<compile_context>
chip_gen: v7x
topology: tpu7x:2x2x1
jax: 0.10.0
libtpu: 0.0.40
codegen_flags: <defaults>
</compile_context>

<pallas_src>
import jax
import jax.numpy as jnp
from jax.experimental import pallas as pl
from jax.experimental.pallas import tpu as pltpu


def _round_up(v, m):
    return ((v + m - 1) // m) * m


def _vmem_capacity_bytes():
    try:
        return int(pltpu.get_tpu_info().vmem_capacity_bytes)
    except Exception:
        return 64 * 1024 * 1024  # conservative fallback (v7x per-TC size)


def _blk_bytes(sublane, lane, nbuf=2, itemsize=4):
    """Bytes one pipelined f32 block really occupies in VMEM ((8,128) padded)."""
    return (nbuf * itemsize
            * _round_up(max(int(sublane), 1), 8)
            * _round_up(max(int(lane), 1), 128))


def _choose_tm(M, Dp, Kp, desired, budget, emit_dist):
    """Largest multiple-of-8 row tile <= desired whose VMEM footprint fits."""
    def footprint(tm):
        total = 0
        total += _blk_bytes(tm, Dp)        # x (double-buffered)
        total += _blk_bytes(Dp, Kp)        # emb (grid-invariant; see TODO)
        total += _blk_bytes(Kp, Dp)        # emb_t
        total += _blk_bytes(1, Kp)         # e2
        total += _blk_bytes(1, tm)         # idx (last two dims of (1,1,tm))
        total += _blk_bytes(tm, Dp)        # quantized
        total += _blk_bytes(1, 1)          # loss partial
        total += _blk_bytes(1, Kp)         # counts partial
        if emit_dist:
            total += _blk_bytes(tm, Kp)    # distances output
        # in-kernel temporaries (dist, enc), single-buffered
        total += 2 * _blk_bytes(tm, Kp, nbuf=1)
        return total

    cap = min(_round_up(desired, 8), _round_up(M, 8))
    best = 8
    t = 8
    while t <= cap:
        if footprint(t) <= budget:
            best = t
        t += 8
    return best


def _make_vq_kernel(tm, m_true, emit_dist, bf16_matmul):
    def _vq_kernel(x_ref, emb_ref, embt_ref, e2_ref, *out_refs):
        if emit_dist:
            idx_ref, quant_ref, loss_ref, counts_ref, dist_ref = out_refs
        else:
            idx_ref, quant_ref, loss_ref, counts_ref = out_refs

        x = x_ref[...]                                         # [tm, Dp] f32
        e = emb_ref[...]                                       # [Dp, Kp] f32
        et = embt_ref[...]                                     # [Kp, Dp] f32
        e2 = e2_ref[...]                                       # [1,  Kp] f32

        # distances = ||x||^2 - 2 x.E + ||E||^2                -> [tm, Kp]
        if bf16_matmul:
            xe = jnp.dot(x.astype(jnp.bfloat16), e.astype(jnp.bfloat16),
                         preferred_element_type=jnp.float32)
        else:
            xe = jnp.dot(x, e, preferred_element_type=jnp.float32)
        x2 = jnp.sum(x * x, axis=1, keepdims=True)
        dist = x2 - 2.0 * xe + e2
        if emit_dist:
            dist_ref[...] = dist

        # nearest code (== torch.argmax(-dist), first occurrence on ties)
        idx = jnp.argmin(dist, axis=1).astype(jnp.int32)       # [tm]
        idx_ref[...] = idx[None, None, :]                      # lane-dense (1,1,tm)

        # one-hot stays kernel-internal (never written to HBM)
        kp = dist.shape[1]
        col = jax.lax.broadcasted_iota(jnp.int32, (tm, kp), 1)
        enc = (col == idx[:, None]).astype(jnp.float32)        # [tm, Kp]

        # codebook gather in MXU-natural orientation: [tm,Kp] @ [Kp,Dp]
        quant = jnp.dot(enc, et, preferred_element_type=jnp.float32)
        quant_ref[...] = quant

        # mask rows added to pad M up to a multiple of tm
        row0 = pl.program_id(0) * tm
        rows = row0 + jax.lax.broadcasted_iota(jnp.int32, (tm, 1), 0)
        valid = (rows < m_true).astype(jnp.float32)            # [tm, 1]

        # per-tile partial reductions (summed in the wrapper; keeps the grid
        # axis parallel — no cross-iteration read-modify-write)
        diff = (quant - x) * valid
        loss_ref[...] = jnp.sum(diff * diff).reshape(1, 1, 1)
        counts_ref[...] = jnp.sum(enc * valid, axis=0)[None, None, :]

    return _vq_kernel


def vector_quantizer_forward(inputs_nchw, embeddings, commitment_cost,
                             return_distances=True, use_bf16_matmul=False,
                             tm_desired=None):
    """Forward pass of VectorQuantizer (PyTorch forward-value parity).

    inputs_nchw: [N, C, H, W] float32, C == embedding_dim
    embeddings : [D, K] float32 codebook
    return_distances: if False, the kernel skips the dominant [M, K] distance
        HBM writeback (dict entry 'distances' is None).
    use_bf16_matmul: feed the distance matmul in bf16 (relaxes exact f32
        distance parity; argmin could flip on near-ties).
    """
    N, C, H, W = inputs_nchw.shape
    D, K = embeddings.shape
    assert C == D

    # PyTorch: inputs.transpose(1, 3) -> [N, W, H, C]; flatten to [M, D].
    x_nwhc = jnp.transpose(inputs_nchw, (0, 3, 2, 1))
    flat_x = x_nwhc.reshape(-1, D).astype(jnp.float32)
    M = flat_x.shape[0]

    # --- pad D (sublane) / K (lane) so vregs, stores and MXU shapes are dense.
    Dp = _round_up(D, 8)
    Kp = _round_up(K, 128)
    emb = embeddings.astype(jnp.float32)
    e2 = jnp.sum(emb * emb, axis=0, keepdims=True)              # [1, K], hoisted
    if Dp != D:
        flat_x = jnp.pad(flat_x, ((0, 0), (0, Dp - D)))
        emb = jnp.pad(emb, ((0, Dp - D), (0, 0)))
    if Kp != K:
        emb = jnp.pad(emb, ((0, 0), (0, Kp - K)))
        # padding codes get a huge norm so argmin never selects them
        e2 = jnp.pad(e2, ((0, 0), (0, Kp - K)),
                     constant_values=jnp.float32(1e30))
    emb_t = emb.T                                               # [Kp, Dp], one-time

    # --- generation-aware VMEM budget and row-tile size
    cap = _vmem_capacity_bytes()
    budget = min((cap * 3) // 4, 96 * 1024 * 1024)   # ~48 MiB v7x, ~96 MiB v5e/v6e
    if tm_desired is None:
        tm_desired = 1024 if cap >= (100 << 20) else 512
    tm = _choose_tm(M, Dp, Kp, tm_desired, budget, return_distances)
    Mp = _round_up(M, tm)
    if Mp != M:
        flat_x = jnp.pad(flat_x, ((0, Mp - M), (0, 0)))
    G = Mp // tm

    out_shapes = [
        jax.ShapeDtypeStruct((G, 1, tm), jnp.int32),     # idx (lane-dense)
        jax.ShapeDtypeStruct((Mp, Dp), jnp.float32),     # quantized (flat, padded D)
        jax.ShapeDtypeStruct((G, 1, 1), jnp.float32),    # per-tile sum((q-x)^2)
        jax.ShapeDtypeStruct((G, 1, Kp), jnp.float32),   # per-tile code counts
    ]
    out_specs = [
        pl.BlockSpec((1, 1, tm), lambda i: (i, 0, 0)),
        pl.BlockSpec((tm, Dp), lambda i: (i, 0)),
        pl.BlockSpec((1, 1, 1), lambda i: (i, 0, 0)),
        pl.BlockSpec((1, 1, Kp), lambda i: (i, 0, 0)),
    ]
    if return_distances:
        out_shapes.append(jax.ShapeDtypeStruct((Mp, Kp), jnp.float32))
        out_specs.append(pl.BlockSpec((tm, Kp), lambda i: (i, 0)))

    grid_spec = pltpu.PrefetchScalarGridSpec(
        num_scalar_prefetch=0,
        grid=(G,),
        in_specs=[
            pl.BlockSpec((tm, Dp), lambda i: (i, 0)),
            pl.BlockSpec((Dp, Kp), lambda i: (0, 0)),
            pl.BlockSpec((Kp, Dp), lambda i: (0, 0)),
            pl.BlockSpec((1, Kp), lambda i: (0, 0)),
        ],
        out_specs=out_specs,
    )
    kernel = _make_vq_kernel(tm, M, return_distances, use_bf16_matmul)
    outs = pl.pallas_call(
        kernel,
        out_shape=tuple(out_shapes),
        grid_spec=grid_spec,
        compiler_params=pltpu.CompilerParams(
            dimension_semantics=("parallel",),
            vmem_limit_bytes=int(min(cap, budget + (8 << 20)))),
    )(flat_x, emb, emb_t, e2)

    if return_distances:
        idx_out, quant_p, loss_part, counts_part, dist_p = outs
    else:
        idx_out, quant_p, loss_part, counts_part = outs
        dist_p = None

    # ---- glue: reductions / un-padding / reshapes (cheap, plain JAX) ----
    sq_sum = jnp.sum(loss_part)
    mse = sq_sum / jnp.float32(M * D)
    # forward value: q_latent_loss + beta * e_latent_loss == (1 + beta) * mse
    loss = mse + jnp.float32(commitment_cost) * mse

    counts = jnp.sum(counts_part, axis=(0, 1))[:K]
    avg_probs = counts / jnp.float32(M)
    perplexity = jnp.exp(-jnp.sum(avg_probs * jnp.log(avg_probs + 1e-10)))

    idx_flat = idx_out.reshape(-1)[:M]
    encodings = jax.nn.one_hot(idx_flat, K, dtype=jnp.float32)  # rebuilt, not stored by kernel
    encoding_indices = idx_flat.reshape(N, W, H)                # inputs.shape[:-1]

    quant_flat = quant_p[:M, :D]
    # straight-through forward value: inputs + sg(q - inputs) == quantized
    quant_nwhc = quant_flat.reshape(N, W, H, D)
    quantized = jnp.transpose(quant_nwhc, (0, 3, 2, 1))         # back to NCHW

    distances = dist_p[:M, :K] if return_distances else None

    return {
        "quantize": quantized,
        "loss": loss,
        "perplexity": perplexity,
        "encodings": encodings,
        "encoding_indices": encoding_indices,
        "distances": distances,
    }


def _reference(inputs_nchw, embeddings, commitment_cost):
    """Pure-JAX reference mirroring the PyTorch forward (for sanity check)."""
    D, K = embeddings.shape
    x = jnp.transpose(inputs_nchw, (0, 3, 2, 1))
    flat = x.reshape(-1, D)
    dist = (jnp.sum(flat ** 2, 1, keepdims=True)
            - 2.0 * flat @ embeddings
            + jnp.sum(embeddings ** 2, 0, keepdims=True))
    idx = jnp.argmax(-dist, axis=1)
    enc = jax.nn.one_hot(idx, K, dtype=jnp.float32)
    quant = embeddings.T[idx]
    mse = jnp.mean((quant.reshape(x.shape) - x) ** 2)
    loss = mse + commitment_cost * mse
    avg = jnp.mean(enc, 0)
    perp = jnp.exp(-jnp.sum(avg * jnp.log(avg + 1e-10)))
    q_nchw = jnp.transpose(quant.reshape(x.shape), (0, 3, 2, 1))
    return q_nchw, loss, perp, dist, idx


if __name__ == "__main__":
    import numpy as np

    # Small shapes: embedding_dim = 4 (channels), num_embeddings = 16
    N, C, H, W = 2, 4, 16, 16
    K = 16
    commitment_cost = 0.25

    key = jax.random.PRNGKey(0)
    k_x, k_e = jax.random.split(key)
    x = jax.random.normal(k_x, (N, C, H, W), dtype=jnp.float32)
    # torch.empty([D, K]).uniform_(-3, 3) equivalent, deterministic
    embeddings = jax.random.uniform(k_e, (C, K), minval=-3.0, maxval=3.0,
                                    dtype=jnp.float32)

    # fast path (default perf): kernel emits no [M,K] distances / one-hot encodings
    out_fast = vector_quantizer_forward(x, embeddings, commitment_cost,
                                        return_distances=False)
    out_fast = jax.tree_util.tree_map(jax.block_until_ready, out_fast)

    # full-parity path (also emits distances for checking module semantics)
    out = vector_quantizer_forward(x, embeddings, commitment_cost,
                                   return_distances=True)
    out = jax.tree_util.tree_map(jax.block_until_ready, out)

    # sanity check against pure-JAX reference
    q_ref, loss_ref, perp_ref, dist_ref, idx_ref = _reference(
        x, embeddings, commitment_cost)
    np.testing.assert_allclose(np.asarray(out["quantize"]), np.asarray(q_ref),
                               rtol=1e-5, atol=1e-5)
    np.testing.assert_allclose(np.asarray(out_fast["quantize"]),
                               np.asarray(q_ref), rtol=1e-5, atol=1e-5)
    np.testing.assert_allclose(np.asarray(out["loss"]), np.asarray(loss_ref),
                               rtol=1e-5, atol=1e-5)
    np.testing.assert_allclose(np.asarray(out_fast["loss"]),
                               np.asarray(loss_ref), rtol=1e-5, atol=1e-5)
    np.testing.assert_allclose(np.asarray(out["perplexity"]),
                               np.asarray(perp_ref), rtol=1e-5, atol=1e-5)
    np.testing.assert_allclose(np.asarray(out["distances"]),
                               np.asarray(dist_ref), rtol=1e-4, atol=1e-4)
    assert np.array_equal(np.asarray(out["encoding_indices"]).reshape(-1),
                          np.asarray(idx_ref))
    assert np.array_equal(np.asarray(out_fast["encoding_indices"]),
                          np.asarray(out["encoding_indices"]))
    assert out["encodings"].shape == (N * H * W, K)
    assert np.array_equal(
        np.asarray(out["encodings"]),
        np.asarray(jax.nn.one_hot(idx_ref, K, dtype=jnp.float32)))

    print("KERNEL_OK")
</pallas_src>

<mosaic_0001>
module attributes {stable_mosaic.version = 11 : i64} {
  func.func @_vq_kernel(%arg0: i32, %arg1: memref<512x8xf32, #tpu.memory_space<vmem>>, %arg2: memref<8x128xf32, #tpu.memory_space<vmem>>, %arg3: memref<128x8xf32, #tpu.memory_space<vmem>>, %arg4: memref<1x128xf32, #tpu.memory_space<vmem>>, %arg5: memref<1x1x512xi32, #tpu.memory_space<vmem>>, %arg6: memref<512x8xf32, #tpu.memory_space<vmem>>, %arg7: memref<1x1x1xf32, #tpu.memory_space<vmem>>, %arg8: memref<1x1x128xf32, #tpu.memory_space<vmem>>) attributes {dimension_semantics = [#tpu.dimension_semantics<parallel>], iteration_bounds = array<i64: 1>, scalar_prefetch = 0 : i64, scratch_operands = 0 : i64, tpu.core_type = #tpu.core_type<tc>, window_params = [{transform_indices = @transform_0, window_bounds = array<i64: 512, 8>}, {pipeline_mode = #tpu.pipeline_mode<synchronous>, transform_indices = @transform_1, window_bounds = array<i64: 8, 128>}, {pipeline_mode = #tpu.pipeline_mode<synchronous>, transform_indices = @transform_2, window_bounds = array<i64: 128, 8>}, {pipeline_mode = #tpu.pipeline_mode<synchronous>, transform_indices = @transform_3, window_bounds = array<i64: 1, 128>}, {transform_indices = @transform_4, window_bounds = array<i64: 1, 1, 512>}, {transform_indices = @transform_5, window_bounds = array<i64: 512, 8>}, {transform_indices = @transform_6, window_bounds = array<i64: 1, 1, 1>}, {transform_indices = @transform_7, window_bounds = array<i64: 1, 1, 128>}]} {
    %c0 = arith.constant 0 : index
    %c0_0 = arith.constant 0 : index
    %0 = vector.load %arg1[%c0, %c0_0] : memref<512x8xf32, #tpu.memory_space<vmem>>, vector<512x8xf32>
    %c0_1 = arith.constant 0 : index
    %c0_2 = arith.constant 0 : index
    %1 = vector.load %arg2[%c0_1, %c0_2] : memref<8x128xf32, #tpu.memory_space<vmem>>, vector<8x128xf32>
    %c0_3 = arith.constant 0 : index
    %c0_4 = arith.constant 0 : index
    %2 = vector.load %arg3[%c0_3, %c0_4] : memref<128x8xf32, #tpu.memory_space<vmem>>, vector<128x8xf32>
    %c0_5 = arith.constant 0 : index
    %c0_6 = arith.constant 0 : index
    %3 = vector.load %arg4[%c0_5, %c0_6] : memref<1x128xf32, #tpu.memory_space<vmem>>, vector<1x128xf32>
    %cst = arith.constant dense<0.000000e+00> : vector<512x128xf32>
    %4 = tpu.matmul %0, %1, %cst {dimension_numbers = #tpu.dot_dimension_numbers<[1], [0], [0], [1], [0, 0, 1, 1], [], []>} : vector<512x8xf32>, vector<8x128xf32>, vector<512x128xf32> -> vector<512x128xf32>
    %5 = arith.mulf %0, %0 : vector<512x8xf32>
    %cst_7 = arith.constant dense<0.000000e+00> : vector<512xf32>
    %6 = vector.multi_reduction <add>, %5, %cst_7 [1] : vector<512x8xf32> to vector<512xf32>
    %7 = vector.shape_cast %6 : vector<512xf32> to vector<512x1xf32>
    %cst_8 = arith.constant 2.000000e+00 : f32
    %8 = vector.broadcast %cst_8 : f32 to vector<512x128xf32>
    %9 = arith.mulf %8, %4 : vector<512x128xf32>
    %10 = vector.broadcast %7 : vector<512x1xf32> to vector<512x128xf32>
    %11 = arith.subf %10, %9 : vector<512x128xf32>
    %12 = vector.broadcast %3 : vector<1x128xf32> to vector<512x128xf32>
    %13 = arith.addf %11, %12 : vector<512x128xf32>
    %14 = tpu.reduce_index %13 {axis = 1 : i32, kind = #tpu.reduction_kind<arg_min>} : vector<512x128xf32> -> vector<512xi32>
    %15 = vector.shape_cast %14 : vector<512xi32> to vector<1x1x512xi32>
    %c0_9 = arith.constant 0 : index
    %c0_10 = arith.constant 0 : index
    %c0_11 = arith.constant 0 : index
    %16 = vector.load %arg5[%c0_9, %c0_10, %c0_11] : memref<1x1x512xi32, #tpu.memory_space<vmem>>, vector<1x1x512xi32>
    tpu.vector_store %arg5[%c0_9, %c0_10, %c0_11], %15 {strides = array<i32>} : memref<1x1x512xi32, #tpu.memory_space<vmem>>, vector<1x1x512xi32>,
    %17 = tpu.iota {dimensions = array<i32: 1>} : vector<512x128xi32>
    %18 = vector.shape_cast %14 : vector<512xi32> to vector<512x1xi32>
    %19 = vector.broadcast %18 : vector<512x1xi32> to vector<512x128xi32>
    %20 = arith.cmpi eq, %17, %19 : vector<512x128xi32>
    %21 = arith.extui %20 : vector<512x128xi1> to vector<512x128xi32>
    %22 = arith.sitofp %21 : vector<512x128xi32> to vector<512x128xf32>
    %cst_12 = arith.constant dense<0.000000e+00> : vector<512x8xf32>
    %23 = tpu.matmul %22, %2, %cst_12 {dimension_numbers = #tpu.dot_dimension_numbers<[1], [0], [0], [1], [0, 0, 1, 1], [], []>} : vector<512x128xf32>, vector<128x8xf32>, vector<512x8xf32> -> vector<512x8xf32>
    %c0_13 = arith.constant 0 : index
    %c0_14 = arith.constant 0 : index
    %24 = vector.load %arg6[%c0_13, %c0_14] : memref<512x8xf32, #tpu.memory_space<vmem>>, vector<512x8xf32>
    tpu.vector_store %arg6[%c0_13, %c0_14], %23 {strides = array<i32>} : memref<512x8xf32, #tpu.memory_space<vmem>>, vector<512x8xf32>,
    %c512_i32 = arith.constant 512 : i32
    %25 = arith.muli %arg0, %c512_i32 : i32
    %26 = tpu.iota {dimensions = array<i32: 0>} : vector<512x1xi32>
    %27 = vector.broadcast %25 : i32 to vector<512x1xi32>
    %28 = arith.addi %27, %26 : vector<512x1xi32>
    %c512_i32_15 = arith.constant 512 : i32
    %29 = vector.broadcast %c512_i32_15 : i32 to vector<512x1xi32>
    %30 = arith.cmpi slt, %28, %29 : vector<512x1xi32>
    %31 = arith.extui %30 : vector<512x1xi1> to vector<512x1xi32>
    %32 = arith.sitofp %31 : vector<512x1xi32> to vector<512x1xf32>
    %33 = arith.subf %23, %0 : vector<512x8xf32>
    %34 = vector.broadcast %32 : vector<512x1xf32> to vector<512x8xf32>
    %35 = arith.mulf %33, %34 : vector<512x8xf32>
    %36 = arith.mulf %35, %35 : vector<512x8xf32>
    %37 = vector.shape_cast %36 : vector<512x8xf32> to vector<1x512x8xf32>
    %cst_16 = arith.constant dense<0.000000e+00> : vector<1xf32>
    %38 = vector.multi_reduction <add>, %37, %cst_16 [1, 2] : vector<1x512x8xf32> to vector<1xf32>
    %39 = vector.shape_cast %38 : vector<1xf32> to vector<1x1x1xf32>
    %40 = vector.extract %39[0, 0, 0] : f32 from vector<1x1x1xf32>
    %41 = vector.broadcast %40 : f32 to vector<1x1x1xf32>
    %c0_17 = arith.constant 0 : index
    %c0_18 = arith.constant 0 : index
    %c0_19 = arith.constant 0 : index
    %42 = vector.load %arg7[%c0_17, %c0_18, %c0_19] : memref<1x1x1xf32, #tpu.memory_space<vmem>>, vector<1x1x1xf32>
    tpu.vector_store %arg7[%c0_17, %c0_18, %c0_19], %41 {strides = array<i32>} : memref<1x1x1xf32, #tpu.memory_space<vmem>>, vector<1x1x1xf32>,
    %43 = vector.broadcast %32 : vector<512x1xf32> to vector<512x128xf32>
    %44 = arith.mulf %22, %43 : vector<512x128xf32>
    %cst_20 = arith.constant dense<0.000000e+00> : vector<128xf32>
    %45 = vector.multi_reduction <add>, %44, %cst_20 [0] : vector<512x128xf32> to vector<128xf32>
    %46 = vector.shape_cast %45 : vector<128xf32> to vector<1x1x128xf32>
    %c0_21 = arith.constant 0 : index
    %c0_22 = arith.constant 0 : index
    %c0_23 = arith.constant 0 : index
    %47 = vector.load %arg8[%c0_21, %c0_22, %c0_23] : memref<1x1x128xf32, #tpu.memory_space<vmem>>, vector<1x1x128xf32>
    tpu.vector_store %arg8[%c0_21, %c0_22, %c0_23], %46 {strides = array<i32>} : memref<1x1x128xf32, #tpu.memory_space<vmem>>, vector<1x1x128xf32>,
    return
  }
  func.func @transform_0(%arg0: i32) -> (i32, i32) {
    %c0_i32 = arith.constant 0 : i32
    %c0_i32_0 = arith.constant 0 : i32
    return %arg0, %c0_i32 : i32, i32
  }
  func.func @transform_1(%arg0: i32) -> (i32, i32) {
    %c0_i32 = arith.constant 0 : i32
    %c0_i32_0 = arith.constant 0 : i32
    %c0_i32_1 = arith.constant 0 : i32
    return %c0_i32, %c0_i32_0 : i32, i32
  }
  func.func @transform_2(%arg0: i32) -> (i32, i32) {
    %c0_i32 = arith.constant 0 : i32
    %c0_i32_0 = arith.constant 0 : i32
    %c0_i32_1 = arith.constant 0 : i32
    return %c0_i32, %c0_i32_0 : i32, i32
  }
  func.func @transform_3(%arg0: i32) -> (i32, i32) {
    %c0_i32 = arith.constant 0 : i32
    %c0_i32_0 = arith.constant 0 : i32
    %c0_i32_1 = arith.constant 0 : i32
    return %c0_i32, %c0_i32_0 : i32, i32
  }
  func.func @transform_4(%arg0: i32) -> (i32, i32, i32) {
    %c0_i32 = arith.constant 0 : i32
    %c0_i32_0 = arith.constant 0 : i32
    %c0_i32_1 = arith.constant 0 : i32
    return %arg0, %c0_i32, %c0_i32_0 : i32, i32, i32
  }
  func.func @transform_5(%arg0: i32) -> (i32, i32) {
    %c0_i32 = arith.constant 0 : i32
    %c0_i32_0 = arith.constant 0 : i32
    return %arg0, %c0_i32 : i32, i32
  }
  func.func @transform_6(%arg0: i32) -> (i32, i32, i32) {
    %c0_i32 = arith.constant 0 : i32
    %c0_i32_0 = arith.constant 0 : i32
    %c0_i32_1 = arith.constant 0 : i32
    return %arg0, %c0_i32, %c0_i32_0 : i32, i32, i32
  }
  func.func @transform_7(%arg0: i32) -> (i32, i32, i32) {
    %c0_i32 = arith.constant 0 : i32
    %c0_i32_0 = arith.constant 0 : i32
    %c0_i32_1 = arith.constant 0 : i32
    return %arg0, %c0_i32, %c0_i32_0 : i32, i32, i32
  }
}

</mosaic_0001>

<bundles_post_ra>
// kernel: tpu_custom_call.1
= control target key start
LH: loop header
LB: loop body
LE: loop exit
PB: predicated region body
PF: predicated region fallthrough
CT: control target
= control target key end

     0   :  { %13 = vsyncpa [#allocation3], 0  ;;  %vm105_vm0 = vcmask 64512   ;;  %s12843_s0 = inlined_call_operand.vmem [shape: f32[512,8], index: 0, kind: input, shape index: {}]   ;;  %s12844_s1 = inlined_call_operand.vmem [shape: f32[8,128], index: 1, kind: input, shape index: {}]   ;;  %s12845_s2 = inlined_call_operand.vmem [shape: f32[128,8], index: 2, kind: input, shape index: {}]   ;;  %s12846_s3 = inlined_call_operand.vmem [shape: f32[1,128], index: 3, kind: input, shape index: {}]   ;;  %s12847_s4 = inlined_call_operand.hbm [shape: s32[1,1,512], index: 4, kind: output, shape index: {0}]   ;;  %s12848_s5 = inlined_call_operand.vmem [shape: f32[512,8], index: 5, kind: output, shape index: {1}]   ;;  %s12849_s6 = inlined_call_operand.hbm [shape: f32[1,1,1], index: 6, kind: output, shape index: {2}]   ;;  %s12850_s7 = inlined_call_operand.hbm [shape: f32[1,1,128], index: 7, kind: output, shape index: {3}]  }
   0x1   :  { %v87_v0 = vld [vmem:[%s12844_s1] sm:$0xff]  ;;  %v24_v2 = vld [vmem:[%s12843_s0 + $0x8] sm:$0xff]  ;;  %v25_v3 = vld [vmem:[%s12843_s0 + $0x10] sm:$0xff] }
   0x2   :  { %v23_v1 = vld [vmem:[%s12843_s0] sm:$0xff]  ;;  %8830 = vmatprep.subr.mxu0 %v87_v0  ;;  %v26_v4 = vld [vmem:[%s12843_s0 + $0x18] sm:$0xff]  ;;  %v684_v6 = vmul.f32 %v24_v2, %v24_v2  ;;  %v685_v7 = vmul.f32 %v25_v3, %v25_v3  ;;  %v28_v12 = vld [vmem:[%s12843_s0 + $0x28] sm:$0xff] }
   0x3   :  { %8832 = vmatprep.mubr.msk.f32.mxu0 %vm105_vm0, %v23_v1  ;;  %v683_v5 = vmul.f32 %v23_v1, %v23_v1  ;;  %8831 = vmatpush3.msra.mxu0 %v87_v0  ;;  %v686_v8 = vmul.f32 %v26_v4, %v26_v4  ;;  %v27_v10 = vld [vmem:[%s12843_s0 + $0x20] sm:$0xff]  ;;  %v688_v16 = vmul.f32 %v28_v12, %v28_v12  ;;  %v29_v17 = vld [vmem:[%s12843_s0 + $0x30] sm:$0xff]  ;;  %v30_v18 = vld [vmem:[%s12843_s0 + $0x38] sm:$0xff] }
   0x4   :  { %8833 = vmatmul.mubr.msk.f32.vlgmr.msra.gmra.mrb[0].mxu0 %vm105_vm0, %v24_v2  ;;  %v753_v11 = vsel %vm105_vm0, %v685_v7, 0.0  ;;  %v750_v13 = vsel %vm105_vm0, %v684_v6, 0.0  ;;  %v687_v14 = vmul.f32 %v27_v10, %v27_v10  ;;  %v689_v20 = vmul.f32 %v29_v17, %v29_v17  ;;  %v31_v23 = vld [vmem:[%s12843_s0 + $0x40] sm:$0xff]  ;;  %v32_v24 = vld [vmem:[%s12843_s0 + $0x48] sm:$0xff]  ;;  %v33_v29 = vld [vmem:[%s12843_s0 + $0x50] sm:$0xff] }
   0x5   :  { %v747_v9 = vsel %vm105_vm0, %v683_v5, 0.0  ;;  %8835 = vmatprep.mubr.msk.f32.mxu0 %vm105_vm0, %v25_v3  ;;  %754 = vadd.xlane.f32.xlu1 %v753_v11  ;;  %v756_v15 = vsel %vm105_vm0, %v686_v8, 0.0  ;;  %v762_v21 = vsel %vm105_vm0, %v688_v16, 0.0  ;;  %v690_v22 = vmul.f32 %v30_v18, %v30_v18  ;;  %v34_v30 = vld [vmem:[%s12843_s0 + $0x58] sm:$0xff]  ;;  %v35_v35 = vld [vmem:[%s12843_s0 + $0x60] sm:$0xff]  ;;  %v36_v36 = vld [vmem:[%s12843_s0 + $0x68] sm:$0xff] }
   0x6   :  { %748 = vadd.xlane.f32.xlu0 %v747_v9  ;;  %v759_v19 = vsel %vm105_vm0, %v687_v14, 0.0  ;;  %v765_v25 = vsel %vm105_vm0, %v689_v20, 0.0  ;;  %v691_v26 = vmul.f32 %v31_v23, %v31_v23  ;;  %v692_v28 = vmul.f32 %v32_v24, %v32_v24 }
   0x7   :  { %v768_v27 = vsel %vm105_vm0, %v690_v22, 0.0  ;;  %v693_v32 = vmul.f32 %v33_v29, %v33_v29  ;;  %v694_v34 = vmul.f32 %v34_v30, %v34_v30  ;;  %v695_v38 = vmul.f32 %v35_v35, %v35_v35 }
   0x8   :  { %8836 = vmatmul.mubr.msk.f32.gmra.mrb[2].mxu0 %vm105_vm0, %v26_v4  ;;  %v771_v31 = vsel %vm105_vm0, %v691_v26, 0.0  ;;  %v774_v33 = vsel %vm105_vm0, %v692_v28, 0.0  ;;  %v696_v40 = vmul.f32 %v36_v36, %v36_v36 }
   0x9   :  { %8838 = vmatprep.mubr.msk.f32.mxu0 %vm105_vm0, %v27_v10  ;;  %757 = vadd.xlane.f32.xlu1 %v756_v15  ;;  %v777_v37 = vsel %vm105_vm0, %v693_v32, 0.0  ;;  %v780_v39 = vsel %vm105_vm0, %v694_v34, 0.0 }
   0xa   :  { %751 = vadd.xlane.f32.xlu0 %v750_v13 }
   0xc   :  { %8839 = vmatmul.mubr.msk.f32.gmra.mrb[4].mxu0 %vm105_vm0, %v28_v12 }
   0xd   :  { %8841 = vmatprep.mubr.msk.f32.mxu0 %vm105_vm0, %v29_v17  ;;  %763 = vadd.xlane.f32.xlu1 %v762_v21 }
   0xe   :  { %760 = vadd.xlane.f32.xlu0 %v759_v19 }
  0x10   :  { %8842 = vmatmul.mubr.msk.f32.gmra.mrb[6].mxu0 %vm105_vm0, %v30_v18 }
  0x11   :  { %8844 = vmatprep.mubr.msk.f32.mxu0 %vm105_vm0, %v31_v23  ;;  %769 = vadd.xlane.f32.xlu1 %v768_v27 }
  0x12   :  { %766 = vadd.xlane.f32.xlu0 %v765_v25 }
  0x14   :  { %8845 = vmatmul.mubr.msk.f32.gmra.mrb[8].mxu0 %vm105_vm0, %v32_v24 }
  0x15   :  { %8847 = vmatprep.mubr.msk.f32.mxu0 %vm105_vm0, %v33_v29  ;;  %775 = vadd.xlane.f32.xlu1 %v774_v33 }
  0x16   :  { %772 = vadd.xlane.f32.xlu0 %v771_v31 }
  0x17   :  { %14 = vsyncpa [#allocation5], 0  ;;  %v37_v41 = vld [vmem:[%s12843_s0 + $0x70] sm:$0xff]  ;;  %v38_v42 = vld [vmem:[%s12843_s0 + $0x78] sm:$0xff]  ;;  %v783_v43 = vsel %vm105_vm0, %v695_v38, 0.0  ;;  %v786_v45 = vsel %vm105_vm0, %v696_v40, 0.0 }
  0x18   :  { %8848 = vmatmul.mubr.msk.f32.gmra.mrb[10].mxu0 %vm105_vm0, %v34_v30  ;;  %v697_v44 = vmul.f32 %v37_v41, %v37_v41  ;;  %v698_v46 = vmul.f32 %v38_v42, %v38_v42  ;;  %v39_v47 = vld [vmem:[%s12843_s0 + $0x80] sm:$0xff]  ;;  %v40_v48 = vld [vmem:[%s12843_s0 + $0x88] sm:$0xff]  ;;  %v41_v53 = vld [vmem:[%s12843_s0 + $0x90] sm:$0xff] }
  0x19   :  { %8850 = vmatprep.mubr.msk.f32.mxu0 %vm105_vm0, %v35_v35  ;;  %781 = vadd.xlane.f32.xlu1 %v780_v39  ;;  %v699_v50 = vmul.f32 %v39_v47, %v39_v47  ;;  %v700_v52 = vmul.f32 %v40_v48, %v40_v48  ;;  %v42_v54 = vld [vmem:[%s12843_s0 + $0x98] sm:$0xff]  ;;  %v701_v56 = vmul.f32 %v41_v53, %v41_v53  ;;  %v43_v59 = vld [vmem:[%s12843_s0 + $0xa0] sm:$0xff]  ;;  %v44_v60 = vld [vmem:[%s12843_s0 + $0xa8] sm:$0xff] }
  0x1a   :  { %778 = vadd.xlane.f32.xlu0 %v777_v37  ;;  %v789_v49 = vsel %vm105_vm0, %v697_v44, 0.0  ;;  %v792_v51 = vsel %vm105_vm0, %v698_v46, 0.0  ;;  %v702_v58 = vmul.f32 %v42_v54, %v42_v54  ;;  %v703_v62 = vmul.f32 %v43_v59, %v43_v59  ;;  %v45_v1 = vld [vmem:[%s12843_s0 + $0xb0] sm:$0xff]  ;;  %v46_v2 = vld [vmem:[%s12843_s0 + $0xb8] sm:$0xff]  ;;  %v47_v7 = vld [vmem:[%s12843_s0 + $0xc0] sm:$0xff] }
  0x1b   :  { %v795_v55 = vsel %vm105_vm0, %v699_v50, 0.0  ;;  %v798_v57 = vsel %vm105_vm0, %v700_v52, 0.0  ;;  %v801_v61 = vsel %vm105_vm0, %v701_v56, 0.0  ;;  %v704_v0 = vmul.f32 %v44_v60, %v44_v60  ;;  %v48_v8 = vld [vmem:[%s12843_s0 + $0xc8] sm:$0xff]  ;;  %v49_v13 = vld [vmem:[%s12843_s0 + $0xd0] sm:$0xff]  ;;  %v50_v14 = vld [vmem:[%s12843_s0 + $0xd8] sm:$0xff] }
  0x1c   :  { %8851 = vmatmul.mubr.msk.f32.gmra.mrb[12].mxu0 %vm105_vm0, %v36_v36  ;;  %v804_v63 = vsel %vm105_vm0, %v702_v58, 0.0  ;;  %v807_v3 = vsel %vm105_vm0, %v703_v62, 0.0  ;;  %v705_v4 = vmul.f32 %v45_v1, %v45_v1  ;;  %v706_v6 = vmul.f32 %v46_v2, %v46_v2  ;;  %v51_v19 = vld [vmem:[%s12843_s0 + $0xe0] sm:$0xff]  ;;  %v52_v20 = vld [vmem:[%s12843_s0 + $0xe8] sm:$0xff]  ;;  %v53_v25 = vld [vmem:[%s12843_s0 + $0xf0] sm:$0xff] }
  0x1d   :  { %8853 = vmatprep.mubr.msk.f32.mxu0 %vm105_vm0, %v37_v41  ;;  %787 = vadd.xlane.f32.xlu1 %v786_v45  ;;  %v810_v5 = vsel %vm105_vm0, %v704_v0, 0.0  ;;  %v707_v10 = vmul.f32 %v47_v7, %v47_v7  ;;  %v708_v12 = vmul.f32 %v48_v8, %v48_v8  ;;  %v709_v16 = vmul.f32 %v49_v13, %v49_v13  ;;  %v54_v26 = vld [vmem:[%s12843_s0 + $0xf8] sm:$0xff]  ;;  %v55_v31 = vld [vmem:[%s12843_s0 + $0x100] sm:$0xff]  ;;  %v56_v32 = vld [vmem:[%s12843_s0 + $0x108] sm:$0xff] }
  0x1e   :  { %784 = vadd.xlane.f32.xlu0 %v783_v43  ;;  %v813_v9 = vsel %vm105_vm0, %v705_v4, 0.0  ;;  %v816_v11 = vsel %vm105_vm0, %v706_v6, 0.0  ;;  %v710_v18 = vmul.f32 %v50_v14, %v50_v14  ;;  %v711_v22 = vmul.f32 %v51_v19, %v51_v19  ;;  %v57_v37 = vld [vmem:[%s12843_s0 + $0x110] sm:$0xff]  ;;  %v58_v38 = vld [vmem:[%s12843_s0 + $0x118] sm:$0xff]  ;;  %v59_v43 = vld [vmem:[%s12843_s0 + $0x120] sm:$0xff] }
  0x1f   :  { %v819_v15 = vsel %vm105_vm0, %v707_v10, 0.0  ;;  %v822_v17 = vsel %vm105_vm0, %v708_v12, 0.0  ;;  %v825_v21 = vsel %vm105_vm0, %v709_v16, 0.0  ;;  %v712_v24 = vmul.f32 %v52_v20, %v52_v20  ;;  %v60_v44 = vld [vmem:[%s12843_s0 + $0x128] sm:$0xff]  ;;  %v65_v58 = vld [vmem:[%s12843_s0 + $0x150] sm:$0xff]  ;;  %v67_v62 = vld [vmem:[%s12843_s0 + $0x160] sm:$0xff] }
  0x20   :  { %8854 = vmatmul.mubr.msk.f32.gmra.mrb[14].mxu0 %vm105_vm0, %v38_v42  ;;  %v828_v23 = vsel %vm105_vm0, %v710_v18, 0.0  ;;  %v831_v27 = vsel %vm105_vm0, %v711_v22, 0.0  ;;  %v713_v28 = vmul.f32 %v53_v25, %v53_v25  ;;  %v714_v30 = vmul.f32 %v54_v26, %v54_v26  ;;  %v71_v6 = vld [vmem:[%s12843_s0 + $0x180] sm:$0xff]  ;;  %v73_v10 = vld [vmem:[%s12843_s0 + $0x190] sm:$0xff] }
  0x21   :  { %8856 = vmatprep.mubr.msk.f32.mxu0 %vm105_vm0, %v39_v47  ;;  %793 = vadd.xlane.f32.xlu1 %v792_v51  ;;  %v834_v29 = vsel %vm105_vm0, %v712_v24, 0.0  ;;  %v715_v34 = vmul.f32 %v55_v31, %v55_v31  ;;  %v716_v36 = vmul.f32 %v56_v32, %v56_v32  ;;  %v717_v40 = vmul.f32 %v57_v37, %v57_v37  ;;  %v77_v18 = vld [vmem:[%s12843_s0 + $0x1b0] sm:$0xff]  ;;  %v79_v22 = vld [vmem:[%s12843_s0 + $0x1c0] sm:$0xff] }
  0x22   :  { %790 = vadd.xlane.f32.xlu0 %v789_v49  ;;  %v837_v33 = vsel %vm105_vm0, %v713_v28, 0.0  ;;  %v840_v35 = vsel %vm105_vm0, %v714_v30, 0.0  ;;  %v718_v42 = vmul.f32 %v58_v38, %v58_v38  ;;  %v719_v46 = vmul.f32 %v59_v43, %v59_v43  ;;  %v61_v49 = vld [vmem:[%s12843_s0 + $0x130] sm:$0xff]  ;;  %v83_v30 = vld [vmem:[%s12843_s0 + $0x1e0] sm:$0xff] }
  0x23   :  { %v843_v39 = vsel %vm105_vm0, %v715_v34, 0.0  ;;  %v846_v41 = vsel %vm105_vm0, %v716_v36, 0.0  ;;  %v849_v45 = vsel %vm105_vm0, %v717_v40, 0.0  ;;  %v721_v51 = vmul.f32 %v61_v49, %v61_v49  ;;  %v85_v34 = vld [vmem:[%s12843_s0 + $0x1f0] sm:$0xff] }
  0x24   :  { %8857 = vmatmul.mubr.msk.f32.gmra.mrb[16].mxu0 %vm105_vm0, %v40_v48  ;;  %v852_v47 = vsel %vm105_vm0, %v718_v42, 0.0  ;;  %v720_v48 = vmul.f32 %v60_v44, %v60_v44  ;;  %v855_v50 = vsel %vm105_vm0, %v719_v46, 0.0  ;;  %v725_v4 = vmul.f32 %v65_v58, %v65_v58 }
  0x25   :  { %8859 = vmatprep.mubr.msk.f32.mxu0 %vm105_vm0, %v41_v53  ;;  %799 = vadd.xlane.f32.xlu1 %v798_v57  ;;  %v62_v53 = vld [vmem:[%s12843_s0 + $0x138] sm:$0xff]  ;;  %v64_v57 = vld [vmem:[%s12843_s0 + $0x148] sm:$0xff]  ;;  %v727_v12 = vmul.f32 %v67_v62, %v67_v62  ;;  %v731_v28 = vmul.f32 %v71_v6, %v71_v6  ;;  %v733_v36 = vmul.f32 %v73_v10, %v73_v10 }
  0x26   :  { %796 = vadd.xlane.f32.xlu0 %v795_v55  ;;  %v858_v52 = vsel %vm105_vm0, %v720_v48, 0.0  ;;  %v861_v55 = vsel %vm105_vm0, %v721_v51, 0.0  ;;  %v722_v56 = vmul.f32 %v62_v53, %v62_v53  ;;  %v724_v0 = vmul.f32 %v64_v57, %v64_v57 }
  0x28   :  { %8860 = vmatmul.mubr.msk.f32.gmra.mrb[18].mxu0 %vm105_vm0, %v42_v54  ;;  %v63_v54 = vld [vmem:[%s12843_s0 + $0x140] sm:$0xff] }
  0x29   :  { %8862 = vmatprep.mubr.msk.f32.mxu0 %vm105_vm0, %v43_v59  ;;  %805 = vadd.xlane.f32.xlu1 %v804_v63  ;;  %v864_v59 = vsel %vm105_vm0, %v722_v56, 0.0 }
  0x2a   :  { %802 = vadd.xlane.f32.xlu0 %v801_v61  ;;  %v66_v61 = vld [vmem:[%s12843_s0 + $0x158] sm:$0xff] }
  0x2c   :  { %8863 = vmatmul.mubr.msk.f32.gmra.mrb[20].mxu0 %vm105_vm0, %v44_v60  ;;  %v723_v60 = vmul.f32 %v63_v54, %v63_v54 }
  0x2d   :  { %8865 = vmatprep.mubr.msk.f32.mxu0 %vm105_vm0, %v45_v1  ;;  %811 = vadd.xlane.f32.xlu1 %v810_v5  ;;  %v68_v1 = vld [vmem:[%s12843_s0 + $0x168] sm:$0xff]  ;;  %v70_v5 = vld [vmem:[%s12843_s0 + $0x178] sm:$0xff] }
  0x2e   :  { %808 = vadd.xlane.f32.xlu0 %v807_v3  ;;  %v867_v63 = vsel %vm105_vm0, %v723_v60, 0.0  ;;  %v870_v3 = vsel %vm105_vm0, %v724_v0, 0.0  ;;  %v728_v16 = vmul.f32 %v68_v1, %v68_v1  ;;  %v730_v24 = vmul.f32 %v70_v5, %v70_v5  ;;  %v89_v0 = vld [vmem:[%s12845_s2 + $0x8] sm:$0xff] }
  0x30   :  { %8866 = vmatmul.mubr.msk.f32.gmra.mrb[22].mxu0 %vm105_vm0, %v46_v2  ;;  %v69_v2 = vld [vmem:[%s12843_s0 + $0x170] sm:$0xff] }
  0x31   :  { %8868 = vmatprep.mubr.msk.f32.mxu0 %vm105_vm0, %v47_v7  ;;  %817 = vadd.xlane.f32.xlu1 %v816_v11  ;;  %v873_v7 = vsel %vm105_vm0, %v725_v4, 0.0 }
  0x32   :  { %814 = vadd.xlane.f32.xlu0 %v813_v9  ;;  %v72_v9 = vld [vmem:[%s12843_s0 + $0x188] sm:$0xff] }
  0x34   :  { %8869 = vmatmul.mubr.msk.f32.gmra.mrb[24].mxu0 %vm105_vm0, %v48_v8  ;;  %v726_v8 = vmul.f32 %v66_v61, %v66_v61 }
  0x35   :  { %8871 = vmatprep.mubr.msk.f32.mxu0 %vm105_vm0, %v49_v13  ;;  %823 = vadd.xlane.f32.xlu1 %v822_v17  ;;  %v74_v13 = vld [vmem:[%s12843_s0 + $0x198] sm:$0xff]  ;;  %v76_v17 = vld [vmem:[%s12843_s0 + $0x1a8] sm:$0xff] }
  0x36   :  { %820 = vadd.xlane.f32.xlu0 %v819_v15  ;;  %v876_v11 = vsel %vm105_vm0, %v726_v8, 0.0  ;;  %v879_v15 = vsel %vm105_vm0, %v727_v12, 0.0  ;;  %v91_v12 = vld [vmem:[%s12845_s2 + $0x18] sm:$0xff] }
  0x38   :  { %8872 = vmatmul.mubr.msk.f32.gmra.mrb[26].mxu0 %vm105_vm0, %v50_v14  ;;  %v75_v14 = vld [vmem:[%s12843_s0 + $0x1a0] sm:$0xff] }
  0x39   :  { %8874 = vmatprep.mubr.msk.f32.mxu0 %vm105_vm0, %v51_v19  ;;  %829 = vadd.xlane.f32.xlu1 %v828_v23  ;;  %v882_v19 = vsel %vm105_vm0, %v728_v16, 0.0 }
  0x3a   :  { %826 = vadd.xlane.f32.xlu0 %v825_v21  ;;  %v78_v21 = vld [vmem:[%s12843_s0 + $0x1b8] sm:$0xff] }
  0x3c   :  { %8875 = vmatmul.mubr.msk.f32.gmra.mrb[28].mxu0 %vm105_vm0, %v52_v20  ;;  %v729_v20 = vmul.f32 %v69_v2, %v69_v2 }
  0x3d   :  { %8877 = vmatprep.mubr.msk.f32.mxu0 %vm105_vm0, %v53_v25  ;;  %835 = vadd.xlane.f32.xlu1 %v834_v29  ;;  %v80_v25 = vld [vmem:[%s12843_s0 + $0x1c8] sm:$0xff]  ;;  %v82_v29 = vld [vmem:[%s12843_s0 + $0x1d8] sm:$0xff] }
  0x3e   :  { %832 = vadd.xlane.f32.xlu0 %v831_v27  ;;  %v885_v23 = vsel %vm105_vm0, %v729_v20, 0.0  ;;  %v888_v27 = vsel %vm105_vm0, %v730_v24, 0.0  ;;  %v93_v20 = vld [vmem:[%s12845_s2 + $0x28] sm:$0xff] }
  0x40   :  { %8878 = vmatmul.mubr.msk.f32.gmra.mrb[30].mxu0 %vm105_vm0, %v54_v26  ;;  %v81_v26 = vld [vmem:[%s12843_s0 + $0x1d0] sm:$0xff] }
  0x41   :  { %8880 = vmatprep.mubr.msk.f32.mxu0 %vm105_vm0, %v55_v31  ;;  %841 = vadd.xlane.f32.xlu1 %v840_v35  ;;  %v891_v31 = vsel %vm105_vm0, %v731_v28, 0.0  ;;  %v741_v56 = vmul.f32 %v81_v26, %v81_v26 }
  0x42   :  { %838 = vadd.xlane.f32.xlu0 %v837_v33  ;;  %v84_v33 = vld [vmem:[%s12843_s0 + $0x1e8] sm:$0xff] }
  0x43   :  { %v744_v4 = vmul.f32 %v84_v33, %v84_v33 }
  0x44   :  { %8881 = vmatmul.mubr.msk.f32.gmra.mrb[32].mxu0 %vm105_vm0, %v56_v32  ;;  %v732_v32 = vmul.f32 %v72_v9, %v72_v9 }
  0x45   :  { %8883 = vmatprep.mubr.msk.f32.mxu0 %vm105_vm0, %v57_v37  ;;  %847 = vadd.xlane.f32.xlu1 %v846_v41  ;;  %v86_v37 = vld [vmem:[%s12843_s0 + $0x1f8] sm:$0xff]  ;;  %v735_v41 = vmul.f32 %v75_v14, %v75_v14 }
  0x46   :  { %844 = vadd.xlane.f32.xlu0 %v843_v39  ;;  %v894_v35 = vsel %vm105_vm0, %v732_v32, 0.0  ;;  %v734_v39 = vmul.f32 %v74_v13, %v74_v13 }
  0x47   :  { %v903_v42 = vsel %vm105_vm0, %v735_v41, 0.0 }
  0x48   :  { %8884 = vmatmul.mubr.msk.f32.gmra.mrb[34].mxu0 %vm105_vm0, %v58_v38  ;;  %v897_v38 = vsel %vm105_vm0, %v733_v36, 0.0  ;;  %v900_v40 = vsel %vm105_vm0, %v734_v39, 0.0  ;;  %v9683_v36 = vld [vmem:[%s12846_s3] ss:$0 sm:$0xff] }
  0x49   :  { %8886 = vmatprep.mubr.msk.f32.mxu0 %vm105_vm0, %v59_v43  ;;  %853 = vadd.xlane.f32.xlu1 %v852_v47  ;;  %v736_v43 = vmul.f32 %v76_v17, %v76_v17  ;;  %v738_v47 = vmul.f32 %v78_v21, %v78_v21 }
  0x4a   :  { %850 = vadd.xlane.f32.xlu0 %v849_v45  ;;  %v737_v45 = vmul.f32 %v77_v18, %v77_v18 }
  0x4c   :  { %8887 = vmatmul.mubr.msk.f32.gmra.mrb[36].mxu0 %vm105_vm0, %v60_v44  ;;  %v906_v44 = vsel %vm105_vm0, %v736_v43, 0.0  ;;  %v909_v46 = vsel %vm105_vm0, %v737_v45, 0.0 }
  0x4d   :  { %8889 = vmatprep.mubr.msk.f32.mxu0 %vm105_vm0, %v61_v49  ;;  %859 = vadd.xlane.f32.xlu1 %v858_v52  ;;  %v912_v49 = vsel %vm105_vm0, %v738_v47, 0.0  ;;  %v96_v47 = vld [vmem:[%s12845_s2 + $0x40] sm:$0xff] }
  0x4e   :  { %856 = vadd.xlane.f32.xlu0 %v855_v50  ;;  %v739_v50 = vmul.f32 %v79_v22, %v79_v22 }
  0x50   :  { %8890 = vmatmul.mubr.msk.f32.gmra.mrb[38].mxu0 %vm105_vm0, %v62_v53  ;;  %v915_v52 = vsel %vm105_vm0, %v739_v50, 0.0  ;;  %v740_v53 = vmul.f32 %v80_v25, %v80_v25 }
  0x51   :  { %8892 = vmatprep.mubr.msk.f32.mxu0 %vm105_vm0, %v63_v54 }
  0x52   :  { %862 = vadd.xlane.f32.xlu0 %v861_v55  ;;  %v918_v55 = vsel %vm105_vm0, %v740_v53, 0.0 }
  0x54   :  { %8893 = vmatmul.mubr.msk.f32.gmra.mrb[40].mxu0 %vm105_vm0, %v64_v57 }
  0x55   :  { %8895 = vmatprep.mubr.msk.f32.mxu0 %vm105_vm0, %v65_v58  ;;  %v921_v58 = vsel %vm105_vm0, %v741_v56, 0.0 }
  0x56   :  { %865 = vadd.xlane.f32.xlu0 %v864_v59  ;;  %v742_v59 = vmul.f32 %v82_v29, %v82_v29 }
  0x58   :  { %8896 = vmatmul.mubr.msk.f32.gmra.mrb[42].mxu0 %vm105_vm0, %v66_v61  ;;  %v924_v61 = vsel %vm105_vm0, %v742_v59, 0.0  ;;  %v98_v59 = vld [vmem:[%s12845_s2 + $0x50] sm:$0xff] }
  0x59   :  { %8898 = vmatprep.mubr.msk.f32.mxu0 %vm105_vm0, %v67_v62  ;;  %v743_v62 = vmul.f32 %v83_v30, %v83_v30 }
  0x5a   :  { %868 = vadd.xlane.f32.xlu0 %v867_v63  ;;  %v88_v63 = vld [vmem:[%s12845_s2] sm:$0xff] }
  0x5c   :  { %8899 = vmatmul.mubr.msk.f32.gmra.mrb[44].mxu0 %vm105_vm0, %v68_v1  ;;  %v9056_v1 = vpack.c.bf16 %v89_v0, %v88_v63 }
  0x5d   :  { %8901 = vmatprep.mubr.msk.f32.mxu0 %vm105_vm0, %v69_v2 }
  0x5e   :  { %871 = vadd.xlane.f32.xlu0 %v870_v3  ;;  %v927_v3 = vsel %vm105_vm0, %v743_v62, 0.0  ;;  %9057 = vmatprep.subr.bf16.mxu0 %v9056_v1 }
  0x5f   :  { %9088 = vmatprep.subr.bf16.mxu1 %v9056_v1  ;;  %9059 = vmatpush3.bf16.msra.mxu0 %v9056_v1 }
  0x60   :  { %8902 = vmatmul.mubr.msk.f32.gmra.mrb[46].mxu0 %vm105_vm0, %v70_v5  ;;  %9096 = vmatpush3.bf16.msra.mxu1 %v9056_v1 }
  0x61   :  { %8904 = vmatprep.mubr.msk.f32.mxu0 %vm105_vm0, %v71_v6  ;;  %v930_v6 = vsel %vm105_vm0, %v744_v4, 0.0 }
  0x62   :  { %874 = vadd.xlane.f32.xlu0 %v873_v7  ;;  %v745_v7 = vmul.f32 %v85_v34, %v85_v34 }
  0x64   :  { %8905 = vmatmul.mubr.msk.f32.gmra.mrb[48].mxu0 %vm105_vm0, %v72_v9  ;;  %v933_v9 = vsel %vm105_vm0, %v745_v7, 0.0  ;;  %v100_v7 = vld [vmem:[%s12845_s2 + $0x60] sm:$0xff] }
  0x65   :  { %8907 = vmatprep.mubr.msk.f32.mxu0 %vm105_vm0, %v73_v10  ;;  %v746_v10 = vmul.f32 %v86_v37, %v86_v37 }
  0x66   :  { %877 = vadd.xlane.f32.xlu0 %v876_v11  ;;  %v90_v11 = vld [vmem:[%s12845_s2 + $0x10] sm:$0xff] }
  0x68   :  { %8908 = vmatmul.mubr.msk.f32.gmra.mrb[50].mxu0 %vm105_vm0, %v74_v13  ;;  %v9060_v13 = vpack.c.bf16 %v91_v12, %v90_v11 }
  0x69   :  { %8910 = vmatprep.mubr.msk.f32.mxu0 %vm105_vm0, %v75_v14 }
  0x6a   :  { %880 = vadd.xlane.f32.xlu0 %v879_v15  ;;  %9061 = vmatprep.subr.bf16.mxu0 %v9060_v13  ;;  %v936_v15 = vsel %vm105_vm0, %v746_v10, 0.0 }
  0x6b   :  { %9063 = vmatpush3.bf16.msra.mxu0 %v9060_v13  ;;  %9089 = vmatprep.subr.bf16.mxu1 %v9060_v13 }
  0x6c   :  { %8911 = vmatmul.mubr.msk.f32.gmra.mrb[52].mxu0 %vm105_vm0, %v76_v17  ;;  %9097 = vmatpush3.bf16.msra.mxu1 %v9060_v13 }
  0x6d   :  { %8913 = vmatprep.mubr.msk.f32.mxu0 %vm105_vm0, %v77_v18 }
  0x6e   :  { %883 = vadd.xlane.f32.xlu0 %v882_v19  ;;  %v92_v19 = vld [vmem:[%s12845_s2 + $0x20] sm:$0xff] }
  0x70   :  { %8914 = vmatmul.mubr.msk.f32.gmra.mrb[54].mxu0 %vm105_vm0, %v78_v21  ;;  %v9064_v21 = vpack.c.bf16 %v93_v20, %v92_v19 }
  0x71   :  { %8916 = vmatprep.mubr.msk.f32.mxu0 %vm105_vm0, %v79_v22 }
  0x72   :  { %886 = vadd.xlane.f32.xlu0 %v885_v23  ;;  %9065 = vmatprep.subr.bf16.mxu0 %v9064_v21 }
  0x73   :  { %9090 = vmatprep.subr.bf16.mxu1 %v9064_v21  ;;  %9067 = vmatpush3.bf16.msra.mxu0 %v9064_v21 }
  0x74   :  { %8917 = vmatmul.mubr.msk.f32.gmra.mrb[56].mxu0 %vm105_vm0, %v80_v25  ;;  %9098 = vmatpush3.bf16.msra.mxu1 %v9064_v21 }
  0x75   :  { %8919 = vmatprep.mubr.msk.f32.mxu0 %vm105_vm0, %v81_v26  ;;  %v94_v26 = vld [vmem:[%s12845_s2 + $0x30] sm:$0xff] }
  0x76   :  { %889 = vadd.xlane.f32.xlu0 %v888_v27  ;;  %v95_v27 = vld [vmem:[%s12845_s2 + $0x38] sm:$0xff] }
  0x77   :  { %v9068_v28 = vpack.c.bf16 %v95_v27, %v94_v26 }
  0x78   :  { %8920 = vmatmul.mubr.msk.f32.gmra.mrb[58].mxu0 %vm105_vm0, %v82_v29 }
  0x79   :  { %8922 = vmatprep.mubr.msk.f32.mxu0 %vm105_vm0, %v83_v30  ;;  %9069 = vmatprep.subr.bf16.mxu0 %v9068_v28 }
  0x7a   :  { %892 = vadd.xlane.f32.xlu0 %v891_v31  ;;  %9091 = vmatprep.subr.bf16.mxu1 %v9068_v28 }
  0x7b   :  { %9071 = vmatpush3.bf16.msra.mxu0 %v9068_v28  ;;  %9099 = vmatpush3.bf16.msra.mxu1 %v9068_v28  ;;  %v102_v28 = vld [vmem:[%s12845_s2 + $0x70] sm:$0xff] }
  0x7c   :  { %8923 = vmatmul.mubr.msk.f32.gmra.mrb[60].mxu0 %vm105_vm0, %v84_v33 }
  0x7d   :  { %8925 = vmatprep.mubr.msk.f32.mxu0 %vm105_vm0, %v85_v34 }
  0x7e   :  { %895 = vadd.xlane.f32.xlu0 %v894_v35 }
  0x80   :  { %8926 = vmatmul.mubr.msk.f32.gmra.mrb[62].mxu0 %vm105_vm0, %v86_v37 }
  0x82   :  { %898 = vadd.xlane.f32.xlu0 %v897_v38 }
  0x86   :  { %901 = vadd.xlane.f32.xlu0 %v900_v40 }
  0x8a   :  { %904 = vadd.xlane.f32.xlu0 %v903_v42 }
  0x8e   :  { %907 = vadd.xlane.f32.xlu0 %v906_v44 }
  0x92   :  { %910 = vadd.xlane.f32.xlu0 %v909_v46  ;;  %v755_v30 = vpop.xlane.xlu1 %754 }
  0x93   :  { %v9611_v48 = vpop.xlane.xlu0 %748 }
  0x96   :  { %913 = vadd.xlane.f32.xlu0 %v912_v49  ;;  %v758_v40 = vpop.xlane.xlu1 %757  ;;  %v97_v49 = vld [vmem:[%s12845_s2 + $0x48] sm:$0xff] }
  0x97   :  { %v9614_v51 = vpop.xlane.xlu0 %751 }
  0x9a   :  { %916 = vadd.xlane.f32.xlu0 %v915_v52  ;;  %v764_v63 = vpop.xlane.xlu1 %763 }
  0x9b   :  { %v9617_v54 = vpop.xlane.xlu0 %760 }
  0x9e   :  { %919 = vadd.xlane.f32.xlu0 %v918_v55  ;;  %v770_v27 = vpop.xlane.xlu1 %769 }
  0x9f   :  { %v9620_v57 = vpop.xlane.xlu0 %766 }
  0xa2   :  { %922 = vadd.xlane.f32.xlu0 %v921_v58 }
  0xa3   :  { %v9623_v60 = vpop.xlane.xlu0 %772 }
  0xa6   :  { %925 = vadd.xlane.f32.xlu0 %v924_v61  ;;  %v99_v61 = vld [vmem:[%s12845_s2 + $0x58] sm:$0xff] }
  0xa7   :  { %v9632_v2 = vpop.xlane.xlu0 %778  ;;  %v9076_v0 = vpack.c.bf16 %v99_v61, %v98_v59 }
  0xaa   :  { %928 = vadd.xlane.f32.xlu0 %v927_v3 }
  0xab   :  { %v9635_v5 = vpop.xlane.xlu0 %784 }
  0xae   :  { %931 = vadd.xlane.f32.xlu0 %v930_v6 }
  0xaf   :  { %v9638_v8 = vpop.xlane.xlu0 %790 }
  0xb2   :  { %934 = vadd.xlane.f32.xlu0 %v933_v9  ;;  %v101_v9 = vld [vmem:[%s12845_s2 + $0x68] sm:$0xff] }
  0xb3   :  { %v9647_v14 = vpop.xlane.xlu0 %796  ;;  %v9080_v11 = vpack.c.bf16 %v101_v9, %v100_v7 }
  0xb6   :  { %937 = vadd.xlane.f32.xlu0 %v936_v15 }
  0xb7   :  { %v9650_v16 = vpop.xlane.xlu0 %802 }
  0xbb   :  { %v9652_v17 = vpop.xlane.xlu0 %808 }
  0xbf   :  { %v9654_v18 = vpop.xlane.xlu0 %814 }
  0xc3   :  { %v9662_v22 = vpop.xlane.xlu0 %820 }
  0xc7   :  { %v9664_v23 = vpop.xlane.xlu0 %826 }
  0xcb   :  { %v9666_v24 = vpop.xlane.xlu0 %832 }
  0xcf   :  { %v9668_v25 = vpop.xlane.xlu0 %838 }
  0xd3   :  { %v9676_v29 = vpop.xlane.xlu0 %844 }
  0xd7   :  { %v9678_v31 = vpop.xlane.xlu0 %850  ;;  %v8834_v32 = vpop.f32.mrb[0].mxu0 }
  0xd8   :  { %v940_v33 = vmul.f32 2.0, %v8834_v32  ;;  %v364_v34 = vpop.f32.mrb[1].mxu0 }
  0xd9   :  { %v939_v35 = vmul.f32 2.0, %v364_v34 }
  0xda   :  { %v1004_v37 = vsub.f32 %v9614_v51, %v940_v33  ;;  %v9072_v51 = vpack.c.bf16 %v97_v49, %v96_v47  ;;  %v776_v47 = vpop.xlane.xlu1 %775 }
  0xdb   :  { %v9686_v38 = vpop.xlane.xlu0 %856  ;;  %v8837_v39 = vpop.f32.mrb[2].mxu0  ;;  %v1003_v41 = vsub.f32 %v9611_v48, %v939_v35 }
  0xdc   :  { %v942_v42 = vmul.f32 2.0, %v8837_v39  ;;  %v374_v43 = vpop.f32.mrb[3].mxu0  ;;  %v1074_v44 = vadd.f32 %v9683_v36, %v1004_v37  ;;  %9073 = vmatprep.subr.bf16.mxu0 %v9072_v51  ;;  %9092 = vmatprep.subr.bf16.mxu1 %v9072_v51 }
  0xdd   :  { %v941_v52 = vmul.f32 2.0, %v374_v43  ;;  %v1073_v53 = vadd.f32 %v9683_v36, %v1003_v41  ;;  %9075 = vmatpush3.bf16.msra.mxu0 %v9072_v51  ;;  %9100 = vmatpush3.bf16.msra.mxu1 %v9072_v51 }
  0xde   :  { %1139 = vmin.index.xlane.f32.xlu1 %v1074_v44  ;;  %v1006_v45 = vsub.f32 %v758_v40, %v942_v42  ;;  %9077 = vmatprep.subr.bf16.mxu0 %v9076_v0 }
  0xdf   :  { %v9690_v46 = vpop.xlane.xlu0 %862  ;;  %v8840_v50 = vpop.f32.mrb[4].mxu0  ;;  %v1005_v1 = vsub.f32 %v755_v30, %v941_v52  ;;  %9093 = vmatprep.subr.bf16.mxu1 %v9076_v0  ;;  %v103_v30 = vld [vmem:[%s12845_s2 + $0x78] sm:$0xff] }
  0xe0   :  { %v384_v48 = vpop.f32.mrb[5].mxu0  ;;  %v944_v55 = vmul.f32 2.0, %v8840_v50  ;;  %v1076_v56 = vadd.f32 %v9683_v36, %v1006_v45  ;;  %v9084_v34 = vpack.c.bf16 %v103_v30, %v102_v28 }
  0xe1   :  { %9079 = vmatpush3.bf16.msra.mxu0 %v9076_v0  ;;  %9101 = vmatpush3.bf16.msra.mxu1 %v9076_v0  ;;  %v943_v12 = vmul.f32 2.0, %v384_v48  ;;  %v1075_v15 = vadd.f32 %v9683_v36, %v1005_v1  ;;  %v9250_v0 = vmov 0  }
  0xe2   :  { %1137 = vmin.index.xlane.f32.xlu1 %v1073_v53  ;;  %v1008_v4 = vsub.f32 %v764_v63, %v944_v55  ;;  %9081 = vmatprep.subr.bf16.mxu0 %v9080_v11 }
  0xe3   :  { %v9700_v58 = vpop.xlane.xlu0 %865  ;;  %v8843_v62 = vpop.f32.mrb[6].mxu0  ;;  %9094 = vmatprep.subr.bf16.mxu1 %v9080_v11  ;;  %v1007_v32 = vsub.f32 %v9617_v54, %v943_v12  ;;  %9114 = vset.pattern.permute.xlu0 %v9250_v0 }
  0xe4   :  { %v394_v3 = vpop.f32.mrb[7].mxu0  ;;  %v946_v19 = vmul.f32 2.0, %v8843_v62  ;;  %v1078_v20 = vadd.f32 %v9683_v36, %v1008_v4  ;;  %9113 = vset.pattern.permute.xlu1 %v9250_v0 }
  0xe5   :  { %9083 = vmatpush3.bf16.msra.mxu0 %v9080_v11  ;;  %9102 = vmatpush3.bf16.msra.mxu1 %v9080_v11  ;;  %v945_v40 = vmul.f32 2.0, %v394_v3  ;;  %v1077_v42 = vadd.f32 %v9683_v36, %v1007_v32 }
  0xe6   :  { %1143 = vmin.index.xlane.f32.xlu1 %v1076_v56  ;;  %v1010_v35 = vsub.f32 %v770_v27, %v946_v19  ;;  %9085 = vmatprep.subr.bf16.mxu0 %v9084_v34 }
  0xe7   :  { %v9708_v6 = vpop.xlane.xlu0 %868  ;;  %v8846_v10 = vpop.f32.mrb[8].mxu0  ;;  %9095 = vmatprep.subr.bf16.mxu1 %v9084_v34  ;;  %v1009_v49 = vsub.f32 %v9620_v57, %v945_v40 }
  0xe8   :  { %v404_v13 = vpop.f32.mrb[9].mxu0  ;;  %v948_v43 = vmul.f32 2.0, %v8846_v10  ;;  %v1080_v44 = vadd.f32 %v9683_v36, %v1010_v35  ;;  %v782_v57 = vpop.xlane.xlu1 %781 }
  0xe9   :  { %9087 = vmatpush3.bf16.msra.mxu0 %v9084_v34  ;;  %9103 = vmatpush3.bf16.msra.mxu1 %v9084_v34  ;;  %v947_v53 = vmul.f32 2.0, %v404_v13  ;;  %v1079_v56 = vadd.f32 %v9683_v36, %v1009_v49 }
  0xea   :  { %1141 = vmin.index.xlane.f32.xlu1 %v1075_v15  ;;  %v1012_v51 = vsub.f32 %v776_v47, %v948_v43 }
  0xeb   :  { %v9718_v21 = vpop.xlane.xlu0 %871  ;;  %v8849_v26 = vpop.f32.mrb[10].mxu0  ;;  %v1011_v1 = vsub.f32 %v9623_v60, %v947_v53 }
  0xec   :  { %v414_v33 = vpop.f32.mrb[11].mxu0  ;;  %v950_v59 = vmul.f32 2.0, %v8849_v26  ;;  %v1082_v61 = vadd.f32 %v9683_v36, %v1012_v51 }
  0xed   :  { %v949_v10 = vmul.f32 2.0, %v414_v33  ;;  %v1081_v12 = vadd.f32 %v9683_v36, %v1011_v1 }
  0xee   :  { %1147 = vmin.index.xlane.f32.xlu1 %v1078_v20  ;;  %v1014_v4 = vsub.f32 %v782_v57, %v950_v59  ;;  %v788_v20 = vpop.xlane.xlu1 %787 }
  0xef   :  { %v9727_v37 = vpop.xlane.xlu0 %874  ;;  %v8852_v39 = vpop.f32.mrb[12].mxu0  ;;  %v1013_v26 = vsub.f32 %v9632_v2, %v949_v10 }
  0xf0   :  { %v424_v41 = vpop.f32.mrb[13].mxu0  ;;  %v952_v13 = vmul.f32 2.0, %v8852_v39  ;;  %v1084_v15 = vadd.f32 %v9683_v36, %v1014_v4 }
  0xf1   :  { %v951_v33 = vmul.f32 2.0, %v424_v41  ;;  %v1083_v35 = vadd.f32 %v9683_v36, %v1013_v26 }
  0xf2   :  { %1145 = vmin.index.xlane.f32.xlu1 %v1077_v42  ;;  %v1016_v28 = vsub.f32 %v788_v20, %v952_v13  ;;  %v794_v43 = vpop.xlane.xlu1 %793 }
  0xf3   :  { %v9731_v54 = vpop.xlane.xlu0 %877  ;;  %v8855_v45 = vpop.f32.mrb[14].mxu0 }
  0xf4   :  { %v434_v50 = vpop.f32.mrb[15].mxu0  ;;  %v954_v39 = vmul.f32 2.0, %v8855_v45  ;;  %v1086_v40 = vadd.f32 %v9683_v36, %v1016_v28 }
  0xf5   :  { %v953_v45 = vmul.f32 2.0, %v434_v50 }
  0xf6   :  { %1151 = vmin.index.xlane.f32.xlu1 %v1080_v44  ;;  %v1015_v44 = vsub.f32 %v9635_v5, %v951_v33  ;;  %v1018_v51 = vsub.f32 %v794_v43, %v954_v39 }
  0xf7   :  { %v9734_v52 = vpop.xlane.xlu0 %880  ;;  %v8858_v48 = vpop.f32.mrb[16].mxu0  ;;  %v1017_v50 = vsub.f32 %v9638_v8, %v953_v45 }
  0xf8   :  { %v9736_v55 = vpop.f32.mrb[17].mxu0  ;;  %v956_v1 = vmul.f32 2.0, %v8858_v48  ;;  %v1088_v5 = vadd.f32 %v9683_v36, %v1018_v51 }
  0xf9   :  { %v955_v33 = vmul.f32 2.0, %v9736_v55 }
  0xfa   :  { %1149 = vmin.index.xlane.f32.xlu1 %v1079_v56 }
  0xfb   :  { %v9740_v62 = vpop.xlane.xlu0 %883  ;;  %v9742_v63 = vpop.f32.mrb[18].mxu0  ;;  %v1019_v55 = vsub.f32 %v9647_v14, %v955_v33 }
  0xfc   :  { %v9745_v3 = vpop.f32.mrb[19].mxu0  ;;  %v958_v43 = vmul.f32 2.0, %v9742_v63 }
  0xfe   :  { %1155 = vmin.index.xlane.f32.xlu1 %v1082_v61  ;;  %v1085_v61 = vadd.f32 %v9683_v36, %v1015_v44 }
  0xff   :  { %v9747_v7 = vpop.xlane.xlu0 %886  ;;  %v9749_v9 = vpop.f32.mrb[20].mxu0 }
 0x100   :  { %v9751_v11 = vpop.f32.mrb[21].mxu0 }
 0x102   :  { %1153 = vmin.index.xlane.f32.xlu1 %v1081_v12 }
 0x103   :  { %v9755_v19 = vpop.xlane.xlu0 %889  ;;  %v9757_v60 = vpop.f32.mrb[22].mxu0 }
 0x104   :  { %v9760_v27 = vpop.f32.mrb[23].mxu0 }
 0x106   :  { %1159 = vmin.index.xlane.f32.xlu1 %v1084_v15 }
 0x107   :  { %v9762_v30 = vpop.xlane.xlu0 %892  ;;  %v9764_v32 = vpop.f32.mrb[24].mxu0 }
 0x108   :  { %v9766_v34 = vpop.f32.mrb[25].mxu0 }
 0x10a   :  { %1157 = vmin.index.xlane.f32.xlu1 %v1083_v35  ;;  %v1087_v35 = vadd.f32 %v9683_v36, %v1017_v50 }
 0x10b   :  { %v9770_v42 = vpop.xlane.xlu0 %895  ;;  %v9772_v2 = vpop.f32.mrb[26].mxu0 }
 0x10c   :  { %v494_v47 = vpop.f32.mrb[27].mxu0 }
 0x10d   :  { %v965_v49 = vmul.f32 2.0, %v494_v47 }
 0x10e   :  { %1163 = vmin.index.xlane.f32.xlu1 %v1086_v40 }
 0x10f   :  { %v9775_v41 = vpop.xlane.xlu0 %898  ;;  %v1029_v53 = vsub.f32 %v9664_v23, %v965_v49  ;;  %v9778_v56 = vpop.f32.mrb[28].mxu0 }
 0x110   :  { %v504_v59 = vpop.f32.mrb[29].mxu0  ;;  %v800_v23 = vpop.xlane.xlu1 %799 }
 0x111   :  { %v967_v57 = vmul.f32 2.0, %v504_v59  ;;  %v1099_v0 = vadd.f32 %v9683_v36, %v1029_v53  ;;  %v1020_v26 = vsub.f32 %v800_v23, %v956_v1  ;;  %v1089_v1 = vadd.f32 %v9683_v36, %v1019_v55 }
 0x112   :  { %1161 = vmin.index.xlane.f32.xlu1 %v1085_v61 }
 0x113   :  { %v9783_v4 = vpop.xlane.xlu0 %901  ;;  %v1031_v10 = vsub.f32 %v9666_v24, %v967_v57  ;;  %1189 = vmin.index.xlane.f32.xlu0 %v1099_v0  ;;  %v9786_v12 = vpop.f32.mrb[30].mxu0  ;;  %v1090_v44 = vadd.f32 %v9683_v36, %v1020_v26 }
 0x114   :  { %v514_v13 = vpop.f32.mrb[31].mxu0  ;;  %v806_v49 = vpop.xlane.xlu1 %805 }
 0x115   :  { %v969_v15 = vmul.f32 2.0, %v514_v13  ;;  %v1101_v20 = vadd.f32 %v9683_v36, %v1031_v10  ;;  %v1022_v59 = vsub.f32 %v806_v49, %v958_v43  ;;  %v960_v10 = vmul.f32 2.0, %v9749_v9 }
 0x116   :  { %1167 = vmin.index.xlane.f32.xlu1 %v1088_v5  ;;  %v962_v43 = vmul.f32 2.0, %v9757_v60 }
 0x117   :  { %v1033_v48 = vsub.f32 %v9668_v25, %v969_v15  ;;  %1193 = vmin.index.xlane.f32.xlu0 %v1101_v20  ;;  %v9791_v28 = vpop.f32.mrb[32].mxu0  ;;  %v9795_v39 = vpop.xlane.xlu0 %904  ;;  %v1092_v23 = vadd.f32 %v9683_v36, %v1022_v59 }
 0x118   :  { %v524_v24 = vpop.f32.mrb[33].mxu0  ;;  %v812_v13 = vpop.xlane.xlu1 %811 }
 0x119   :  { %v971_v40 = vmul.f32 2.0, %v524_v24  ;;  %v1103_v8 = vadd.f32 %v9683_v36, %v1033_v48  ;;  %v1024_v33 = vsub.f32 %v812_v13, %v960_v10 }
 0x11a   :  { %1165 = vmin.index.xlane.f32.xlu1 %v1087_v35 }
 0x11b   :  { %v1035_v25 = vsub.f32 %v9676_v29, %v971_v40  ;;  %1197 = vmin.index.xlane.f32.xlu0 %v1103_v8  ;;  %v9801_v47 = vpop.f32.mrb[34].mxu0  ;;  %v9805_v61 = vpop.xlane.xlu0 %907  ;;  %v957_v29 = vmul.f32 2.0, %v9745_v3 }
 0x11c   :  { %v534_v51 = vpop.f32.mrb[35].mxu0  ;;  %v818_v49 = vpop.xlane.xlu1 %817 }
 0x11d   :  { %v973_v53 = vmul.f32 2.0, %v534_v51  ;;  %v1105_v45 = vadd.f32 %v9683_v36, %v1035_v25  ;;  %v1021_v15 = vsub.f32 %v9650_v16, %v957_v29  ;;  %v1026_v59 = vsub.f32 %v818_v49, %v962_v43 }
 0x11e   :  { %1171 = vmin.index.xlane.f32.xlu1 %v1090_v44  ;;  %v1094_v44 = vadd.f32 %v9683_v36, %v1024_v33 }
 0x11f   :  { %v1037_v63 = vsub.f32 %v9678_v31, %v973_v53  ;;  %1201 = vmin.index.xlane.f32.xlu0 %v1105_v45  ;;  %v9808_v57 = vpop.f32.mrb[36].mxu0  ;;  %v9819_v20 = vpop.xlane.xlu0 %910  ;;  %v1091_v35 = vadd.f32 %v9683_v36, %v1021_v15  ;;  %v1096_v10 = vadd.f32 %v9683_v36, %v1026_v59 }
 0x120   :  { %v544_v0 = vpop.f32.mrb[37].mxu0 }
 0x121   :  { %v975_v5 = vmul.f32 2.0, %v544_v0  ;;  %v1107_v14 = vadd.f32 %v9683_v36, %v1037_v63  ;;  %v824_v63 = vpop.xlane.xlu1 %823  ;;  %v961_v0 = vmul.f32 2.0, %v9760_v27  ;;  %v963_v27 = vmul.f32 2.0, %v9766_v34 }
 0x122   :  { %1169 = vmin.index.xlane.f32.xlu1 %v1089_v1 }
 0x123   :  { %v1039_v50 = vsub.f32 %v9686_v38, %v975_v5  ;;  %1205 = vmin.index.xlane.f32.xlu0 %v1107_v14  ;;  %v9816_v31 = vpop.f32.mrb[38].mxu0  ;;  %v959_v38 = vmul.f32 2.0, %v9751_v11  ;;  %v9830_v25 = vpop.xlane.xlu0 %913  ;;  %v1025_v13 = vsub.f32 %v9654_v18, %v961_v0 }
 0x124   :  { %v554_v3 = vpop.f32.mrb[39].mxu0 }
 0x125   :  { %v977_v26 = vmul.f32 2.0, %v554_v3  ;;  %v1109_v48 = vadd.f32 %v9683_v36, %v1039_v50  ;;  %v1023_v11 = vsub.f32 %v9652_v17, %v959_v38  ;;  %v830_v50 = vpop.xlane.xlu1 %829  ;;  %v1027_v38 = vsub.f32 %v9662_v22, %v963_v27 }
 0x126   :  { %1175 = vmin.index.xlane.f32.xlu1 %v1092_v23  ;;  %v1095_v18 = vadd.f32 %v9683_v36, %v1025_v13 }
 0x127   :  { %v1041_v9 = vsub.f32 %v9690_v46, %v977_v26  ;;  %1209 = vmin.index.xlane.f32.xlu0 %v1109_v48  ;;  %v9823_v24 = vpop.f32.mrb[40].mxu0  ;;  %v9842_v5 = vpop.xlane.xlu0 %916 }
 0x128   :  { %v564_v40 = vpop.f32.mrb[41].mxu0 }
 0x129   :  { %v1111_v16 = vadd.f32 %v9683_v36, %v1041_v9  ;;  %v979_v8 = vmul.f32 2.0, %v564_v40  ;;  %v836_v34 = vpop.xlane.xlu1 %835 }
 0x12a   :  { %1173 = vmin.index.xlane.f32.xlu1 %v1091_v35 }
 0x12b   :  { %1213 = vmin.index.xlane.f32.xlu0 %v1111_v16  ;;  %v1043_v46 = vsub.f32 %v9708_v6, %v979_v8  ;;  %v9833_v55 = vpop.f32.mrb[42].mxu0  ;;  %v1093_v6 = vadd.f32 %v9683_v36, %v1023_v11  ;;  %v9852_v48 = vpop.xlane.xlu0 %919 }
 0x12c   :  { %v574_v51 = vpop.f32.mrb[43].mxu0 }
 0x12d   :  { %v1113_v53 = vadd.f32 %v9683_v36, %v1043_v46  ;;  %v981_v45 = vmul.f32 2.0, %v574_v51  ;;  %v842_v51 = vpop.xlane.xlu1 %841 }
 0x12e   :  { %1179 = vmin.index.xlane.f32.xlu1 %v1094_v44 }
 0x12f   :  { %1217 = vmin.index.xlane.f32.xlu0 %v1113_v53  ;;  %v1045_v60 = vsub.f32 %v9727_v37, %v981_v45  ;;  %v9838_v29 = vpop.f32.mrb[44].mxu0  ;;  %v923_v22 = vpop.xlane.xlu0 %922 }
 0x130   :  { %v584_v1 = vpop.f32.mrb[45].mxu0 }
 0x131   :  { %v1115_v17 = vadd.f32 %v9683_v36, %v1045_v60  ;;  %v983_v14 = vmul.f32 2.0, %v584_v1 }
 0x132   :  { %1177 = vmin.index.xlane.f32.xlu1 %v1093_v6 }
 0x133   :  { %1221 = vmin.index.xlane.f32.xlu0 %v1115_v17  ;;  %v1047_v23 = vsub.f32 %v9734_v52, %v983_v14  ;;  %v9847_v37 = vpop.f32.mrb[46].mxu0  ;;  %v964_v52 = vmul.f32 2.0, %v9764_v32  ;;  %v1097_v32 = vadd.f32 %v9683_v36, %v1027_v38  ;;  %v9873_v6 = vpop.xlane.xlu0 %925 }
 0x134   :  { %v594_v15 = vpop.f32.mrb[47].mxu0 }
 0x135   :  { %v985_v3 = vmul.f32 2.0, %v594_v15  ;;  %v1117_v26 = vadd.f32 %v9683_v36, %v1047_v23  ;;  %v1028_v44 = vsub.f32 %v824_v63, %v964_v52  ;;  %v848_v23 = vpop.xlane.xlu1 %847 }
 0x136   :  { %1183 = vmin.index.xlane.f32.xlu1 %v1096_v10 }
 0x137   :  { %v1049_v33 = vsub.f32 %v9747_v7, %v985_v3  ;;  %1225 = vmin.index.xlane.f32.xlu0 %v1117_v26  ;;  %v9855_v9 = vpop.f32.mrb[48].mxu0  ;;  %v966_v7 = vmul.f32 2.0, %v9772_v2  ;;  %v1098_v2 = vadd.f32 %v9683_v36, %v1028_v44 }
 0x138   :  { %v604_v35 = vpop.f32.mrb[49].mxu0 }
 0x139   :  { %v987_v40 = vmul.f32 2.0, %v604_v35  ;;  %v1119_v16 = vadd.f32 %v9683_v36, %v1049_v33  ;;  %v1030_v59 = vsub.f32 %v830_v50, %v966_v7  ;;  %v929_v33 = vpop.xlane.xlu0 %928 }
 0x13a   :  { %1181 = vmin.index.xlane.f32.xlu1 %v1095_v18  ;;  %v854_v18 = vpop.xlane.xlu1 %853 }
 0x13b   :  { %v1051_v8 = vsub.f32 %v9762_v30, %v987_v40  ;;  %1229 = vmin.index.xlane.f32.xlu0 %v1119_v16  ;;  %v9862_v43 = vpop.f32.mrb[50].mxu0  ;;  %v968_v30 = vmul.f32 2.0, %v9778_v56  ;;  %v1100_v56 = vadd.f32 %v9683_v36, %v1030_v59 }
 0x13c   :  { %v614_v46 = vpop.f32.mrb[51].mxu0 }
 0x13d   :  { %v989_v49 = vmul.f32 2.0, %v614_v46  ;;  %v1121_v11 = vadd.f32 %v9683_v36, %v1051_v8  ;;  %v1032_v14 = vsub.f32 %v836_v34, %v968_v30  ;;  %v9893_v44 = vpop.xlane.xlu0 %931 }
 0x13e   :  { %1185 = vmin.index.xlane.f32.xlu1 %v1097_v32 }
 0x13f   :  { %v1053_v53 = vsub.f32 %v9775_v41, %v989_v49  ;;  %1233 = vmin.index.xlane.f32.xlu0 %v1121_v11  ;;  %v9868_v45 = vpop.f32.mrb[52].mxu0  ;;  %v970_v41 = vmul.f32 2.0, %v9786_v12  ;;  %v1102_v26 = vadd.f32 %v9683_v36, %v1032_v14 }
 0x140   :  { %v624_v60 = vpop.f32.mrb[53].mxu0 }
 0x141   :  { %v991_v63 = vmul.f32 2.0, %v624_v60  ;;  %v1123_v0 = vadd.f32 %v9683_v36, %v1053_v53  ;;  %v1034_v3 = vsub.f32 %v842_v51, %v970_v41  ;;  %v860_v51 = vpop.xlane.xlu1 %859 }
 0x142   :  { %1187 = vmin.index.xlane.f32.xlu1 %v1098_v2 }
 0x143   :  { %v1055_v1 = vsub.f32 %v9795_v39, %v991_v63  ;;  %1237 = vmin.index.xlane.f32.xlu0 %v1123_v0  ;;  %v9876_v17 = vpop.f32.mrb[54].mxu0  ;;  %v972_v39 = vmul.f32 2.0, %v9791_v28  ;;  %v1104_v28 = vadd.f32 %v9683_v36, %v1034_v3 }
 0x144   :  { %v634_v10 = vpop.f32.mrb[55].mxu0 }
 0x145   :  { %v993_v50 = vmul.f32 2.0, %v634_v10  ;;  %v1125_v13 = vadd.f32 %v9683_v36, %v1055_v1  ;;  %v1036_v40 = vsub.f32 %v848_v23, %v972_v39  ;;  %v980_v10 = vmul.f32 2.0, %v9823_v24 }
 0x146   :  { %1191 = vmin.index.xlane.f32.xlu1 %v1100_v56  ;;  %v12851_v39 = vlaneseq }
 0x147   :  { %v1057_v27 = vsub.f32 %v9819_v20, %v993_v50  ;;  %1241 = vmin.index.xlane.f32.xlu0 %v1125_v13  ;;  %v9882_v15 = vpop.f32.mrb[56].mxu0  ;;  %v974_v20 = vmul.f32 2.0, %v9801_v47  ;;  %v1106_v11 = vadd.f32 %v9683_v36, %v1036_v40  ;;  %v982_v13 = vmul.f32 2.0, %v9833_v55 }
 0x148   :  { %v644_v12 = vpop.f32.mrb[57].mxu0  ;;  %v988_v55 = vmul.f32 2.0, %v9855_v9 }
 0x149   :  { %v995_v52 = vmul.f32 2.0, %v644_v12  ;;  %v1127_v38 = vadd.f32 %v9683_v36, %v1057_v27  ;;  %v1038_v49 = vsub.f32 %v854_v18, %v974_v20  ;;  %v1046_v3 = vsub.f32 %v9731_v54, %v982_v13 }
 0x14a   :  { %1195 = vmin.index.xlane.f32.xlu1 %v1102_v26  ;;  %v9916_v26 = vshrl.u32 %v12851_v39, 7  ;;  %v986_v12 = vmul.f32 2.0, %v9847_v37  ;;  %v994_v54 = vmul.f32 2.0, %v9876_v17  ;;  %v9927_v20 = vand.u32 127, %v12851_v39 }
 0x14b   :  { %v1059_v35 = vsub.f32 %v9842_v5, %v995_v52  ;;  %1245 = vmin.index.xlane.f32.xlu0 %v1127_v38  ;;  %v9888_v34 = vpop.f32.mrb[58].mxu0  ;;  %v976_v5 = vmul.f32 2.0, %v9808_v57  ;;  %v1108_v60 = vadd.f32 %v9683_v36, %v1038_v49  ;;  %v935_v57 = vpop.xlane.xlu0 %934  ;;  %v990_v52 = vmul.f32 2.0, %v9862_v43 }
 0x14c   :  { %v654_v16 = vpop.f32.mrb[59].mxu0  ;;  %v992_v38 = vmul.f32 2.0, %v9868_v45  ;;  %v1116_v18 = vadd.f32 %v9683_v36, %v1046_v3  ;;  %v9930_v37 = vsub.s32 0, %v9916_v26  ;;  %v9933_v9 = vsub.s32 1, %v9916_v26 }
 0x14d   :  { %v997_v8 = vmul.f32 2.0, %v654_v16  ;;  %v1129_v7 = vadd.f32 %v9683_v36, %v1059_v35  ;;  %v1040_v63 = vsub.f32 %v860_v51, %v976_v5  ;;  %v996_v35 = vmul.f32 2.0, %v9882_v15 }
 0x14e   :  { %1199 = vmin.index.xlane.f32.xlu1 %v1104_v28  ;;  %v1050_v43 = vsub.f32 %v9755_v19, %v986_v12  ;;  %v9937_v45 = vsub.s32 2, %v9916_v26  ;;  %v1052_v15 = vsub.f32 %v9770_v42, %v988_v55  ;;  %v1054_v40 = vsub.f32 %v9783_v4, %v990_v52 }
 0x14f   :  { %v1061_v32 = vsub.f32 %v923_v22, %v997_v8  ;;  %1249 = vmin.index.xlane.f32.xlu0 %v1129_v7  ;;  %v9895_v46 = vpop.f32.mrb[60].mxu0  ;;  %v978_v22 = vmul.f32 2.0, %v9816_v31  ;;  %v1110_v23 = vadd.f32 %v9683_v36, %v1040_v63  ;;  %v1044_v31 = vsub.f32 %v9718_v21, %v980_v10 }
 0x150   :  { %v664_v47 = vpop.f32.mrb[61].mxu0  ;;  %v1056_v28 = vsub.f32 %v9805_v61, %v992_v38  ;;  %v1058_v16 = vsub.f32 %v9830_v25, %v994_v54  ;;  %v9948_v19 = vsub.s32 4, %v9916_v26  ;;  %v9951_v7 = vsub.s32 5, %v9916_v26 }
 0x151   :  { %v999_v53 = vmul.f32 2.0, %v664_v47  ;;  %v1131_v30 = vadd.f32 %v9683_v36, %v1061_v32  ;;  %v1042_v56 = vsub.f32 %v9700_v58, %v978_v22  ;;  %v984_v58 = vmul.f32 2.0, %v9838_v29 }
 0x152   :  { %1203 = vmin.index.xlane.f32.xlu1 %v1106_v11  ;;  %v1114_v24 = vadd.f32 %v9683_v36, %v1044_v31  ;;  %v1060_v32 = vsub.f32 %v9852_v48, %v996_v35  ;;  %v9955_v5 = vsub.s32 6, %v9916_v26  ;;  %v9958_v42 = vsub.s32 7, %v9916_v26 }
 0x153   :  { %v1063_v59 = vsub.f32 %v929_v33, %v999_v53  ;;  %1253 = vmin.index.xlane.f32.xlu0 %v1131_v30  ;;  %v9900_v2 = vpop.f32.mrb[62].mxu0  ;;  %v1112_v27 = vadd.f32 %v9683_v36, %v1042_v56  ;;  %v9251_v33 = vmov 1966171168   ;;  %v1048_v29 = vsub.f32 %v9740_v62, %v984_v58 }
 0x154   :  { %v674_v0 = vpop.f32.mrb[63].mxu0  ;;  %v3318_v21 = vunpack.c.l.s4 %v9251_v33  ;;  %v9940_v62 = vsub.s32 3, %v9916_v26  ;;  %12906 = vst [vmem:[#allocation9_spill] sm:$0xff] %v9955_v5  ;;  %v998_v4 = vmul.f32 2.0, %v9888_v34  ;;  %v1000_v61 = vmul.f32 2.0, %v9895_v46 }
 0x155   :  { %v1001_v1 = vmul.f32 2.0, %v674_v0  ;;  %v1133_v41 = vadd.f32 %v9683_v36, %v1063_v59  ;;  %v1118_v8 = vadd.f32 %v9683_v36, %v1048_v29  ;;  %v1120_v25 = vadd.f32 %v9683_v36, %v1050_v43 }
 0x156   :  { %1207 = vmin.index.xlane.f32.xlu1 %v1108_v60  ;;  %v3319_v17 = vunpack.c.0.s8 %v3318_v21  ;;  %v1122_v47 = vadd.f32 %v9683_v36, %v1052_v15  ;;  %v1124_v48 = vadd.f32 %v9683_v36, %v1054_v40  ;;  %v9969_v51 = vadd.f32 %v9683_v36, %v1056_v28 }
 0x157   :  { %v1065_v14 = vsub.f32 %v935_v57, %v1001_v1  ;;  %1257 = vmin.index.xlane.f32.xlu0 %v1133_v41  ;;  %v9972_v53 = vadd.f32 %v9683_v36, %v1058_v16  ;;  %v9979_v59 = vadd.f32 %v9683_v36, %v1060_v32  ;;  %v1062_v0 = vsub.f32 %v9873_v6, %v998_v4 }
 0x158   :  { %v9964_v49 = vsub.s32 %v3319_v17, %v9916_v26  ;;  %v1064_v57 = vsub.f32 %v9893_v44, %v1000_v61  ;;  %v12854_v1 = vmov 0.0   ;;  %v12852_v3 = vmov 1.0  }
 0x159   :  { %v1135_v50 = vadd.f32 %v9683_v36, %v1065_v14  ;;  %v10008_v43 = vadd.f32 %v9683_v36, %v1062_v0  ;;  %v10019_v32 = vmul.f32 2.0, %v9900_v2 }
 0x15a   :  { %1211 = vmin.index.xlane.f32.xlu1 %v1110_v23  ;;  %v10013_v40 = vadd.f32 %v9683_v36, %v1064_v57 }
 0x15b   :  { %1261 = vmin.index.xlane.f32.xlu0 %v1135_v50 }
 0x15e   :  { %1215 = vmin.index.xlane.f32.xlu1 %v1112_v27 }
 0x162   :  { %1219 = vmin.index.xlane.f32.xlu1 %v1114_v24 }
 0x166   :  { %1223 = vmin.index.xlane.f32.xlu1 %v1116_v18 }
 0x16a   :  { %1227 = vmin.index.xlane.f32.xlu1 %v1118_v8 }
 0x16b   :  { %v1140_v11 = vpop.xlane.xlu1 %1139 }
 0x16c   :  { %vm7019_vm1 = vcmp.eq.s32.totalorder %v9927_v20, %v1140_v11  ;;  %v1300_v34 = vrot.slane %v1140_v11, %v9930_v37  ;;  %v1304_v46 = vrot.slane %v1140_v11, %v9933_v9  ;;  %v1308_v30 = vrot.slane %v1140_v11, %v9937_v45 }
 0x16d   :  { %v1312_v22 = vrot.slane %v1140_v11, %v9940_v62  ;;  %v1316_v60 = vrot.slane %v1140_v11, %v9948_v19  ;;  %v1320_v63 = vrot.slane %v1140_v11, %v9951_v7  ;;  %v8558_v41 = vsel %vm7019_vm1, 1.0, %v12854_v1 }
 0x16e   :  { %1231 = vmin.index.xlane.f32.xlu1 %v1120_v25  ;;  %v1324_v14 = vrot.slane %v1140_v11, %v9955_v5  ;;  %v1328_v10 = vrot.slane %v1140_v11, %v9958_v42  ;;  %v3362_v23 = vcombine.low %v1300_v34, %v1304_v46  ;;  %v10027_v11 = vpop.xlane.xlu0 %937 }
 0x16f   :  { %v1138_v56 = vpop.xlane.xlu1 %1137  ;;  %v3363_v50 = vcombine.low %v1308_v30, %v1312_v22  ;;  %v9991_v31 = vcombine.low %v1316_v60, %v1320_v63 }
 0x170   :  { %vm7018_vm2 = vcmp.eq.s32.totalorder %v9927_v20, %v1138_v56  ;;  %v1268_v6 = vrot.slane %v1138_v56, %v9930_v37  ;;  %v1272_v44 = vrot.slane %v1138_v56, %v9933_v9  ;;  %v1276_v13 = vrot.slane %v1138_v56, %v9937_v45 }
 0x171   :  { %v8557_v27 = vsel %vm7018_vm2, 1.0, %v12854_v1  ;;  %8960 = vmatprep.mubr.msk.f32.mxu0 %vm7018_vm2, %v12852_v3  ;;  %v1280_v58 = vrot.slane %v1138_v56, %v9940_v62  ;;  %v1284_v24 = vrot.slane %v1138_v56, %v9948_v19  ;;  %v1288_v12 = vrot.slane %v1138_v56, %v9951_v7 }
 0x172   :  { %v8377_v33 = vadd.f32 %v8558_v41, %v8557_v27  ;;  %8961 = vmatmul.mubr.msk.f32.vlgmr.msra.gmra.mrb[64].mxu0 %vm7019_vm1, %v12852_v3  ;;  %1235 = vmin.index.xlane.f32.xlu1 %v1122_v47  ;;  %v1292_v21 = vrot.slane %v1138_v56, %v9955_v5  ;;  %v1296_v55 = vrot.slane %v1138_v56, %v9958_v42 }
 0x173   :  { %v1144_v52 = vpop.xlane.xlu1 %1143  ;;  %v3313_v38 = vcombine.low %v1268_v6, %v1272_v44  ;;  %v3314_v54 = vcombine.low %v1276_v13, %v1280_v58  ;;  %v3315_v29 = vcombine.low %v1284_v24, %v1288_v12  ;;  %v3365_v18 = vcombine.low %v1324_v14, %v1328_v10 }
 0x174   :  { %v3316_v35 = vcombine.low %v1292_v21, %v1296_v55  ;;  %v3372_v17 = vrot.slane %v3362_v23, %v9964_v49  ;;  %v3379_v15 = vrot.slane %v3363_v50, %v9964_v49  ;;  %vm7021_vm3 = vcmp.eq.s32.totalorder %v9927_v20, %v1144_v52 }
 0x175   :  { %v3323_v28 = vrot.slane %v3313_v38, %v9964_v49  ;;  %v3330_v16 = vrot.slane %v3314_v54, %v9964_v49  ;;  %v3337_v8 = vrot.slane %v3315_v29, %v9964_v49  ;;  %v3386_v61 = vrot.slane %v9991_v31, %v9964_v49 }
 0x176   :  { %1239 = vmin.index.xlane.f32.xlu1 %v1124_v48  ;;  %v3344_v4 = vrot.slane %v3316_v35, %v9964_v49  ;;  %v3393_v47 = vrot.slane %v3365_v18, %v9964_v49  ;;  %v1364_v34 = vrot.slane %v1144_v52, %v9930_v37  ;;  %v1368_v2 = vrot.slane %v1144_v52, %v9933_v9 }
 0x177   :  { %v10025_v25 = vpop.xlane.xlu1 %1141  ;;  %v3345_v36 = vcombine.low %v3323_v28, %v3330_v16  ;;  %v10034_v46 = vcombine.low %v3372_v17, %v3379_v15  ;;  %v1372_v30 = vrot.slane %v1144_v52, %v9937_v45  ;;  %v1376_v63 = vrot.slane %v1144_v52, %v9940_v62 }
 0x178   :  { %vm7020_vm4 = vcmp.eq.s32.totalorder %v9927_v20, %v10025_v25  ;;  %v3346_v48 = vcombine.low %v3337_v8, %v3344_v4  ;;  %v1380_v0 = vrot.slane %v1144_v52, %v9948_v19  ;;  %v8560_v41 = vsel %vm7021_vm3, 1.0, %v12854_v1 }
 0x179   :  { %v8559_v22 = vsel %vm7020_vm4, 1.0, %v12854_v1  ;;  %8963 = vmatprep.mubr.msk.f32.mxu0 %vm7020_vm4, %v12852_v3  ;;  %v3353_v60 = vrot.slane %v3345_v36, %v9964_v49  ;;  %v1066_v56 = vsub.f32 %v10027_v11, %v10019_v32  ;;  %v1384_v23 = vrot.slane %v1144_v52, %v9951_v7 }
 0x17a   :  { %v8378_v57 = vadd.f32 %v8559_v22, %v8377_v33  ;;  %8964 = vmatmul.mubr.msk.f32.gmra.mrb[66].mxu0 %vm7021_vm3, %v12852_v3  ;;  %1243 = vmin.index.xlane.f32.xlu1 %v9969_v51  ;;  %v3360_v14 = vrot.slane %v3346_v48, %v9964_v49  ;;  %v1388_v50 = vrot.slane %v1144_v52, %v9955_v5 }
 0x17b   :  { %v10052_v10 = vpop.xlane.xlu1 %1147  ;;  %v1392_v31 = vrot.slane %v1144_v52, %v9958_v42  ;;  %v3460_v6 = vcombine.low %v1364_v34, %v1368_v2  ;;  %v10057_v27 = vcombine.low %v3386_v61, %v3393_v47  ;;  %v3402_v51 = vrot.slane %v10034_v46, %v9964_v49 }
 0x17c   :  { %v8379_v44 = vadd.f32 %v8560_v41, %v8378_v57  ;;  %v3361_v13 = vcombine.low %v3353_v60, %v3360_v14  ;;  %vm7023_vm5 = vcmp.eq.s32.totalorder %v9927_v20, %v10052_v10  ;;  %v3461_v58 = vcombine.low %v1372_v30, %v1376_v63 }
 0x17d   :  { %v3462_v24 = vcombine.low %v1380_v0, %v1384_v23  ;;  %v3463_v12 = vcombine.low %v1388_v50, %v1392_v31  ;;  %v3470_v33 = vrot.slane %v3460_v6, %v9964_v49  ;;  %v1332_v21 = vrot.slane %v10025_v25, %v9930_v37 }
 0x17e   :  { %6450 = vperm.xlu0 %9114, %v3361_v13   ;;  %1247 = vmin.index.xlane.f32.xlu1 %v9972_v53  ;;  %v1336_v55 = vrot.slane %v10025_v25, %v9933_v9  ;;  %v3477_v38 = vrot.slane %v3461_v58, %v9964_v49  ;;  %v1340_v18 = vrot.slane %v10025_v25, %v9937_v45  ;;  %v8562_v47 = vsel %vm7023_vm5, 1.0, %v12854_v1 }
 0x17f   :  { %v10069_v52 = vpop.xlane.xlu1 %1145  ;;  %v3484_v54 = vrot.slane %v3462_v24, %v9964_v49  ;;  %v3491_v29 = vrot.slane %v3463_v12, %v9964_v49  ;;  %v1344_v53 = vrot.slane %v10025_v25, %v9940_v62  ;;  %v1348_v35 = vrot.slane %v10025_v25, %v9948_v19  ;;  %v9115_v12 = vld [vmem:[%s12846_s3] ss:$0 sm:$0xff] }
 0x180   :  { %vm7022_vm6 = vcmp.eq.s32.totalorder %v9927_v20, %v10069_v52  ;;  %v1352_v17 = vrot.slane %v10025_v25, %v9951_v7  ;;  %v3492_v28 = vcombine.low %v3470_v33, %v3477_v38  ;;  %v1356_v8 = vrot.slane %v10025_v25, %v9955_v5 }
 0x181   :  { %v8561_v15 = vsel %vm7022_vm6, 1.0, %v12854_v1  ;;  %8966 = vmatprep.mubr.msk.f32.mxu0 %vm7022_vm6, %v12852_v3  ;;  %v3493_v16 = vcombine.low %v3484_v54, %v3491_v29  ;;  %v1360_v61 = vrot.slane %v10025_v25, %v9958_v42  ;;  %v3411_v36 = vcombine.low %v1332_v21, %v1336_v55 }
 0x182   :  { %v8380_v4 = vadd.f32 %v8561_v15, %v8379_v44  ;;  %8967 = vmatmul.mubr.msk.f32.gmra.mrb[68].mxu0 %vm7023_vm5, %v12852_v3  ;;  %1251 = vmin.index.xlane.f32.xlu1 %v9979_v59  ;;  %v3409_v2 = vrot.slane %v10057_v27, %v9964_v49  ;;  %v3412_v48 = vcombine.low %v1340_v18, %v1344_v53 }
 0x183   :  { %v10099_v34 = vpop.xlane.xlu1 %1151  ;;  %v3413_v30 = vcombine.low %v1348_v35, %v1352_v17  ;;  %v3500_v60 = vrot.slane %v3492_v28, %v9964_v49  ;;  %v3414_v59 = vcombine.low %v1356_v8, %v1360_v61  ;;  %v3421_v63 = vrot.slane %v3411_v36, %v9964_v49 }
 0x184   :  { %v8381_v22 = vadd.f32 %v8562_v47, %v8380_v4  ;;  %vm7025_vm7 = vcmp.eq.s32.totalorder %v9927_v20, %v10099_v34  ;;  %v3507_v25 = vrot.slane %v3493_v16, %v9964_v49  ;;  %v3428_v0 = vrot.slane %v3412_v48, %v9964_v49 }
 0x185   :  { %v3435_v57 = vrot.slane %v3413_v30, %v9964_v49  ;;  %v3442_v41 = vrot.slane %v3414_v59, %v9964_v49  ;;  %v1428_v14 = vrot.slane %v10052_v10, %v9930_v37  ;;  %v1432_v23 = vrot.slane %v10052_v10, %v9933_v9 }
 0x186   :  { %1255 = vmin.index.xlane.f32.xlu1 %v10008_v43  ;;  %v1436_v50 = vrot.slane %v10052_v10, %v9937_v45  ;;  %v3443_v6 = vcombine.low %v3421_v63, %v3428_v0  ;;  %v1440_v44 = vrot.slane %v10052_v10, %v9940_v62  ;;  %v1444_v43 = vrot.slane %v10052_v10, %v9948_v19 }
 0x187   :  { %v10118_v31 = vpop.xlane.xlu1 %1149  ;;  %v1448_v13 = vrot.slane %v10052_v10, %v9951_v7  ;;  %v3444_v27 = vcombine.low %v3435_v57, %v3442_v41  ;;  %v1452_v58 = vrot.slane %v10052_v10, %v9955_v5  ;;  %v1456_v24 = vrot.slane %v10052_v10, %v9958_v42 }
 0x188   :  { %vm7024_vm8 = vcmp.eq.s32.totalorder %v9927_v20, %v10118_v31  ;;  %v1136_v33 = vadd.f32 %v9115_v12, %v1066_v56  ;;  %v3558_v55 = vcombine.low %v1428_v14, %v1432_v23  ;;  %v3559_v38 = vcombine.low %v1436_v50, %v1440_v44 }
 0x189   :  { %v8563_v21 = vsel %vm7024_vm8, 1.0, %v12854_v1  ;;  %8969 = vmatprep.mubr.msk.f32.mxu1 %vm7024_vm8, %v12852_v3  ;;  %v8564_v10 = vsel %vm7025_vm7, 1.0, %v12854_v1  ;;  %v10152_v32 = vcombine.low %v3402_v51, %v3409_v2  ;;  %v10154_v11 = vcombine.low %v3500_v60, %v3507_v25 }
 0x18a   :  { %v8382_v54 = vadd.f32 %v8563_v21, %v8381_v22  ;;  %8970 = vmatmul.mubr.msk.f32.vlgmr.msra.gmra.mrb[0].mxu1 %vm7025_vm7, %v12852_v3  ;;  %1259 = vmin.index.xlane.f32.xlu1 %v10013_v40  ;;  %v3451_v29 = vrot.slane %v3443_v6, %v9964_v49  ;;  %v3458_v18 = vrot.slane %v3444_v27, %v9964_v49 }
 0x18b   :  { %v1156_v56 = vpop.xlane.xlu1 %1155  ;;  %v3560_v53 = vcombine.low %v1444_v43, %v1448_v13  ;;  %v3561_v35 = vcombine.low %v1452_v58, %v1456_v24  ;;  %v3568_v40 = vrot.slane %v3558_v55, %v9964_v49  ;;  %v3575_v8 = vrot.slane %v3559_v38, %v9964_v49 }
 0x18c   :  { %v8383_v17 = vadd.f32 %v8564_v10, %v8382_v54  ;;  %v1556_v15 = vrot.slane %v1156_v56, %v9930_v37  ;;  %v1560_v28 = vrot.slane %v1156_v56, %v9933_v9  ;;  %v1564_v46 = vrot.slane %v1156_v56, %v9937_v45 }
 0x18d   :  { %v1568_v51 = vrot.slane %v1156_v56, %v9940_v62  ;;  %v1572_v16 = vrot.slane %v1156_v56, %v9948_v19  ;;  %v1576_v4 = vrot.slane %v1156_v56, %v9951_v7  ;;  %v1580_v61 = vrot.slane %v1156_v56, %v9955_v5 }
 0x18e   :  { %1263 = vmin.index.xlane.f32.xlu1 %v1136_v33  ;;  %v1584_v36 = vrot.slane %v1156_v56, %v9958_v42  ;;  %v3754_v47 = vcombine.low %v1556_v15, %v1560_v28  ;;  %vm7027_vm9 = vcmp.eq.s32.totalorder %v9927_v20, %v1156_v56  ;;  %v3582_v30 = vrot.slane %v3560_v53, %v9964_v49 }
 0x18f   :  { %v10168_v2 = vpop.xlane.xlu1 %1153  ;;  %v3755_v48 = vcombine.low %v1564_v46, %v1568_v51  ;;  %v3589_v22 = vrot.slane %v3561_v35, %v9964_v49  ;;  %v3756_v60 = vcombine.low %v1572_v16, %v1576_v4  ;;  %v10179_v57 = vcombine.low %v3568_v40, %v3575_v8 }
 0x190   :  { %vm7026_vm10 = vcmp.eq.s32.totalorder %v9927_v20, %v10168_v2  ;;  %v3757_v59 = vcombine.low %v1580_v61, %v1584_v36  ;;  %v3764_v63 = vrot.slane %v3754_v47, %v9964_v49  ;;  %v1396_v6 = vrot.slane %v10069_v52, %v9930_v37 }
 0x191   :  { %v8565_v25 = vsel %vm7026_vm10, 1.0, %v12854_v1  ;;  %8972 = vmatprep.mubr.msk.f32.mxu1 %vm7026_vm10, %v12852_v3  ;;  %v3771_v0 = vrot.slane %v3755_v48, %v9964_v49  ;;  %v10181_v41 = vcombine.low %v3582_v30, %v3589_v22  ;;  %v3778_v23 = vrot.slane %v3756_v60, %v9964_v49 }
 0x192   :  { %v8384_v14 = vadd.f32 %v8565_v25, %v8383_v17  ;;  %8973 = vmatmul.mubr.msk.f32.gmra.mrb[2].mxu1 %vm7027_vm9, %v12852_v3  ;;  %v3785_v50 = vrot.slane %v3757_v59, %v9964_v49  ;;  %v8566_v44 = vsel %vm7027_vm9, 1.0, %v12854_v1  ;;  %v10193_v27 = vcombine.low %v3451_v29, %v3458_v18 }
 0x193   :  { %v1160_v43 = vpop.xlane.xlu1 %1159  ;;  %v3786_v13 = vcombine.low %v3764_v63, %v3771_v0  ;;  %v1400_v58 = vrot.slane %v10069_v52, %v9933_v9  ;;  %v3598_v21 = vrot.slane %v10179_v57, %v9964_v49  ;;  %v3605_v10 = vrot.slane %v10181_v41, %v9964_v49 }
 0x194   :  { %v8385_v24 = vadd.f32 %v8566_v44, %v8384_v14  ;;  %v3787_v12 = vcombine.low %v3778_v23, %v3785_v50  ;;  %v1620_v33 = vrot.slane %v1160_v43, %v9930_v37  ;;  %v1624_v38 = vrot.slane %v1160_v43, %v9933_v9 }
 0x195   :  { %v3794_v55 = vrot.slane %v3786_v13, %v9964_v49  ;;  %v1628_v54 = vrot.slane %v1160_v43, %v9937_v45  ;;  %v1632_v29 = vrot.slane %v1160_v43, %v9940_v62  ;;  %v1636_v18 = vrot.slane %v1160_v43, %v9948_v19 }
 0x196   :  { %v3801_v56 = vrot.slane %v3787_v12, %v9964_v49  ;;  %v1640_v53 = vrot.slane %v1160_v43, %v9951_v7  ;;  %vm7029_vm11 = vcmp.eq.s32.totalorder %v9927_v20, %v1160_v43  ;;  %v1644_v17 = vrot.slane %v1160_v43, %v9955_v5 }
 0x197   :  { %v10209_v35 = vpop.xlane.xlu1 %1157  ;;  %v1648_v15 = vrot.slane %v1160_v43, %v9958_v42  ;;  %v3852_v28 = vcombine.low %v1620_v33, %v1624_v38  ;;  %v3853_v46 = vcombine.low %v1628_v54, %v1632_v29  ;;  %v1404_v61 = vrot.slane %v10069_v52, %v9937_v45 }
 0x198   :  { %v3802_v40 = vcombine.low %v3794_v55, %v3801_v56  ;;  %vm7028_vm12 = vcmp.eq.s32.totalorder %v9927_v20, %v10209_v35  ;;  %v3854_v51 = vcombine.low %v1636_v18, %v1640_v53  ;;  %v8568_v47 = vsel %vm7029_vm11, 1.0, %v12854_v1 }
 0x199   :  { %v8567_v16 = vsel %vm7028_vm12, 1.0, %v12854_v1  ;;  %8975 = vmatprep.mubr.msk.f32.mxu1 %vm7028_vm12, %v12852_v3  ;;  %v3855_v8 = vcombine.low %v1644_v17, %v1648_v15  ;;  %v3862_v4 = vrot.slane %v3852_v28, %v9964_v49  ;;  %v3869_v48 = vrot.slane %v3853_v46, %v9964_v49 }
 0x19a   :  { %6477 = vperm.xlu0 %9114, %v3802_v40   ;;  %v8386_v36 = vadd.f32 %v8567_v16, %v8385_v24  ;;  %8976 = vmatmul.mubr.msk.f32.gmra.mrb[4].mxu1 %vm7029_vm11, %v12852_v3  ;;  %v3876_v30 = vrot.slane %v3854_v51, %v9964_v49  ;;  %v1408_v59 = vrot.slane %v10069_v52, %v9940_v62 }
 0x19b   :  { %v1164_v22 = vpop.xlane.xlu1 %1163  ;;  %v3883_v60 = vrot.slane %v3855_v8, %v9964_v49  ;;  %v1412_v63 = vrot.slane %v10069_v52, %v9948_v19  ;;  %v1416_v25 = vrot.slane %v10069_v52, %v9951_v7  ;;  %v3884_v14 = vcombine.low %v3862_v4, %v3869_v48 }
 0x19c   :  { %v8387_v0 = vadd.f32 %v8568_v47, %v8386_v36  ;;  %v1684_v23 = vrot.slane %v1164_v22, %v9930_v37  ;;  %v1420_v50 = vrot.slane %v10069_v52, %v9955_v5  ;;  %vm7031_vm13 = vcmp.eq.s32.totalorder %v9927_v20, %v1164_v22 }
 0x19d   :  { %v3885_v44 = vcombine.low %v3876_v30, %v3883_v60  ;;  %v1688_v43 = vrot.slane %v1164_v22, %v9933_v9  ;;  %v1692_v13 = vrot.slane %v1164_v22, %v9937_v45  ;;  %v3892_v24 = vrot.slane %v3884_v14, %v9964_v49 }
 0x19e   :  { %v1696_v12 = vrot.slane %v1164_v22, %v9940_v62  ;;  %v1700_v33 = vrot.slane %v1164_v22, %v9948_v19  ;;  %v1704_v55 = vrot.slane %v1164_v22, %v9951_v7  ;;  %v1708_v56 = vrot.slane %v1164_v22, %v9955_v5 }
 0x19f   :  { %v10246_v38 = vpop.xlane.xlu1 %1161  ;;  %6453 = vperm.xlu1 %9113, %v10152_v32   ;;  %v3899_v54 = vrot.slane %v3885_v44, %v9964_v49  ;;  %v1712_v29 = vrot.slane %v1164_v22, %v9958_v42  ;;  %v3950_v18 = vcombine.low %v1684_v23, %v1688_v43  ;;  %v1424_v15 = vrot.slane %v10069_v52, %v9958_v42 }
 0x1a0   :  { %vm7030_vm14 = vcmp.eq.s32.totalorder %v9927_v20, %v10246_v38  ;;  %v3951_v53 = vcombine.low %v1692_v13, %v1696_v12  ;;  %v3952_v17 = vcombine.low %v1700_v33, %v1704_v55  ;;  %v3509_v4 = vcombine.low %v1396_v6, %v1400_v58 }
 0x1a1   :  { %v3900_v28 = vcombine.low %v3892_v24, %v3899_v54  ;;  %v8569_v40 = vsel %vm7030_vm14, 1.0, %v12854_v1  ;;  %8978 = vmatprep.mubr.msk.f32.mxu1 %vm7030_vm14, %v12852_v3  ;;  %v3953_v32 = vcombine.low %v1708_v56, %v1712_v29  ;;  %v3960_v46 = vrot.slane %v3950_v18, %v9964_v49 }
 0x1a2   :  { %v8388_v51 = vadd.f32 %v8569_v40, %v8387_v0  ;;  %8979 = vmatmul.mubr.msk.f32.gmra.mrb[6].mxu1 %vm7031_vm13, %v12852_v3  ;;  %v3967_v16 = vrot.slane %v3951_v53, %v9964_v49  ;;  %v3974_v8 = vrot.slane %v3952_v17, %v9964_v49  ;;  %v8570_v36 = vsel %vm7031_vm13, 1.0, %v12854_v1 }
 0x1a3   :  { %6483 = vperm.xlu0 %9114, %v3900_v28   ;;  %v1168_v47 = vpop.xlane.xlu1 %1167  ;;  %6459 = vperm.xlu1 %9113, %v10154_v11   ;;  %v3981_v48 = vrot.slane %v3953_v32, %v9964_v49  ;;  %v3510_v30 = vcombine.low %v1404_v61, %v1408_v59  ;;  %v3511_v60 = vcombine.low %v1412_v63, %v1416_v25 }
 0x1a4   :  { %v8389_v0 = vadd.f32 %v8570_v36, %v8388_v51  ;;  %v3982_v14 = vcombine.low %v3960_v46, %v3967_v16  ;;  %v3606_v52 = vcombine.low %v3598_v21, %v3605_v10  ;;  %v3512_v6 = vcombine.low %v1420_v50, %v1424_v15 }
 0x1a5   :  { %v3983_v58 = vcombine.low %v3974_v8, %v3981_v48  ;;  %vm7033_vm15 = vcmp.eq.s32.totalorder %v9927_v20, %v1168_v47  ;;  %v3519_v22 = vrot.slane %v3509_v4, %v9964_v49  ;;  %v3526_v11 = vrot.slane %v3510_v30, %v9964_v49 }
 0x1a6   :  { %v3990_v61 = vrot.slane %v3982_v14, %v9964_v49  ;;  %v3533_v59 = vrot.slane %v3511_v60, %v9964_v49  ;;  %v3540_v63 = vrot.slane %v3512_v6, %v9964_v49  ;;  %v1748_v41 = vrot.slane %v1168_v47, %v9930_v37 }
 0x1a7   :  { %v10288_v25 = vpop.xlane.xlu1 %1165  ;;  %6456 = vperm.xlu1 %9113, %v10193_v27   ;;  %v3997_v57 = vrot.slane %v3983_v58, %v9964_v49  ;;  %v3541_v21 = vcombine.low %v3519_v22, %v3526_v11  ;;  %v1752_v10 = vrot.slane %v1168_v47, %v9933_v9  ;;  %v1756_v23 = vrot.slane %v1168_v47, %v9937_v45 }
 0x1a8   :  { %vm7032_vm1 = vcmp.eq.s32.totalorder %v9927_v20, %v10288_v25  ;;  %v3542_v50 = vcombine.low %v3533_v59, %v3540_v63  ;;  %v1760_v44 = vrot.slane %v1168_v47, %v9940_v62  ;;  %v1764_v43 = vrot.slane %v1168_v47, %v9948_v19 }
 0x1a9   :  { %v3998_v13 = vcombine.low %v3990_v61, %v3997_v57  ;;  %v8571_v24 = vsel %vm7032_vm1, 1.0, %v12854_v1  ;;  %8981 = vmatprep.mubr.msk.f32.mxu1 %vm7032_vm1, %v12852_v3  ;;  %v3549_v27 = vrot.slane %v3541_v21, %v9964_v49  ;;  %v1768_v12 = vrot.slane %v1168_v47, %v9951_v7 }
 0x1aa   :  { %v8390_v33 = vadd.f32 %v8571_v24, %v8389_v0  ;;  %8982 = vmatmul.mubr.msk.f32.gmra.mrb[8].mxu1 %vm7033_vm15, %v12852_v3  ;;  %v3556_v55 = vrot.slane %v3542_v50, %v9964_v49  ;;  %v1772_v54 = vrot.slane %v1168_v47, %v9955_v5  ;;  %v1776_v56 = vrot.slane %v1168_v47, %v9958_v42 }
 0x1ab   :  { %6489 = vperm.xlu0 %9114, %v3998_v13   ;;  %v8572_v29 = vsel %vm7033_vm15, 1.0, %v12854_v1  ;;  %v10311_v18 = vpop.xlane.xlu1 %1171  ;;  %6465 = vperm.xlu1 %9113, %v3606_v52   ;;  %v4048_v53 = vcombine.low %v1748_v41, %v1752_v10  ;;  %v4049_v17 = vcombine.low %v1756_v23, %v1760_v44  ;;  %v4050_v15 = vcombine.low %v1764_v43, %v1768_v12 }
 0x1ac   :  { %v8391_v28 = vadd.f32 %v8572_v29, %v8390_v33  ;;  %v3557_v40 = vcombine.low %v3549_v27, %v3556_v55  ;;  %v4051_v32 = vcombine.low %v1772_v54, %v1776_v56  ;;  %vm7035_vm2 = vcmp.eq.s32.totalorder %v9927_v20, %v10311_v18 }
 0x1ad   :  { %v4058_v46 = vrot.slane %v4048_v53, %v9964_v49  ;;  %v4065_v51 = vrot.slane %v4049_v17, %v9964_v49  ;;  %v4072_v16 = vrot.slane %v4050_v15, %v9964_v49  ;;  %v8574_v8 = vsel %vm7035_vm2, 1.0, %v12854_v1 }
 0x1ae   :  { %v4079_v4 = vrot.slane %v4051_v32, %v9964_v49  ;;  %v1492_v36 = vrot.slane %v10099_v34, %v9930_v37  ;;  %v1496_v47 = vrot.slane %v10099_v34, %v9933_v9  ;;  %v1500_v48 = vrot.slane %v10099_v34, %v9937_v45 }
 0x1af   :  { %v10329_v30 = vpop.xlane.xlu1 %1169  ;;  %6462 = vperm.xlu1 %9113, %v3557_v40   ;;  %v4080_v60 = vcombine.low %v4058_v46, %v4065_v51  ;;  %v1504_v0 = vrot.slane %v10099_v34, %v9940_v62  ;;  %v1508_v14 = vrot.slane %v10099_v34, %v9948_v19  ;;  %v1512_v52 = vrot.slane %v10099_v34, %v9951_v7 }
 0x1b0   :  { %v4081_v6 = vcombine.low %v4072_v16, %v4079_v4  ;;  %vm7034_vm3 = vcmp.eq.s32.totalorder %v9927_v20, %v10329_v30  ;;  %v1516_v58 = vrot.slane %v10099_v34, %v9955_v5  ;;  %v1520_v22 = vrot.slane %v10099_v34, %v9958_v42 }
 0x1b1   :  { %v4088_v11 = vrot.slane %v4080_v60, %v9964_v49  ;;  %v8573_v61 = vsel %vm7034_vm3, 1.0, %v12854_v1  ;;  %8984 = vmatprep.mubr.msk.f32.mxu1 %vm7034_vm3, %v12852_v3  ;;  %v3656_v59 = vcombine.low %v1492_v36, %v1496_v47  ;;  %v3657_v63 = vcombine.low %v1500_v48, %v1504_v0 }
 0x1b2   :  { %v4095_v41 = vrot.slane %v4081_v6, %v9964_v49  ;;  %v8392_v57 = vadd.f32 %v8573_v61, %v8391_v28  ;;  %8985 = vmatmul.mubr.msk.f32.gmra.mrb[10].mxu1 %vm7035_vm2, %v12852_v3  ;;  %v3658_v21 = vcombine.low %v1508_v14, %v1512_v52  ;;  %v3659_v10 = vcombine.low %v1516_v58, %v1520_v22 }
 0x1b3   :  { %v10351_v23 = vpop.xlane.xlu1 %1175  ;;  %v3666_v34 = vrot.slane %v3656_v59, %v9964_v49  ;;  %v3673_v50 = vrot.slane %v3657_v63, %v9964_v49  ;;  %v1460_v44 = vrot.slane %v10118_v31, %v9930_v37  ;;  %v1464_v43 = vrot.slane %v10118_v31, %v9933_v9 }
 0x1b4   :  { %v4096_v13 = vcombine.low %v4088_v11, %v4095_v41  ;;  %v8393_v24 = vadd.f32 %v8574_v8, %v8392_v57  ;;  %v3680_v27 = vrot.slane %v3658_v21, %v9964_v49  ;;  %v3687_v12 = vrot.slane %v3659_v10, %v9964_v49 }
 0x1b5   :  { %v3688_v33 = vcombine.low %v3666_v34, %v3673_v50  ;;  %v1468_v55 = vrot.slane %v10118_v31, %v9937_v45  ;;  %v1472_v54 = vrot.slane %v10118_v31, %v9940_v62  ;;  %v1476_v56 = vrot.slane %v10118_v31, %v9948_v19 }
 0x1b6   :  { %6495 = vperm.xlu0 %9114, %v4096_v13   ;;  %v3689_v29 = vcombine.low %v3680_v27, %v3687_v12  ;;  %v1480_v53 = vrot.slane %v10118_v31, %v9951_v7  ;;  %v1484_v17 = vrot.slane %v10118_v31, %v9955_v5  ;;  %v1488_v15 = vrot.slane %v10118_v31, %v9958_v42 }
 0x1b7   :  { %v3696_v28 = vrot.slane %v3688_v33, %v9964_v49  ;;  %v3607_v40 = vcombine.low %v1460_v44, %v1464_v43  ;;  %v3608_v32 = vcombine.low %v1468_v55, %v1472_v54  ;;  %v1812_v46 = vrot.slane %v10311_v18, %v9930_v37  ;;  %v10379_v36 = vpop.xlane.xlu1 %1173 }
 0x1b8   :  { %v3703_v51 = vrot.slane %v3689_v29, %v9964_v49  ;;  %v3609_v16 = vcombine.low %v1476_v56, %v1480_v53  ;;  %v3610_v8 = vcombine.low %v1484_v17, %v1488_v15  ;;  %v1816_v4 = vrot.slane %v10311_v18, %v9933_v9 }
 0x1b9   :  { %v3617_v47 = vrot.slane %v3607_v40, %v9964_v49  ;;  %v3624_v31 = vrot.slane %v3608_v32, %v9964_v49  ;;  %v1820_v48 = vrot.slane %v10311_v18, %v9937_v45  ;;  %v1824_v60 = vrot.slane %v10311_v18, %v9940_v62 }
 0x1ba   :  { %v3704_v0 = vcombine.low %v3696_v28, %v3703_v51  ;;  %v3631_v14 = vrot.slane %v3609_v16, %v9964_v49  ;;  %v3638_v52 = vrot.slane %v3610_v8, %v9964_v49  ;;  %v1828_v6 = vrot.slane %v10311_v18, %v9948_v19 }
 0x1bb   :  { %v3639_v58 = vcombine.low %v3617_v47, %v3624_v31  ;;  %v1832_v22 = vrot.slane %v10311_v18, %v9951_v7  ;;  %v1836_v11 = vrot.slane %v10311_v18, %v9955_v5  ;;  %v1840_v61 = vrot.slane %v10311_v18, %v9958_v42 }
 0x1bc   :  { %6471 = vperm.xlu1 %9113, %v3704_v0   ;;  %v3640_v59 = vcombine.low %v3631_v14, %v3638_v52  ;;  %v4146_v63 = vcombine.low %v1812_v46, %v1816_v4  ;;  %v4147_v41 = vcombine.low %v1820_v48, %v1824_v60  ;;  %vm7036_vm4 = vcmp.eq.s32.totalorder %v9927_v20, %v10379_v36  ;;  %v10437_v0 = vpop.xlane.xlu1 %1179 }
 0x1bd   :  { %v3647_v57 = vrot.slane %v3639_v58, %v9964_v49  ;;  %v4148_v21 = vcombine.low %v1828_v6, %v1832_v22  ;;  %v4149_v10 = vcombine.low %v1836_v11, %v1840_v61  ;;  %v8575_v34 = vsel %vm7036_vm4, 1.0, %v12854_v1  ;;  %8987 = vmatprep.mubr.msk.f32.mxu1 %vm7036_vm4, %v12852_v3 }
 0x1be   :  { %v3654_v50 = vrot.slane %v3640_v59, %v9964_v49  ;;  %v4156_v44 = vrot.slane %v4146_v63, %v9964_v49  ;;  %v4163_v18 = vrot.slane %v4147_v41, %v9964_v49  ;;  %v8394_v43 = vadd.f32 %v8575_v34, %v8393_v24 }
 0x1bf   :  { %v4170_v13 = vrot.slane %v4148_v21, %v9964_v49  ;;  %v4177_v27 = vrot.slane %v4149_v10, %v9964_v49  ;;  %vm7037_vm5 = vcmp.eq.s32.totalorder %v9927_v20, %v10351_v23  ;;  %v1524_v12 = vrot.slane %v10168_v2, %v9930_v37 }
 0x1c0   :  { %v3655_v33 = vcombine.low %v3647_v57, %v3654_v50  ;;  %v4178_v55 = vcombine.low %v4156_v44, %v4163_v18  ;;  %v8576_v54 = vsel %vm7037_vm5, 1.0, %v12854_v1  ;;  %8988 = vmatmul.mubr.msk.f32.gmra.mrb[12].mxu1 %vm7037_vm5, %v12852_v3  ;;  %v1528_v56 = vrot.slane %v10168_v2, %v9933_v9 }
 0x1c1   :  { %v4179_v24 = vcombine.low %v4170_v13, %v4177_v27  ;;  %v10415_v29 = vadd.f32 %v8576_v54, %v8394_v43  ;;  %v1532_v53 = vrot.slane %v10168_v2, %v9937_v45  ;;  %v1536_v17 = vrot.slane %v10168_v2, %v9940_v62 }
 0x1c2   :  { %6468 = vperm.xlu1 %9113, %v3655_v33   ;;  %v4186_v15 = vrot.slane %v4178_v55, %v9964_v49  ;;  %v1540_v28 = vrot.slane %v10168_v2, %v9948_v19  ;;  %v1544_v40 = vrot.slane %v10168_v2, %v9951_v7  ;;  %v1548_v32 = vrot.slane %v10168_v2, %v9955_v5  ;;  %v10464_v55 = vpop.xlane.xlu1 %1177 }
 0x1c3   :  { %v4193_v46 = vrot.slane %v4179_v24, %v9964_v49  ;;  %v1552_v51 = vrot.slane %v10168_v2, %v9958_v42  ;;  %v3705_v16 = vcombine.low %v1524_v12, %v1528_v56  ;;  %v3706_v8 = vcombine.low %v1532_v53, %v1536_v17 }
 0x1c4   :  { %v3707_v4 = vcombine.low %v1540_v28, %v1544_v40  ;;  %v1588_v47 = vrot.slane %v10209_v35, %v9930_v37  ;;  %v1592_v31 = vrot.slane %v10209_v35, %v9933_v9  ;;  %v1596_v48 = vrot.slane %v10209_v35, %v9937_v45 }
 0x1c5   :  { %v4194_v60 = vcombine.low %v4186_v15, %v4193_v46  ;;  %v3708_v14 = vcombine.low %v1548_v32, %v1552_v51  ;;  %v3715_v52 = vrot.slane %v3705_v16, %v9964_v49  ;;  %v3722_v2 = vrot.slane %v3706_v8, %v9964_v49 }
 0x1c6   :  { %v3729_v6 = vrot.slane %v3707_v4, %v9964_v49  ;;  %v1600_v58 = vrot.slane %v10209_v35, %v9940_v62  ;;  %v1604_v22 = vrot.slane %v10209_v35, %v9948_v19  ;;  %v1608_v11 = vrot.slane %v10209_v35, %v9951_v7 }
 0x1c7   :  { %6501 = vperm.xlu0 %9114, %v4194_v60   ;;  %v3736_v61 = vrot.slane %v3708_v14, %v9964_v49  ;;  %v3737_v59 = vcombine.low %v3715_v52, %v3722_v2  ;;  %v1612_v63 = vrot.slane %v10209_v35, %v9955_v5  ;;  %v1616_v41 = vrot.slane %v10209_v35, %v9958_v42 }
 0x1c8   :  { %v3803_v57 = vcombine.low %v1588_v47, %v1592_v31  ;;  %v3804_v21 = vcombine.low %v1596_v48, %v1600_v58  ;;  %v3805_v10 = vcombine.low %v1604_v22, %v1608_v11  ;;  %v1876_v34 = vrot.slane %v10351_v23, %v9930_v37 }
 0x1c9   :  { %v3738_v50 = vcombine.low %v3729_v6, %v3736_v61  ;;  %v3745_v44 = vrot.slane %v3737_v59, %v9964_v49  ;;  %v3806_v18 = vcombine.low %v1612_v63, %v1616_v41  ;;  %v1880_v43 = vrot.slane %v10351_v23, %v9933_v9 }
 0x1ca   :  { %v3813_v13 = vrot.slane %v3803_v57, %v9964_v49  ;;  %v3820_v27 = vrot.slane %v3804_v21, %v9964_v49  ;;  %v3827_v12 = vrot.slane %v3805_v10, %v9964_v49  ;;  %v1884_v35 = vrot.slane %v10351_v23, %v9937_v45 }
 0x1cb   :  { %v3752_v33 = vrot.slane %v3738_v50, %v9964_v49  ;;  %v3834_v54 = vrot.slane %v3806_v18, %v9964_v49  ;;  %v1888_v56 = vrot.slane %v10351_v23, %v9940_v62  ;;  %v1892_v24 = vrot.slane %v10351_v23, %v9948_v19 }
 0x1cc   :  { %v3835_v53 = vcombine.low %v3813_v13, %v3820_v27  ;;  %v1896_v17 = vrot.slane %v10351_v23, %v9951_v7  ;;  %v1900_v15 = vrot.slane %v10351_v23, %v9955_v5  ;;  %v1904_v28 = vrot.slane %v10351_v23, %v9958_v42 }
 0x1cd   :  { %v3753_v40 = vcombine.low %v3745_v44, %v3752_v33  ;;  %v3836_v32 = vcombine.low %v3827_v12, %v3834_v54  ;;  %v4244_v46 = vcombine.low %v1876_v34, %v1880_v43  ;;  %v4245_v51 = vcombine.low %v1884_v35, %v1888_v56  ;;  %v10516_v35 = vpop.xlane.xlu1 %1183 }
 0x1ce   :  { %v3843_v16 = vrot.slane %v3835_v53, %v9964_v49  ;;  %v4246_v8 = vcombine.low %v1892_v24, %v1896_v17  ;;  %v4247_v4 = vcombine.low %v1900_v15, %v1904_v28  ;;  %vm7038_vm6 = vcmp.eq.s32.totalorder %v9927_v20, %v10464_v55 }
 0x1cf   :  { %6474 = vperm.xlu1 %9113, %v3753_v40   ;;  %v3850_v47 = vrot.slane %v3836_v32, %v9964_v49  ;;  %v4254_v31 = vrot.slane %v4244_v46, %v9964_v49  ;;  %v4261_v48 = vrot.slane %v4245_v51, %v9964_v49  ;;  %v8577_v23 = vsel %vm7038_vm6, 1.0, %v12854_v1  ;;  %8990 = vmatprep.mubr.msk.f32.mxu1 %vm7038_vm6, %v12852_v3 }
 0x1d0   :  { %v4268_v60 = vrot.slane %v4246_v8, %v9964_v49  ;;  %v4275_v14 = vrot.slane %v4247_v4, %v9964_v49  ;;  %v8396_v52 = vadd.f32 %v8577_v23, %v10415_v29  ;;  %vm7039_vm7 = vcmp.eq.s32.totalorder %v9927_v20, %v10437_v0 }
 0x1d1   :  { %v3851_v2 = vcombine.low %v3843_v16, %v3850_v47  ;;  %v4276_v6 = vcombine.low %v4254_v31, %v4261_v48  ;;  %v8578_v58 = vsel %vm7039_vm7, 1.0, %v12854_v1  ;;  %8991 = vmatmul.mubr.msk.f32.gmra.mrb[14].mxu1 %vm7039_vm7, %v12852_v3  ;;  %v1652_v22 = vrot.slane %v10246_v38, %v9930_v37 }
 0x1d2   :  { %v4277_v11 = vcombine.low %v4268_v60, %v4275_v14  ;;  %v10494_v61 = vadd.f32 %v8578_v58, %v8396_v52  ;;  %v1656_v59 = vrot.slane %v10246_v38, %v9933_v9  ;;  %v1660_v29 = vrot.slane %v10246_v38, %v9937_v45 }
 0x1d3   :  { %6480 = vperm.xlu1 %9113, %v3851_v2   ;;  %v4284_v63 = vrot.slane %v4276_v6, %v9964_v49  ;;  %v1664_v41 = vrot.slane %v10246_v38, %v9940_v62  ;;  %v1668_v57 = vrot.slane %v10246_v38, %v9948_v19  ;;  %v1672_v21 = vrot.slane %v10246_v38, %v9951_v7  ;;  %v10544_v2 = vpop.xlane.xlu1 %1181 }
 0x1d4   :  { %v4291_v10 = vrot.slane %v4277_v11, %v9964_v49  ;;  %v1676_v34 = vrot.slane %v10246_v38, %v9955_v5  ;;  %v1680_v50 = vrot.slane %v10246_v38, %v9958_v42  ;;  %v3901_v44 = vcombine.low %v1652_v22, %v1656_v59 }
 0x1d5   :  { %v3902_v18 = vcombine.low %v1660_v29, %v1664_v41  ;;  %v3903_v43 = vcombine.low %v1668_v57, %v1672_v21  ;;  %v1716_v13 = vrot.slane %v10288_v25, %v9930_v37  ;;  %v1720_v27 = vrot.slane %v10288_v25, %v9933_v9 }
 0x1d6   :  { %v4292_v12 = vcombine.low %v4284_v63, %v4291_v10  ;;  %v3904_v33 = vcombine.low %v1676_v34, %v1680_v50  ;;  %v3911_v54 = vrot.slane %v3901_v44, %v9964_v49  ;;  %v1724_v56 = vrot.slane %v10288_v25, %v9937_v45 }
 0x1d7   :  { %v3918_v38 = vrot.slane %v3902_v18, %v9964_v49  ;;  %v3925_v24 = vrot.slane %v3903_v43, %v9964_v49  ;;  %v1728_v53 = vrot.slane %v10288_v25, %v9940_v62  ;;  %v1732_v17 = vrot.slane %v10288_v25, %v9948_v19 }
 0x1d8   :  { %6507 = vperm.xlu0 %9114, %v4292_v12   ;;  %v3932_v15 = vrot.slane %v3904_v33, %v9964_v49  ;;  %v1736_v28 = vrot.slane %v10288_v25, %v9951_v7  ;;  %v1740_v40 = vrot.slane %v10288_v25, %v9955_v5  ;;  %v1744_v32 = vrot.slane %v10288_v25, %v9958_v42 }
 0x1d9   :  { %v3933_v46 = vcombine.low %v3911_v54, %v3918_v38  ;;  %v3999_v51 = vcombine.low %v1716_v13, %v1720_v27  ;;  %v4000_v16 = vcombine.low %v1724_v56, %v1728_v53  ;;  %v1940_v8 = vrot.slane %v10437_v0, %v9930_v37 }
 0x1da   :  { %v3934_v4 = vcombine.low %v3925_v24, %v3932_v15  ;;  %v4001_v47 = vcombine.low %v1732_v17, %v1736_v28  ;;  %v4002_v31 = vcombine.low %v1740_v40, %v1744_v32  ;;  %v1944_v48 = vrot.slane %v10437_v0, %v9933_v9  ;;  %v10575_v15 = vpop.xlane.xlu1 %1185 }
 0x1db   :  { %v3941_v23 = vrot.slane %v3933_v46, %v9964_v49  ;;  %v4009_v60 = vrot.slane %v3999_v51, %v9964_v49  ;;  %v4016_v14 = vrot.slane %v4000_v16, %v9964_v49  ;;  %v1948_v25 = vrot.slane %v10437_v0, %v9937_v45 }
 0x1dc   :  { %v3948_v52 = vrot.slane %v3934_v4, %v9964_v49  ;;  %v4023_v6 = vrot.slane %v4001_v47, %v9964_v49  ;;  %v4030_v58 = vrot.slane %v4002_v31, %v9964_v49  ;;  %v1952_v22 = vrot.slane %v10437_v0, %v9940_v62 }
 0x1dd   :  { %v4031_v11 = vcombine.low %v4009_v60, %v4016_v14  ;;  %v1956_v59 = vrot.slane %v10437_v0, %v9948_v19  ;;  %v1960_v29 = vrot.slane %v10437_v0, %v9951_v7  ;;  %v1964_v63 = vrot.slane %v10437_v0, %v9955_v5 }
 0x1de   :  { %v3949_v41 = vcombine.low %v3941_v23, %v3948_v52  ;;  %v4032_v57 = vcombine.low %v4023_v6, %v4030_v58  ;;  %v1968_v21 = vrot.slane %v10437_v0, %v9958_v42  ;;  %v4342_v10 = vcombine.low %v1940_v8, %v1944_v48 }
 0x1df   :  { %v4039_v34 = vrot.slane %v4031_v11, %v9964_v49  ;;  %v4343_v50 = vcombine.low %v1948_v25, %v1952_v22  ;;  %v4344_v44 = vcombine.low %v1956_v59, %v1960_v29  ;;  %vm7040_vm8 = vcmp.eq.s32.totalorder %v9927_v20, %v10544_v2 }
 0x1e0   :  { %6486 = vperm.xlu1 %9113, %v3949_v41   ;;  %v4046_v18 = vrot.slane %v4032_v57, %v9964_v49  ;;  %v4345_v43 = vcombine.low %v1964_v63, %v1968_v21  ;;  %v4352_v13 = vrot.slane %v4342_v10, %v9964_v49  ;;  %v8579_v27 = vsel %vm7040_vm8, 1.0, %v12854_v1  ;;  %8993 = vmatprep.mubr.msk.f32.mxu1 %vm7040_vm8, %v12852_v3 }
 0x1e1   :  { %v4359_v0 = vrot.slane %v4343_v50, %v9964_v49  ;;  %v4366_v12 = vrot.slane %v4344_v44, %v9964_v49  ;;  %v8398_v33 = vadd.f32 %v8579_v27, %v10494_v61  ;;  %vm7041_vm9 = vcmp.eq.s32.totalorder %v9927_v20, %v10516_v35 }
 0x1e2   :  { %v4047_v54 = vcombine.low %v4039_v34, %v4046_v18  ;;  %v4373_v56 = vrot.slane %v4345_v43, %v9964_v49  ;;  %v8580_v38 = vsel %vm7041_vm9, 1.0, %v12854_v1  ;;  %8994 = vmatmul.mubr.msk.f32.gmra.mrb[16].mxu1 %vm7041_vm9, %v12852_v3  ;;  %v1780_v24 = vrot.slane %v10329_v30, %v9930_v37 }
 0x1e3   :  { %v4374_v53 = vcombine.low %v4352_v13, %v4359_v0  ;;  %v8399_v17 = vadd.f32 %v8580_v38, %v8398_v33  ;;  %v1784_v61 = vrot.slane %v10329_v30, %v9933_v9  ;;  %v1788_v28 = vrot.slane %v10329_v30, %v9937_v45  ;;  %v10625_v38 = vpop.xlane.xlu1 %1187 }
 0x1e4   :  { %6492 = vperm.xlu1 %9113, %v4047_v54   ;;  %v4375_v40 = vcombine.low %v4366_v12, %v4373_v56  ;;  %v1792_v32 = vrot.slane %v10329_v30, %v9940_v62  ;;  %v1796_v46 = vrot.slane %v10329_v30, %v9948_v19  ;;  %v1800_v51 = vrot.slane %v10329_v30, %v9951_v7 }
 0x1e5   :  { %v4382_v16 = vrot.slane %v4374_v53, %v9964_v49  ;;  %v1804_v8 = vrot.slane %v10329_v30, %v9955_v5  ;;  %v1808_v4 = vrot.slane %v10329_v30, %v9958_v42  ;;  %v4097_v47 = vcombine.low %v1780_v24, %v1784_v61  ;;  %v10634_v61 = vpop.xlane.xlu0 %1189 }
 0x1e6   :  { %v4389_v31 = vrot.slane %v4375_v40, %v9964_v49  ;;  %v4098_v48 = vcombine.low %v1788_v28, %v1792_v32  ;;  %v4099_v23 = vcombine.low %v1796_v46, %v1800_v51  ;;  %vm7042_vm10 = vcmp.eq.s32.totalorder %v9927_v20, %v10575_v15 }
 0x1e7   :  { %v4100_v60 = vcombine.low %v1804_v8, %v1808_v4  ;;  %v4107_v14 = vrot.slane %v4097_v47, %v9964_v49  ;;  %v8581_v25 = vsel %vm7042_vm10, 1.0, %v12854_v1  ;;  %8996 = vmatprep.mubr.msk.f32.mxu1 %vm7042_vm10, %v12852_v3  ;;  %v1844_v52 = vrot.slane %v10379_v36, %v9930_v37 }
 0x1e8   :  { %v4390_v6 = vcombine.low %v4382_v16, %v4389_v31  ;;  %v4114_v30 = vrot.slane %v4098_v48, %v9964_v49  ;;  %v4121_v58 = vrot.slane %v4099_v23, %v9964_v49  ;;  %v8400_v22 = vadd.f32 %v8581_v25, %v8399_v17 }
 0x1e9   :  { %v4128_v11 = vrot.slane %v4100_v60, %v9964_v49  ;;  %v1848_v59 = vrot.slane %v10379_v36, %v9933_v9  ;;  %v1852_v29 = vrot.slane %v10379_v36, %v9937_v45  ;;  %v1856_v63 = vrot.slane %v10379_v36, %v9940_v62 }
 0x1ea   :  { %6513 = vperm.xlu0 %9114, %v4390_v6   ;;  %v4129_v41 = vcombine.low %v4107_v14, %v4114_v30  ;;  %v1860_v57 = vrot.slane %v10379_v36, %v9948_v19  ;;  %v1864_v21 = vrot.slane %v10379_v36, %v9951_v7  ;;  %v1868_v10 = vrot.slane %v10379_v36, %v9955_v5 }
 0x1eb   :  { %v4130_v34 = vcombine.low %v4121_v58, %v4128_v11  ;;  %v1872_v50 = vrot.slane %v10379_v36, %v9958_v42  ;;  %v4195_v44 = vcombine.low %v1844_v52, %v1848_v59  ;;  %v4196_v18 = vcombine.low %v1852_v29, %v1856_v63  ;;  %v10659_v29 = vpop.xlane.xlu0 %1193 }
 0x1ec   :  { %v4137_v43 = vrot.slane %v4129_v41, %v9964_v49  ;;  %v4197_v13 = vcombine.low %v1860_v57, %v1864_v21  ;;  %v2004_v27 = vrot.slane %v10516_v35, %v9930_v37  ;;  %v2008_v0 = vrot.slane %v10516_v35, %v9933_v9  ;;  %v10661_v57 = vpop.xlane.xlu1 %1191 }
 0x1ed   :  { %v4144_v12 = vrot.slane %v4130_v34, %v9964_v49  ;;  %v4198_v33 = vcombine.low %v1868_v10, %v1872_v50  ;;  %v4205_v54 = vrot.slane %v4195_v44, %v9964_v49  ;;  %v4212_v56 = vrot.slane %v4196_v18, %v9964_v49 }
 0x1ee   :  { %v4219_v36 = vrot.slane %v4197_v13, %v9964_v49  ;;  %v2012_v24 = vrot.slane %v10516_v35, %v9937_v45  ;;  %v2016_v53 = vrot.slane %v10516_v35, %v9940_v62  ;;  %v2020_v17 = vrot.slane %v10516_v35, %v9948_v19 }
 0x1ef   :  { %v4145_v28 = vcombine.low %v4137_v43, %v4144_v12  ;;  %v4226_v40 = vrot.slane %v4198_v33, %v9964_v49  ;;  %v4227_v32 = vcombine.low %v4205_v54, %v4212_v56  ;;  %v2024_v46 = vrot.slane %v10516_v35, %v9951_v7 }
 0x1f0   :  { %v2028_v51 = vrot.slane %v10516_v35, %v9955_v5  ;;  %v2032_v16 = vrot.slane %v10516_v35, %v9958_v42  ;;  %v4440_v8 = vcombine.low %v2004_v27, %v2008_v0  ;;  %v4441_v4 = vcombine.low %v2012_v24, %v2016_v53 }
 0x1f1   :  { %6498 = vperm.xlu1 %9113, %v4145_v28   ;;  %v4228_v47 = vcombine.low %v4219_v36, %v4226_v40  ;;  %v4235_v31 = vrot.slane %v4227_v32, %v9964_v49  ;;  %v4442_v48 = vcombine.low %v2020_v17, %v2024_v46  ;;  %vm7043_vm11 = vcmp.eq.s32.totalorder %v9927_v20, %v10625_v38 }
 0x1f2   :  { %v4443_v23 = vcombine.low %v2028_v51, %v2032_v16  ;;  %v4450_v60 = vrot.slane %v4440_v8, %v9964_v49  ;;  %v4457_v14 = vrot.slane %v4441_v4, %v9964_v49  ;;  %v8582_v25 = vsel %vm7043_vm11, 1.0, %v12854_v1  ;;  %8997 = vmatmul.mubr.msk.f32.gmra.mrb[18].mxu1 %vm7043_vm11, %v12852_v3  ;;  %v10695_v51 = vpop.xlane.xlu0 %1197  ;;  %v10697_v4 = vpop.xlane.xlu1 %1195 }
 0x1f3   :  { %v4242_v35 = vrot.slane %v4228_v47, %v9964_v49  ;;  %v4464_v52 = vrot.slane %v4442_v48, %v9964_v49  ;;  %v8401_v6 = vadd.f32 %v8582_v25, %v8400_v22  ;;  %vm7044_vm12 = vcmp.eq.s32.totalorder %v9927_v20, %v10634_v61 }
 0x1f4   :  { %v4471_v30 = vrot.slane %v4443_v23, %v9964_v49  ;;  %v4472_v58 = vcombine.low %v4450_v60, %v4457_v14  ;;  %v8583_v11 = vsel %vm7044_vm12, 1.0, %v12854_v1  ;;  %8999 = vmatprep.mubr.msk.f32.mxu1 %vm7044_vm12, %v12852_v3  ;;  %v1908_v59 = vrot.slane %v10464_v55, %v9930_v37 }
 0x1f5   :  { %v4243_v63 = vcombine.low %v4235_v31, %v4242_v35  ;;  %v8402_v41 = vadd.f32 %v8583_v11, %v8401_v6  ;;  %v1912_v22 = vrot.slane %v10464_v55, %v9933_v9  ;;  %v1916_v21 = vrot.slane %v10464_v55, %v9937_v45 }
 0x1f6   :  { %v4473_v10 = vcombine.low %v4464_v52, %v4471_v30  ;;  %v4480_v34 = vrot.slane %v4472_v58, %v9964_v49  ;;  %v1920_v50 = vrot.slane %v10464_v55, %v9940_v62  ;;  %v1924_v44 = vrot.slane %v10464_v55, %v9948_v19 }
 0x1f7   :  { %6504 = vperm.xlu1 %9113, %v4243_v63   ;;  %v1928_v18 = vrot.slane %v10464_v55, %v9951_v7  ;;  %v1932_v43 = vrot.slane %v10464_v55, %v9955_v5  ;;  %v1936_v13 = vrot.slane %v10464_v55, %v9958_v42  ;;  %v4293_v27 = vcombine.low %v1908_v59, %v1912_v22 }
 0x1f8   :  { %v4487_v0 = vrot.slane %v4473_v10, %v9964_v49  ;;  %v4294_v12 = vcombine.low %v1916_v21, %v1920_v50  ;;  %vm7045_vm13 = vcmp.eq.s32.totalorder %v9927_v20, %v10661_v57  ;;  %vm7046_vm14 = vcmp.eq.s32.totalorder %v9927_v20, %v10659_v29 }
 0x1f9   :  { %v4295_v33 = vcombine.low %v1924_v44, %v1928_v18  ;;  %v4296_v54 = vcombine.low %v1932_v43, %v1936_v13  ;;  %v4303_v56 = vrot.slane %v4293_v27, %v9964_v49  ;;  %v8584_v36 = vsel %vm7045_vm13, 1.0, %v12854_v1  ;;  %9000 = vmatmul.mubr.msk.f32.gmra.mrb[20].mxu1 %vm7045_vm13, %v12852_v3 }
 0x1fa   :  { %v4488_v24 = vcombine.low %v4480_v34, %v4487_v0  ;;  %v4310_v55 = vrot.slane %v4294_v12, %v9964_v49  ;;  %v8403_v53 = vadd.f32 %v8584_v36, %v8402_v41  ;;  %v8585_v17 = vsel %vm7046_vm14, 1.0, %v12854_v1  ;;  %9002 = vmatprep.mubr.msk.f32.mxu1 %vm7046_vm14, %v12852_v3 }
 0x1fb   :  { %v4317_v28 = vrot.slane %v4295_v33, %v9964_v49  ;;  %v4324_v40 = vrot.slane %v4296_v54, %v9964_v49  ;;  %v1972_v32 = vrot.slane %v10544_v2, %v9930_v37  ;;  %v1976_v46 = vrot.slane %v10544_v2, %v9933_v9 }
 0x1fc   :  { %6519 = vperm.xlu0 %9114, %v4488_v24   ;;  %v4325_v16 = vcombine.low %v4303_v56, %v4310_v55  ;;  %v8404_v8 = vadd.f32 %v8585_v17, %v8403_v53  ;;  %v1980_v47 = vrot.slane %v10544_v2, %v9937_v45  ;;  %v1984_v31 = vrot.slane %v10544_v2, %v9940_v62 }
 0x1fd   :  { %v4326_v48 = vcombine.low %v4317_v28, %v4324_v40  ;;  %v1988_v23 = vrot.slane %v10544_v2, %v9948_v19  ;;  %v1992_v60 = vrot.slane %v10544_v2, %v9951_v7  ;;  %v1996_v14 = vrot.slane %v10544_v2, %v9955_v5 }
 0x1fe   :  { %v4333_v25 = vrot.slane %v4325_v16, %v9964_v49  ;;  %v2000_v35 = vrot.slane %v10544_v2, %v9958_v42  ;;  %v4391_v52 = vcombine.low %v1972_v32, %v1976_v46  ;;  %v4392_v6 = vcombine.low %v1980_v47, %v1984_v31  ;;  %v10749_v46 = vpop.xlane.xlu1 %1199 }
 0x1ff   :  { %v4340_v30 = vrot.slane %v4326_v48, %v9964_v49  ;;  %v4393_v58 = vcombine.low %v1988_v23, %v1992_v60  ;;  %vm7047_vm15 = vcmp.eq.s32.totalorder %v9927_v20, %v10697_v4  ;;  %vm7048_vm1 = vcmp.eq.s32.totalorder %v9927_v20, %v10695_v51 }
 0x200   :  { %v4394_v11 = vcombine.low %v1996_v14, %v2000_v35  ;;  %v4401_v59 = vrot.slane %v4391_v52, %v9964_v49  ;;  %v4408_v63 = vrot.slane %v4392_v6, %v9964_v49  ;;  %v8586_v41 = vsel %vm7047_vm15, 1.0, %v12854_v1  ;;  %9003 = vmatmul.mubr.msk.f32.gmra.mrb[22].mxu1 %vm7047_vm15, %v12852_v3  ;;  %v10765_v6 = vpop.xlane.xlu0 %1201 }
 0x201   :  { %v4341_v2 = vcombine.low %v4333_v25, %v4340_v30  ;;  %v4415_v22 = vrot.slane %v4393_v58, %v9964_v49  ;;  %v8405_v21 = vadd.f32 %v8586_v41, %v8404_v8  ;;  %v8587_v10 = vsel %vm7048_vm1, 1.0, %v12854_v1  ;;  %9005 = vmatprep.mubr.msk.f32.mxu1 %vm7048_vm1, %v12852_v3 }
 0x202   :  { %v4422_v34 = vrot.slane %v4394_v11, %v9964_v49  ;;  %v4423_v50 = vcombine.low %v4401_v59, %v4408_v63  ;;  %v2036_v44 = vrot.slane %v10575_v15, %v9930_v37  ;;  %v2040_v18 = vrot.slane %v10575_v15, %v9933_v9 }
 0x203   :  { %6510 = vperm.xlu1 %9113, %v4341_v2   ;;  %v8406_v43 = vadd.f32 %v8587_v10, %v8405_v21  ;;  %v2044_v13 = vrot.slane %v10575_v15, %v9937_v45  ;;  %v2048_v27 = vrot.slane %v10575_v15, %v9940_v62  ;;  %v2052_v0 = vrot.slane %v10575_v15, %v9948_v19 }
 0x204   :  { %v4424_v12 = vcombine.low %v4415_v22, %v4422_v34  ;;  %v4431_v33 = vrot.slane %v4423_v50, %v9964_v49  ;;  %v2056_v54 = vrot.slane %v10575_v15, %v9951_v7  ;;  %v2060_v56 = vrot.slane %v10575_v15, %v9955_v5 }
 0x205   :  { %v2064_v36 = vrot.slane %v10575_v15, %v9958_v42  ;;  %v4489_v24 = vcombine.low %v2036_v44, %v2040_v18  ;;  %v4490_v55 = vcombine.low %v2044_v13, %v2048_v27  ;;  %v2068_v53 = vrot.slane %v10625_v38, %v9930_v37 }
 0x206   :  { %v4438_v17 = vrot.slane %v4424_v12, %v9964_v49  ;;  %v4491_v28 = vcombine.low %v2052_v0, %v2056_v54  ;;  %v2072_v40 = vrot.slane %v10625_v38, %v9933_v9  ;;  %v2076_v32 = vrot.slane %v10625_v38, %v9937_v45 }
 0x207   :  { %v4492_v16 = vcombine.low %v2060_v56, %v2064_v36  ;;  %v4499_v8 = vrot.slane %v4489_v24, %v9964_v49  ;;  %v4506_v15 = vrot.slane %v4490_v55, %v9964_v49  ;;  %v2080_v47 = vrot.slane %v10625_v38, %v9940_v62 }
 0x208   :  { %v4439_v31 = vcombine.low %v4431_v33, %v4438_v17  ;;  %v4513_v48 = vrot.slane %v4491_v28, %v9964_v49  ;;  %v2084_v23 = vrot.slane %v10625_v38, %v9948_v19  ;;  %v2088_v60 = vrot.slane %v10625_v38, %v9951_v7 }
 0x209   :  { %v4520_v14 = vrot.slane %v4492_v16, %v9964_v49  ;;  %v4521_v25 = vcombine.low %v4499_v8, %v4506_v15  ;;  %v2092_v35 = vrot.slane %v10625_v38, %v9955_v5  ;;  %v2096_v52 = vrot.slane %v10625_v38, %v9958_v42 }
 0x20a   :  { %6516 = vperm.xlu1 %9113, %v4439_v31   ;;  %v4538_v30 = vcombine.low %v2068_v53, %v2072_v40  ;;  %v4539_v58 = vcombine.low %v2076_v32, %v2080_v47  ;;  %v4540_v11 = vcombine.low %v2084_v23, %v2088_v60  ;;  %vm7049_vm2 = vcmp.eq.s32.totalorder %v9927_v20, %v10749_v46  ;;  %v10805_v31 = vpop.xlane.xlu1 %1203 }
 0x20b   :  { %v4522_v59 = vcombine.low %v4513_v48, %v4520_v14  ;;  %v4529_v63 = vrot.slane %v4521_v25, %v9964_v49  ;;  %v4541_v41 = vcombine.low %v2092_v35, %v2096_v52  ;;  %v8588_v2 = vsel %vm7049_vm2, 1.0, %v12854_v1  ;;  %9006 = vmatmul.mubr.msk.f32.gmra.mrb[24].mxu1 %vm7049_vm2, %v12852_v3 }
 0x20c   :  { %v4548_v22 = vrot.slane %v4538_v30, %v9964_v49  ;;  %v4555_v38 = vrot.slane %v4539_v58, %v9964_v49  ;;  %v4562_v21 = vrot.slane %v4540_v11, %v9964_v49  ;;  %v8407_v10 = vadd.f32 %v8588_v2, %v8406_v43 }
 0x20d   :  { %v4536_v34 = vrot.slane %v4522_v59, %v9964_v49  ;;  %v4569_v50 = vrot.slane %v4541_v41, %v9964_v49  ;;  %vm7050_vm3 = vcmp.eq.s32.totalorder %v9927_v20, %v10765_v6  ;;  %v2100_v44 = vrot.slane %v10634_v61, %v9930_v37  ;;  %v10821_v59 = vpop.xlane.xlu0 %1205 }
 0x20e   :  { %v4570_v18 = vcombine.low %v4548_v22, %v4555_v38  ;;  %v8589_v13 = vsel %vm7050_vm3, 1.0, %v12854_v1  ;;  %9008 = vmatprep.mubr.msk.f32.mxu1 %vm7050_vm3, %v12852_v3  ;;  %v2104_v27 = vrot.slane %v10634_v61, %v9933_v9  ;;  %v2108_v43 = vrot.slane %v10634_v61, %v9937_v45 }
 0x20f   :  { %v4537_v0 = vcombine.low %v4529_v63, %v4536_v34  ;;  %v4571_v12 = vcombine.low %v4562_v21, %v4569_v50  ;;  %v8408_v33 = vadd.f32 %v8589_v13, %v8407_v10  ;;  %v2112_v54 = vrot.slane %v10634_v61, %v9940_v62 }
 0x210   :  { %v4578_v56 = vrot.slane %v4570_v18, %v9964_v49  ;;  %v2116_v36 = vrot.slane %v10634_v61, %v9948_v19  ;;  %v2120_v24 = vrot.slane %v10634_v61, %v9951_v7  ;;  %v2124_v55 = vrot.slane %v10634_v61, %v9955_v5 }
 0x211   :  { %6522 = vperm.xlu1 %9113, %v4537_v0   ;;  %v4585_v53 = vrot.slane %v4571_v12, %v9964_v49  ;;  %v2128_v17 = vrot.slane %v10634_v61, %v9958_v42  ;;  %v4587_v28 = vcombine.low %v2100_v44, %v2104_v27  ;;  %v4588_v40 = vcombine.low %v2108_v43, %v2112_v54 }
 0x212   :  { %v4589_v32 = vcombine.low %v2116_v36, %v2120_v24  ;;  %v2132_v16 = vrot.slane %v10661_v57, %v9930_v37  ;;  %v2136_v8 = vrot.slane %v10661_v57, %v9933_v9  ;;  %v2140_v15 = vrot.slane %v10661_v57, %v9937_v45 }
 0x213   :  { %v4586_v47 = vcombine.low %v4578_v56, %v4585_v53  ;;  %v4590_v48 = vcombine.low %v2124_v55, %v2128_v17  ;;  %v4597_v23 = vrot.slane %v4587_v28, %v9964_v49  ;;  %v4604_v61 = vrot.slane %v4588_v40, %v9964_v49 }
 0x214   :  { %v4611_v60 = vrot.slane %v4589_v32, %v9964_v49  ;;  %v2144_v14 = vrot.slane %v10661_v57, %v9940_v62  ;;  %v2148_v25 = vrot.slane %v10661_v57, %v9948_v19  ;;  %v2152_v35 = vrot.slane %v10661_v57, %v9951_v7 }
 0x215   :  { %6525 = vperm.xlu0 %9114, %v4586_v47   ;;  %v4618_v52 = vrot.slane %v4590_v48, %v9964_v49  ;;  %v4619_v30 = vcombine.low %v4597_v23, %v4604_v61  ;;  %v2156_v58 = vrot.slane %v10661_v57, %v9955_v5  ;;  %v2160_v11 = vrot.slane %v10661_v57, %v9958_v42 }
 0x216   :  { %v4636_v63 = vcombine.low %v2132_v16, %v2136_v8  ;;  %v4637_v41 = vcombine.low %v2140_v15, %v2144_v14  ;;  %v4638_v2 = vcombine.low %v2148_v25, %v2152_v35  ;;  %vm7051_vm4 = vcmp.eq.s32.totalorder %v9927_v20, %v10805_v31  ;;  %v10855_v15 = vpop.xlane.xlu1 %1207 }
 0x217   :  { %v4620_v22 = vcombine.low %v4611_v60, %v4618_v52  ;;  %v4627_v38 = vrot.slane %v4619_v30, %v9964_v49  ;;  %v4639_v21 = vcombine.low %v2156_v58, %v2160_v11  ;;  %v8590_v10 = vsel %vm7051_vm4, 1.0, %v12854_v1  ;;  %9009 = vmatmul.mubr.msk.f32.gmra.mrb[26].mxu1 %vm7051_vm4, %v12852_v3 }
 0x218   :  { %v4646_v34 = vrot.slane %v4636_v63, %v9964_v49  ;;  %v4653_v57 = vrot.slane %v4637_v41, %v9964_v49  ;;  %v4660_v50 = vrot.slane %v4638_v2, %v9964_v49  ;;  %v8409_v44 = vadd.f32 %v8590_v10, %v8408_v33 }
 0x219   :  { %v4634_v18 = vrot.slane %v4620_v22, %v9964_v49  ;;  %v4667_v13 = vrot.slane %v4639_v21, %v9964_v49  ;;  %vm7052_vm5 = vcmp.eq.s32.totalorder %v9927_v20, %v10821_v59  ;;  %v2164_v27 = vrot.slane %v10659_v29, %v9930_v37  ;;  %v10877_v22 = vpop.xlane.xlu0 %1209 }
 0x21a   :  { %v4668_v43 = vcombine.low %v4646_v34, %v4653_v57  ;;  %v8591_v0 = vsel %vm7052_vm5, 1.0, %v12854_v1  ;;  %9011 = vmatprep.mubr.msk.f32.mxu1 %vm7052_vm5, %v12852_v3  ;;  %v2168_v12 = vrot.slane %v10659_v29, %v9933_v9  ;;  %v2172_v33 = vrot.slane %v10659_v29, %v9937_v45 }
 0x21b   :  { %v4635_v54 = vcombine.low %v4627_v38, %v4634_v18  ;;  %v4669_v56 = vcombine.low %v4660_v50, %v4667_v13  ;;  %v8410_v36 = vadd.f32 %v8591_v0, %v8409_v44  ;;  %v2176_v24 = vrot.slane %v10659_v29, %v9940_v62 }
 0x21c   :  { %v4676_v55 = vrot.slane %v4668_v43, %v9964_v49  ;;  %v2180_v53 = vrot.slane %v10659_v29, %v9948_v19  ;;  %v2184_v17 = vrot.slane %v10659_v29, %v9951_v7  ;;  %v2188_v28 = vrot.slane %v10659_v29, %v9955_v5  ;;  %v10887_v43 = vpop.xlane.xlu1 %1211 }
 0x21d   :  { %6528 = vperm.xlu1 %9113, %v4635_v54   ;;  %v4683_v40 = vrot.slane %v4669_v56, %v9964_v49  ;;  %v2192_v32 = vrot.slane %v10659_v29, %v9958_v42  ;;  %v4685_v16 = vcombine.low %v2164_v27, %v2168_v12  ;;  %v4686_v8 = vcombine.low %v2172_v33, %v2176_v24 }
 0x21e   :  { %v4687_v47 = vcombine.low %v2180_v53, %v2184_v17  ;;  %v2196_v48 = vrot.slane %v10697_v4, %v9930_v37  ;;  %v2200_v23 = vrot.slane %v10697_v4, %v9933_v9  ;;  %v2204_v61 = vrot.slane %v10697_v4, %v9937_v45 }
 0x21f   :  { %v4684_v60 = vcombine.low %v4676_v55, %v4683_v40  ;;  %v4688_v14 = vcombine.low %v2188_v28, %v2192_v32  ;;  %v4695_v25 = vrot.slane %v4685_v16, %v9964_v49  ;;  %v4702_v29 = vrot.slane %v4686_v8, %v9964_v49 }
 0x220   :  { %v4709_v35 = vrot.slane %v4687_v47, %v9964_v49  ;;  %v2208_v52 = vrot.slane %v10697_v4, %v9940_v62  ;;  %v2212_v30 = vrot.slane %v10697_v4, %v9948_v19  ;;  %v2216_v58 = vrot.slane %v10697_v4, %v9951_v7 }
 0x221   :  { %6531 = vperm.xlu0 %9114, %v4684_v60   ;;  %v4716_v11 = vrot.slane %v4688_v14, %v9964_v49  ;;  %v4717_v63 = vcombine.low %v4695_v25, %v4702_v29  ;;  %v2220_v41 = vrot.slane %v10697_v4, %v9955_v5  ;;  %v2224_v2 = vrot.slane %v10697_v4, %v9958_v42 }
 0x222   :  { %v4734_v38 = vcombine.low %v2196_v48, %v2200_v23  ;;  %v4735_v21 = vcombine.low %v2204_v61, %v2208_v52  ;;  %v4736_v10 = vcombine.low %v2212_v30, %v2216_v58  ;;  %vm7053_vm6 = vcmp.eq.s32.totalorder %v9927_v20, %v10855_v15 }
 0x223   :  { %v4718_v34 = vcombine.low %v4709_v35, %v4716_v11  ;;  %v4725_v57 = vrot.slane %v4717_v63, %v9964_v49  ;;  %v4737_v50 = vcombine.low %v2220_v41, %v2224_v2  ;;  %v8592_v44 = vsel %vm7053_vm6, 1.0, %v12854_v1  ;;  %9012 = vmatmul.mubr.msk.f32.gmra.mrb[28].mxu1 %vm7053_vm6, %v12852_v3  ;;  %v10919_v35 = vpop.xlane.xlu1 %1215 }
 0x224   :  { %v4744_v18 = vrot.slane %v4734_v38, %v9964_v49  ;;  %v4751_v4 = vrot.slane %v4735_v21, %v9964_v49  ;;  %v4758_v13 = vrot.slane %v4736_v10, %v9964_v49  ;;  %v8411_v27 = vadd.f32 %v8592_v44, %v8410_v36 }
 0x225   :  { %v4732_v0 = vrot.slane %v4718_v34, %v9964_v49  ;;  %v4765_v12 = vrot.slane %v4737_v50, %v9964_v49  ;;  %vm7054_vm7 = vcmp.eq.s32.totalorder %v9927_v20, %v10877_v22  ;;  %v2228_v33 = vrot.slane %v10695_v51, %v9930_v37 }
 0x226   :  { %v4766_v54 = vcombine.low %v4744_v18, %v4751_v4  ;;  %v8593_v56 = vsel %vm7054_vm7, 1.0, %v12854_v1  ;;  %9014 = vmatprep.mubr.msk.f32.mxu1 %vm7054_vm7, %v12852_v3  ;;  %v2232_v36 = vrot.slane %v10695_v51, %v9933_v9  ;;  %v2236_v24 = vrot.slane %v10695_v51, %v9937_v45 }
 0x227   :  { %v4733_v55 = vcombine.low %v4725_v57, %v4732_v0  ;;  %v4767_v53 = vcombine.low %v4758_v13, %v4765_v12  ;;  %v8412_v17 = vadd.f32 %v8593_v56, %v8411_v27  ;;  %v2240_v28 = vrot.slane %v10695_v51, %v9940_v62  ;;  %v10935_v57 = vpop.xlane.xlu0 %1213  ;;  %v10945_v56 = vpop.xlane.xlu1 %1219 }
 0x228   :  { %v4774_v40 = vrot.slane %v4766_v54, %v9964_v49  ;;  %v2244_v32 = vrot.slane %v10695_v51, %v9948_v19  ;;  %v2248_v16 = vrot.slane %v10695_v51, %v9951_v7  ;;  %v2252_v8 = vrot.slane %v10695_v51, %v9955_v5  ;;  %12907 = vst [vmem:[#allocation10_spill] sm:$0xff] %v10945_v56 }
 0x229   :  { %6534 = vperm.xlu1 %9113, %v4733_v55   ;;  %v4781_v47 = vrot.slane %v4767_v53, %v9964_v49  ;;  %v2256_v48 = vrot.slane %v10695_v51, %v9958_v42  ;;  %v4783_v23 = vcombine.low %v2228_v33, %v2232_v36  ;;  %v4784_v61 = vcombine.low %v2236_v24, %v2240_v28 }
 0x22a   :  { %v4785_v60 = vcombine.low %v2244_v32, %v2248_v16  ;;  %v2260_v14 = vrot.slane %v10749_v46, %v9930_v37  ;;  %v2264_v25 = vrot.slane %v10749_v46, %v9933_v9  ;;  %v2268_v29 = vrot.slane %v10749_v46, %v9937_v45 }
 0x22b   :  { %v4782_v52 = vcombine.low %v4774_v40, %v4781_v47  ;;  %v4786_v30 = vcombine.low %v2252_v8, %v2256_v48  ;;  %v4793_v58 = vrot.slane %v4783_v23, %v9964_v49  ;;  %v4800_v51 = vrot.slane %v4784_v61, %v9964_v49 }
 0x22c   :  { %v4807_v11 = vrot.slane %v4785_v60, %v9964_v49  ;;  %v2272_v63 = vrot.slane %v10749_v46, %v9940_v62  ;;  %v2276_v41 = vrot.slane %v10749_v46, %v9948_v19  ;;  %v2280_v2 = vrot.slane %v10749_v46, %v9951_v7 }
 0x22d   :  { %6537 = vperm.xlu0 %9114, %v4782_v52   ;;  %v4814_v38 = vrot.slane %v4786_v30, %v9964_v49  ;;  %v4815_v21 = vcombine.low %v4793_v58, %v4800_v51  ;;  %v2284_v10 = vrot.slane %v10749_v46, %v9955_v5  ;;  %v2288_v34 = vrot.slane %v10749_v46, %v9958_v42 }
 0x22e   :  { %v4832_v50 = vcombine.low %v2260_v14, %v2264_v25  ;;  %v4833_v44 = vcombine.low %v2268_v29, %v2272_v63  ;;  %v4834_v18 = vcombine.low %v2276_v41, %v2280_v2  ;;  %vm7055_vm8 = vcmp.eq.s32.totalorder %v9927_v20, %v10887_v43  ;;  %v10977_v63 = vpop.xlane.xlu1 %1223 }
 0x22f   :  { %v4816_v4 = vcombine.low %v4807_v11, %v4814_v38  ;;  %v4823_v13 = vrot.slane %v4815_v21, %v9964_v49  ;;  %v4835_v27 = vcombine.low %v2284_v10, %v2288_v34  ;;  %v8594_v0 = vsel %vm7055_vm8, 1.0, %v12854_v1  ;;  %9015 = vmatmul.mubr.msk.f32.gmra.mrb[30].mxu1 %vm7055_vm8, %v12852_v3  ;;  %12908 = vst [vmem:[#allocation11_spill] sm:$0xff] %v10977_v63 }
 0x230   :  { %v4842_v12 = vrot.slane %v4832_v50, %v9964_v49  ;;  %v4849_v46 = vrot.slane %v4833_v44, %v9964_v49  ;;  %v4856_v33 = vrot.slane %v4834_v18, %v9964_v49  ;;  %v8413_v54 = vadd.f32 %v8594_v0, %v8412_v17 }
 0x231   :  { %v4830_v36 = vrot.slane %v4816_v4, %v9964_v49  ;;  %v4863_v24 = vrot.slane %v4835_v27, %v9964_v49  ;;  %vm7056_vm9 = vcmp.eq.s32.totalorder %v9927_v20, %v10935_v57  ;;  %v2292_v55 = vrot.slane %v10765_v6, %v9930_v37  ;;  %v1218_v27 = vpop.xlane.xlu0 %1217 }
 0x232   :  { %v4864_v53 = vcombine.low %v4842_v12, %v4849_v46  ;;  %v8595_v28 = vsel %vm7056_vm9, 1.0, %v12854_v1  ;;  %9017 = vmatprep.mubr.msk.f32.mxu1 %vm7056_vm9, %v12852_v3  ;;  %v2296_v17 = vrot.slane %v10765_v6, %v9933_v9  ;;  %v2300_v40 = vrot.slane %v10765_v6, %v9937_v45 }
 0x233   :  { %v4831_v32 = vcombine.low %v4823_v13, %v4830_v36  ;;  %v4865_v16 = vcombine.low %v4856_v33, %v4863_v24  ;;  %v8414_v8 = vadd.f32 %v8595_v28, %v8413_v54  ;;  %v2304_v47 = vrot.slane %v10765_v6, %v9940_v62 }
 0x234   :  { %v4872_v48 = vrot.slane %v4864_v53, %v9964_v49  ;;  %v2308_v23 = vrot.slane %v10765_v6, %v9948_v19  ;;  %v2312_v61 = vrot.slane %v10765_v6, %v9951_v7  ;;  %v2316_v60 = vrot.slane %v10765_v6, %v9955_v5 }
 0x235   :  { %6540 = vperm.xlu1 %9113, %v4831_v32   ;;  %v4879_v14 = vrot.slane %v4865_v16, %v9964_v49  ;;  %v2320_v25 = vrot.slane %v10765_v6, %v9958_v42  ;;  %v4881_v29 = vcombine.low %v2292_v55, %v2296_v17  ;;  %v4882_v52 = vcombine.low %v2300_v40, %v2304_v47  ;;  %v11001_v17 = vpop.xlane.xlu1 %1227 }
 0x236   :  { %v4883_v30 = vcombine.low %v2308_v23, %v2312_v61  ;;  %v2324_v58 = vrot.slane %v10805_v31, %v9930_v37  ;;  %v2328_v51 = vrot.slane %v10805_v31, %v9933_v9  ;;  %v2332_v11 = vrot.slane %v10805_v31, %v9937_v45  ;;  %12909 = vst [vmem:[#allocation12_spill] sm:$0xff] %v11001_v17 }
 0x237   :  { %v4880_v41 = vcombine.low %v4872_v48, %v4879_v14  ;;  %v4884_v2 = vcombine.low %v2316_v60, %v2320_v25  ;;  %v4891_v38 = vrot.slane %v4881_v29, %v9964_v49  ;;  %v4898_v6 = vrot.slane %v4882_v52, %v9964_v49 }
 0x238   :  { %v4905_v21 = vrot.slane %v4883_v30, %v9964_v49  ;;  %v2336_v10 = vrot.slane %v10805_v31, %v9940_v62  ;;  %v2340_v34 = vrot.slane %v10805_v31, %v9948_v19  ;;  %v2344_v50 = vrot.slane %v10805_v31, %v9951_v7 }
 0x239   :  { %6543 = vperm.xlu0 %9114, %v4880_v41   ;;  %v4912_v44 = vrot.slane %v4884_v2, %v9964_v49  ;;  %v4913_v18 = vcombine.low %v4891_v38, %v4898_v6  ;;  %v2348_v4 = vrot.slane %v10805_v31, %v9955_v5  ;;  %v2352_v13 = vrot.slane %v10805_v31, %v9958_v42 }
 0x23a   :  { %v4930_v0 = vcombine.low %v2324_v58, %v2328_v51  ;;  %v4931_v12 = vcombine.low %v2332_v11, %v2336_v10  ;;  %v4932_v46 = vcombine.low %v2340_v34, %v2344_v50  ;;  %vm7057_vm10 = vcmp.eq.s32.totalorder %v9927_v20, %v10919_v35  ;;  %v11024_v34 = vpop.xlane.xlu1 %1231 }
 0x23b   :  { %v4914_v33 = vcombine.low %v4905_v21, %v4912_v44  ;;  %v4921_v54 = vrot.slane %v4913_v18, %v9964_v49  ;;  %v4933_v36 = vcombine.low %v2348_v4, %v2352_v13  ;;  %v8596_v24 = vsel %vm7057_vm10, 1.0, %v12854_v1  ;;  %9018 = vmatmul.mubr.msk.f32.gmra.mrb[32].mxu1 %vm7057_vm10, %v12852_v3  ;;  %12910 = vst [vmem:[#allocation13_spill] sm:$0xff] %v11024_v34 }
 0x23c   :  { %v4940_v55 = vrot.slane %v4930_v0, %v9964_v49  ;;  %v4947_v53 = vrot.slane %v4931_v12, %v9964_v49  ;;  %v4954_v31 = vrot.slane %v4932_v46, %v9964_v49  ;;  %v8415_v28 = vadd.f32 %v8596_v24, %v8414_v8  ;;  %v11040_v24 = vpop.xlane.xlu0 %1221 }
 0x23d   :  { %v4928_v40 = vrot.slane %v4914_v33, %v9964_v49  ;;  %v4961_v32 = vrot.slane %v4933_v36, %v9964_v49  ;;  %vm7058_vm11 = vcmp.eq.s32.totalorder %v9927_v20, %v1218_v27  ;;  %v2548_v16 = vrot.slane %v1218_v27, %v9930_v37  ;;  %12911 = vst [vmem:[#allocation14_spill] sm:$0xff] %v11040_v24 }
 0x23e   :  { %v4962_v47 = vcombine.low %v4940_v55, %v4947_v53  ;;  %v8597_v48 = vsel %vm7058_vm11, 1.0, %v12854_v1  ;;  %9020 = vmatprep.mubr.msk.f32.mxu1 %vm7058_vm11, %v12852_v3  ;;  %v2552_v23 = vrot.slane %v1218_v27, %v9933_v9  ;;  %v2556_v61 = vrot.slane %v1218_v27, %v9937_v45 }
 0x23f   :  { %v4929_v8 = vcombine.low %v4921_v54, %v4928_v40  ;;  %v4963_v60 = vcombine.low %v4954_v31, %v4961_v32  ;;  %v8416_v14 = vadd.f32 %v8597_v48, %v8415_v28  ;;  %v2560_v25 = vrot.slane %v1218_v27, %v9940_v62 }
 0x240   :  { %v4970_v29 = vrot.slane %v4962_v47, %v9964_v49  ;;  %v2564_v52 = vrot.slane %v1218_v27, %v9948_v19  ;;  %v2568_v30 = vrot.slane %v1218_v27, %v9951_v7  ;;  %v2572_v58 = vrot.slane %v1218_v27, %v9955_v5 }
 0x241   :  { %6546 = vperm.xlu1 %9113, %v4929_v8   ;;  %v4977_v51 = vrot.slane %v4963_v60, %v9964_v49  ;;  %v2576_v11 = vrot.slane %v1218_v27, %v9958_v42  ;;  %v5273_v41 = vcombine.low %v2548_v16, %v2552_v23  ;;  %v5274_v2 = vcombine.low %v2556_v61, %v2560_v25  ;;  %v11050_v61 = vpop.xlane.xlu1 %1235 }
 0x242   :  { %v5275_v38 = vcombine.low %v2564_v52, %v2568_v30  ;;  %v2388_v6 = vrot.slane %v10855_v15, %v9930_v37  ;;  %v2392_v21 = vrot.slane %v10855_v15, %v9933_v9  ;;  %v2396_v10 = vrot.slane %v10855_v15, %v9937_v45 }
 0x243   :  { %v4978_v50 = vcombine.low %v4970_v29, %v4977_v51  ;;  %v5276_v44 = vcombine.low %v2572_v58, %v2576_v11  ;;  %v5283_v18 = vrot.slane %v5273_v41, %v9964_v49  ;;  %v5290_v4 = vrot.slane %v5274_v2, %v9964_v49  ;;  %v11064_v58 = vpop.xlane.xlu0 %1225 }
 0x244   :  { %v5297_v13 = vrot.slane %v5275_v38, %v9964_v49  ;;  %v2400_v27 = vrot.slane %v10855_v15, %v9940_v62  ;;  %v2404_v0 = vrot.slane %v10855_v15, %v9948_v19  ;;  %v2408_v12 = vrot.slane %v10855_v15, %v9951_v7  ;;  %12912 = vst [vmem:[#allocation15_spill] sm:$0xff] %v11064_v58 }
 0x245   :  { %6549 = vperm.xlu0 %9114, %v4978_v50   ;;  %v5304_v46 = vrot.slane %v5276_v44, %v9964_v49  ;;  %v5305_v33 = vcombine.low %v5283_v18, %v5290_v4  ;;  %v2412_v54 = vrot.slane %v10855_v15, %v9955_v5  ;;  %v2416_v36 = vrot.slane %v10855_v15, %v9958_v42 }
 0x246   :  { %v5028_v55 = vcombine.low %v2388_v6, %v2392_v21  ;;  %v5029_v53 = vcombine.low %v2396_v10, %v2400_v27  ;;  %v5030_v31 = vcombine.low %v2404_v0, %v2408_v12  ;;  %vm7059_vm12 = vcmp.eq.s32.totalorder %v9927_v20, %v10945_v56  ;;  %v11084_v0 = vpop.xlane.xlu1 %1239 }
 0x247   :  { %v5306_v28 = vcombine.low %v5297_v13, %v5304_v46  ;;  %v5313_v40 = vrot.slane %v5305_v33, %v9964_v49  ;;  %v5031_v32 = vcombine.low %v2412_v54, %v2416_v36  ;;  %v8598_v16 = vsel %vm7059_vm12, 1.0, %v12854_v1  ;;  %9021 = vmatmul.mubr.msk.f32.gmra.mrb[34].mxu1 %vm7059_vm12, %v12852_v3 }
 0x248   :  { %v5038_v47 = vrot.slane %v5028_v55, %v9964_v49  ;;  %v5045_v15 = vrot.slane %v5029_v53, %v9964_v49  ;;  %v5052_v48 = vrot.slane %v5030_v31, %v9964_v49  ;;  %v8417_v23 = vadd.f32 %v8598_v16, %v8416_v14  ;;  %v11098_v16 = vpop.xlane.xlu0 %1229 }
 0x249   :  { %v5320_v8 = vrot.slane %v5306_v28, %v9964_v49  ;;  %v5059_v60 = vrot.slane %v5031_v32, %v9964_v49  ;;  %vm7060_vm13 = vcmp.eq.s32.totalorder %v9927_v20, %v11040_v24  ;;  %v2356_v25 = vrot.slane %v10821_v59, %v9930_v37  ;;  %12913 = vst [vmem:[#allocation16_spill] sm:$0xff] %v11098_v16 }
 0x24a   :  { %v5060_v29 = vcombine.low %v5038_v47, %v5045_v15  ;;  %v8599_v52 = vsel %vm7060_vm13, 1.0, %v12854_v1  ;;  %9023 = vmatprep.mubr.msk.f32.mxu1 %vm7060_vm13, %v12852_v3  ;;  %v2360_v14 = vrot.slane %v10821_v59, %v9933_v9  ;;  %v2364_v30 = vrot.slane %v10821_v59, %v9937_v45 }
 0x24b   :  { %v5321_v51 = vcombine.low %v5313_v40, %v5320_v8  ;;  %v5061_v11 = vcombine.low %v5052_v48, %v5059_v60  ;;  %v8418_v41 = vadd.f32 %v8599_v52, %v8417_v23  ;;  %v2368_v2 = vrot.slane %v10821_v59, %v9940_v62 }
 0x24c   :  { %v5068_v38 = vrot.slane %v5060_v29, %v9964_v49  ;;  %v2372_v6 = vrot.slane %v10821_v59, %v9948_v19  ;;  %v2376_v21 = vrot.slane %v10821_v59, %v9951_v7  ;;  %v2380_v10 = vrot.slane %v10821_v59, %v9955_v5 }
 0x24d   :  { %6570 = vperm.xlu1 %9113, %v5321_v51   ;;  %v5075_v50 = vrot.slane %v5061_v11, %v9964_v49  ;;  %v2384_v44 = vrot.slane %v10821_v59, %v9958_v42  ;;  %v4979_v18 = vcombine.low %v2356_v25, %v2360_v14  ;;  %v4980_v4 = vcombine.low %v2364_v30, %v2368_v2  ;;  %v11113_v51 = vpop.xlane.xlu1 %1243 }
 0x24e   :  { %v4981_v13 = vcombine.low %v2372_v6, %v2376_v21  ;;  %vm7061_vm14 = vcmp.eq.s32.totalorder %v9927_v20, %v10977_v63  ;;  %vm7062_vm15 = vcmp.eq.s32.totalorder %v9927_v20, %v11064_v58  ;;  %v2452_v27 = vrot.slane %v10887_v43, %v9930_v37 }
 0x24f   :  { %v5076_v12 = vcombine.low %v5068_v38, %v5075_v50  ;;  %v4982_v46 = vcombine.low %v2380_v10, %v2384_v44  ;;  %v4989_v33 = vrot.slane %v4979_v18, %v9964_v49  ;;  %v4996_v59 = vrot.slane %v4980_v4, %v9964_v49  ;;  %9024 = vmatmul.mubr.msk.f32.gmra.mrb[36].mxu1 %vm7061_vm14, %v12852_v3 }
 0x250   :  { %v5003_v54 = vrot.slane %v4981_v13, %v9964_v49  ;;  %v8600_v36 = vsel %vm7061_vm14, 1.0, %v12854_v1  ;;  %v8601_v55 = vsel %vm7062_vm15, 1.0, %v12854_v1  ;;  %9026 = vmatprep.mubr.msk.f32.mxu1 %vm7062_vm15, %v12852_v3  ;;  %v2456_v53 = vrot.slane %v10887_v43, %v9933_v9 }
 0x251   :  { %6555 = vperm.xlu0 %9114, %v5076_v12   ;;  %v5010_v31 = vrot.slane %v4982_v46, %v9964_v49  ;;  %v5011_v28 = vcombine.low %v4989_v33, %v4996_v59  ;;  %v8419_v40 = vadd.f32 %v8600_v36, %v8418_v41  ;;  %v2460_v32 = vrot.slane %v10887_v43, %v9937_v45  ;;  %v11130_v12 = vpop.xlane.xlu0 %1233 }
 0x252   :  { %v2464_v47 = vrot.slane %v10887_v43, %v9940_v62  ;;  %v2468_v15 = vrot.slane %v10887_v43, %v9948_v19  ;;  %v2472_v48 = vrot.slane %v10887_v43, %v9951_v7  ;;  %v2476_v23 = vrot.slane %v10887_v43, %v9955_v5 }
 0x253   :  { %v5012_v8 = vcombine.low %v5003_v54, %v5010_v31  ;;  %v5019_v60 = vrot.slane %v5011_v28, %v9964_v49  ;;  %v8420_v25 = vadd.f32 %v8601_v55, %v8419_v40  ;;  %v2480_v29 = vrot.slane %v10887_v43, %v9958_v42  ;;  %v11143_v31 = vpop.xlane.xlu1 %1247 }
 0x254   :  { %v5126_v52 = vcombine.low %v2452_v27, %v2456_v53  ;;  %v5127_v14 = vcombine.low %v2460_v32, %v2464_v47  ;;  %v5128_v30 = vcombine.low %v2468_v15, %v2472_v48  ;;  %vm7063_vm1 = vcmp.eq.s32.totalorder %v9927_v20, %v11001_v17 }
 0x255   :  { %v5026_v11 = vrot.slane %v5012_v8, %v9964_v49  ;;  %v5129_v41 = vcombine.low %v2476_v23, %v2480_v29  ;;  %v8602_v2 = vsel %vm7063_vm1, 1.0, %v12854_v1  ;;  %9027 = vmatmul.mubr.msk.f32.gmra.mrb[38].mxu1 %vm7063_vm1, %v12852_v3  ;;  %vm7064_vm2 = vcmp.eq.s32.totalorder %v9927_v20, %v11098_v16 }
 0x256   :  { %v5136_v43 = vrot.slane %v5126_v52, %v9964_v49  ;;  %v5143_v38 = vrot.slane %v5127_v14, %v9964_v49  ;;  %v5150_v6 = vrot.slane %v5128_v30, %v9964_v49  ;;  %v8421_v21 = vadd.f32 %v8602_v2, %v8420_v25  ;;  %9029 = vmatprep.mubr.msk.f32.mxu1 %vm7064_vm2, %v12852_v3  ;;  %v11163_v30 = vpop.xlane.xlu0 %1237 }
 0x257   :  { %v5027_v10 = vcombine.low %v5019_v60, %v5026_v11  ;;  %v5157_v50 = vrot.slane %v5129_v41, %v9964_v49  ;;  %v8603_v44 = vsel %vm7064_vm2, 1.0, %v12854_v1  ;;  %v2420_v13 = vrot.slane %v10877_v22, %v9930_v37 }
 0x258   :  { %v5158_v18 = vcombine.low %v5136_v43, %v5143_v38  ;;  %v8422_v4 = vadd.f32 %v8603_v44, %v8421_v21  ;;  %v2424_v27 = vrot.slane %v10877_v22, %v9933_v9  ;;  %v2428_v33 = vrot.slane %v10877_v22, %v9937_v45 }
 0x259   :  { %6552 = vperm.xlu0 %9114, %v5027_v10   ;;  %v5159_v46 = vcombine.low %v5150_v6, %v5157_v50  ;;  %v2432_v59 = vrot.slane %v10877_v22, %v9940_v62  ;;  %v2436_v36 = vrot.slane %v10877_v22, %v9948_v19  ;;  %v2440_v55 = vrot.slane %v10877_v22, %v9951_v7  ;;  %v11176_v50 = vpop.xlane.xlu1 %1251 }
 0x25a   :  { %v5166_v54 = vrot.slane %v5158_v18, %v9964_v49  ;;  %v2444_v53 = vrot.slane %v10877_v22, %v9955_v5  ;;  %v2448_v40 = vrot.slane %v10877_v22, %v9958_v42  ;;  %v5077_v32 = vcombine.low %v2420_v13, %v2424_v27 }
 0x25b   :  { %v5173_v28 = vrot.slane %v5159_v46, %v9964_v49  ;;  %v5078_v47 = vcombine.low %v2428_v33, %v2432_v59  ;;  %v5079_v15 = vcombine.low %v2436_v36, %v2440_v55  ;;  %vm7065_vm3 = vcmp.eq.s32.totalorder %v9927_v20, %v11024_v34  ;;  %v11188_v55 = vpop.f32.mrb[64].mxu0 }
 0x25c   :  { %vm7066_vm4 = vcmp.eq.s32.totalorder %v9927_v20, %v11130_v12  ;;  %v2516_v48 = vrot.slane %v10919_v35, %v9930_v37  ;;  %v5080_v8 = vcombine.low %v2444_v53, %v2448_v40  ;;  %v5087_v60 = vrot.slane %v5077_v32, %v9964_v49  ;;  %9030 = vmatmul.mubr.msk.f32.gmra.mrb[40].mxu1 %vm7065_vm3, %v12852_v3  ;;  %v11199_v32 = vpop.f32.mrb[65].mxu0 }
 0x25d   :  { %v5174_v23 = vcombine.low %v5166_v54, %v5173_v28  ;;  %v5094_v25 = vrot.slane %v5078_v47, %v9964_v49  ;;  %v5101_v22 = vrot.slane %v5079_v15, %v9964_v49  ;;  %v8604_v29 = vsel %vm7065_vm3, 1.0, %v12854_v1  ;;  %9032 = vmatprep.mubr.msk.f32.mxu1 %vm7066_vm4, %v12852_v3  ;;  %7596 = vst.msk [vmem:[%s12848_s5 + $0x8] sm:$0xff] %vm105_vm0, %v11188_v55  ;;  %v11201_v47 = vpop.xlane.xlu0 %1241 }
 0x25e   :  { %v8605_v52 = vsel %vm7066_vm4, 1.0, %v12854_v1  ;;  %v2520_v14 = vrot.slane %v10919_v35, %v9933_v9  ;;  %v5108_v11 = vrot.slane %v5080_v8, %v9964_v49  ;;  %v8423_v2 = vadd.f32 %v8604_v29, %v8422_v4  ;;  %7595 = vst.msk [vmem:[%s12848_s5] sm:$0xff] %vm105_vm0, %v11199_v32 }
 0x25f   :  { %6561 = vperm.xlu0 %9114, %v5174_v23   ;;  %v5109_v41 = vcombine.low %v5087_v60, %v5094_v25  ;;  %v2524_v43 = vrot.slane %v10919_v35, %v9937_v45  ;;  %v2528_v38 = vrot.slane %v10919_v35, %v9940_v62  ;;  %v2532_v6 = vrot.slane %v10919_v35, %v9948_v19  ;;  %v11212_v60 = vpop.f32.mrb[66].mxu0 }
 0x260   :  { %v2536_v21 = vrot.slane %v10919_v35, %v9951_v7  ;;  %v2540_v10 = vrot.slane %v10919_v35, %v9955_v5  ;;  %v5110_v44 = vcombine.low %v5101_v22, %v5108_v11  ;;  %v8424_v4 = vadd.f32 %v8605_v52, %v8423_v2  ;;  %7598 = vst.msk [vmem:[%s12848_s5 + $0x18] sm:$0xff] %vm105_vm0, %v11212_v60  ;;  %v11225_v11 = vpop.f32.mrb[67].mxu0 }
 0x261   :  { %v5117_v18 = vrot.slane %v5109_v41, %v9964_v49  ;;  %v2544_v13 = vrot.slane %v10919_v35, %v9958_v42  ;;  %v5224_v27 = vcombine.low %v2516_v48, %v2520_v14  ;;  %v5225_v46 = vcombine.low %v2524_v43, %v2528_v38  ;;  %v11218_v14 = vpop.xlane.xlu1 %1255  ;;  %7597 = vst.msk [vmem:[%s12848_s5 + $0x10] sm:$0xff] %vm105_vm0, %v11225_v11 }
 0x262   :  { %v5226_v33 = vcombine.low %v2532_v6, %v2536_v21  ;;  %vm7067_vm5 = vcmp.eq.s32.totalorder %v9927_v20, %v11050_v61  ;;  %v5124_v59 = vrot.slane %v5110_v44, %v9964_v49  ;;  %vm7068_vm6 = vcmp.eq.s32.totalorder %v9927_v20, %v11163_v30  ;;  %v11238_v6 = vpop.f32.mrb[68].mxu0 }
 0x263   :  { %v5227_v54 = vcombine.low %v2540_v10, %v2544_v13  ;;  %v8606_v36 = vsel %vm7067_vm5, 1.0, %v12854_v1  ;;  %9033 = vmatmul.mubr.msk.f32.gmra.mrb[42].mxu1 %vm7067_vm5, %v12852_v3  ;;  %v5234_v35 = vrot.slane %v5224_v27, %v9964_v49  ;;  %v5241_v53 = vrot.slane %v5225_v46, %v9964_v49  ;;  %12914 = vst [vmem:[#allocation17_spill] sm:$0xff] %v11238_v6 }
 0x264   :  { %v5248_v28 = vrot.slane %v5226_v33, %v9964_v49  ;;  %v8425_v40 = vadd.f32 %v8606_v36, %v8424_v4  ;;  %9035 = vmatprep.mubr.msk.f32.mxu1 %vm7068_vm6, %v12852_v3  ;;  %v5125_v15 = vcombine.low %v5117_v18, %v5124_v59  ;;  %v8607_v23 = vsel %vm7068_vm6, 1.0, %v12854_v1  ;;  %7600 = vst.msk [vmem:[%s12848_s5 + $0x28] sm:$0xff] %vm105_vm0, %v11238_v6  ;;  %v11250_v4 = vpop.f32.mrb[69].mxu0 }
 0x265   :  { %v5255_v48 = vrot.slane %v5227_v54, %v9964_v49  ;;  %v2484_v8 = vrot.slane %v10935_v57, %v9930_v37  ;;  %v5256_v25 = vcombine.low %v5234_v35, %v5241_v53  ;;  %v2488_v29 = vrot.slane %v10935_v57, %v9933_v9  ;;  %12915 = vst [vmem:[#allocation18_spill] sm:$0xff] %v11250_v4  ;;  %v11274_v35 = vpop.xlane.xlu0 %1245 }
 0x266   :  { %v8426_v22 = vadd.f32 %v8607_v23, %v8425_v40  ;;  %v2492_v52 = vrot.slane %v10935_v57, %v9937_v45  ;;  %6558 = vperm.xlu0 %9114, %v5125_v15   ;;  %v2496_v2 = vrot.slane %v10935_v57, %v9940_v62  ;;  %v2500_v43 = vrot.slane %v10935_v57, %v9948_v19 }
 0x267   :  { %v5257_v41 = vcombine.low %v5248_v28, %v5255_v48  ;;  %v2504_v38 = vrot.slane %v10935_v57, %v9951_v7  ;;  %v5264_v21 = vrot.slane %v5256_v25, %v9964_v49  ;;  %v2508_v10 = vrot.slane %v10935_v57, %v9955_v5  ;;  %7599 = vst.msk [vmem:[%s12848_s5 + $0x20] sm:$0xff] %vm105_vm0, %v11250_v4 }
 0x268   :  { %v2512_v44 = vrot.slane %v10935_v57, %v9958_v42  ;;  %v5175_v18 = vcombine.low %v2484_v8, %v2488_v29  ;;  %v5176_v27 = vcombine.low %v2492_v52, %v2496_v2  ;;  %vm7069_vm7 = vcmp.eq.s32.totalorder %v9927_v20, %v11084_v0  ;;  %v11260_v57 = vpop.f32.mrb[0].mxu1  ;;  %v11290_v8 = vpop.xlane.xlu1 %1259 }
 0x269   :  { %v5271_v13 = vrot.slane %v5257_v41, %v9964_v49  ;;  %v5177_v46 = vcombine.low %v2500_v43, %v2504_v38  ;;  %12916 = vst [vmem:[#allocation19_spill] sm:$0xff] %v11260_v57  ;;  %v8608_v54 = vsel %vm7069_vm7, 1.0, %v12854_v1  ;;  %9036 = vmatmul.mubr.msk.f32.gmra.mrb[44].mxu1 %vm7069_vm7, %v12852_v3  ;;  %vm7070_vm8 = vcmp.eq.s32.totalorder %v9927_v20, %v11201_v47  ;;  %v11272_v36 = vpop.f32.mrb[1].mxu1 }
 0x26a   :  { %v5178_v33 = vcombine.low %v2508_v10, %v2512_v44  ;;  %v5185_v59 = vrot.slane %v5175_v18, %v9964_v49  ;;  %7602 = vst.msk [vmem:[%s12848_s5 + $0x38] sm:$0xff] %vm105_vm0, %v11260_v57  ;;  %12917 = vst [vmem:[#allocation20_spill] sm:$0xff] %v11272_v36  ;;  %v5192_v28 = vrot.slane %v5176_v27, %v9964_v49  ;;  %9038 = vmatprep.mubr.msk.f32.mxu1 %vm7070_vm8, %v12852_v3  ;;  %v11292_v25 = vpop.f32.mrb[2].mxu1  ;;  %v12927_v63 = vmov 1.0  }
 0x26b   :  { %v5272_v53 = vcombine.low %v5264_v21, %v5271_v13  ;;  %v5199_v40 = vrot.slane %v5177_v46, %v9964_v49  ;;  %v8427_v15 = vadd.f32 %v8608_v54, %v8426_v22  ;;  %7601 = vst.msk [vmem:[%s12848_s5 + $0x30] sm:$0xff] %vm105_vm0, %v11272_v36  ;;  %v8609_v23 = vsel %vm7070_vm8, 1.0, %v12854_v1  ;;  %12918 = vst [vmem:[#allocation21_spill] sm:$0xff] %v11292_v25  ;;  %v11304_v2 = vpop.f32.mrb[3].mxu1 }
 0x26c   :  { %v5206_v48 = vrot.slane %v5178_v33, %v9964_v49  ;;  %vm7071_vm9 = vcmp.eq.s32.totalorder %v9927_v20, %v11113_v51  ;;  %vm7072_vm10 = vcmp.eq.s32.totalorder %v9927_v20, %v11274_v35  ;;  %v5207_v22 = vcombine.low %v5185_v59, %v5192_v28  ;;  %7604 = vst.msk [vmem:[%s12848_s5 + $0x48] sm:$0xff] %vm105_vm0, %v11292_v25  ;;  %v11336_v28 = vpop.xlane.xlu0 %1249 }
 0x26d   :  { %6567 = vperm.xlu0 %9114, %v5272_v53   ;;  %v8428_v29 = vadd.f32 %v8609_v23, %v8427_v15  ;;  %v8610_v52 = vsel %vm7071_vm9, 1.0, %v12854_v1  ;;  %v8611_v41 = vsel %vm7072_vm10, 1.0, %v12854_v1  ;;  %12919 = vst [vmem:[#allocation22_spill] sm:$0xff] %v11304_v2  ;;  %9039 = vmatmul.mubr.msk.f32.gmra.mrb[46].mxu1 %vm7071_vm9, %v12852_v3  ;;  %v2836_v38 = vrot.slane %v11050_v61, %v9930_v37  ;;  %v11334_v53 = vpop.f32.mrb[4].mxu1 }
 0x26e   :  { %v5208_v43 = vcombine.low %v5199_v40, %v5206_v48  ;;  %v2840_v21 = vrot.slane %v11050_v61, %v9933_v9  ;;  %v2844_v10 = vrot.slane %v11050_v61, %v9937_v45  ;;  %7603 = vst.msk [vmem:[%s12848_s5 + $0x40] sm:$0xff] %vm105_vm0, %v11304_v2  ;;  %v5215_v44 = vrot.slane %v5207_v22, %v9964_v49 }
 0x26f   :  { %v8429_v18 = vadd.f32 %v8610_v52, %v8428_v29  ;;  %9041 = vmatprep.mubr.msk.f32.mxu1 %vm7072_vm10, %v12852_v3  ;;  %v2848_v13 = vrot.slane %v11050_v61, %v9940_v62  ;;  %v2852_v27 = vrot.slane %v11050_v61, %v9948_v19  ;;  %v2856_v33 = vrot.slane %v11050_v61, %v9951_v7  ;;  %v11347_v52 = vpop.xlane.xlu1 %1263 }
 0x270   :  { %v5222_v46 = vrot.slane %v5208_v43, %v9964_v49  ;;  %v2860_v59 = vrot.slane %v11050_v61, %v9955_v5  ;;  %v2864_v54 = vrot.slane %v11050_v61, %v9958_v42  ;;  %12920 = vst [vmem:[#allocation23_spill] sm:$0xff] %v11334_v53  ;;  %v5714_v15 = vcombine.low %v2836_v38, %v2840_v21 }
 0x271   :  { %v8430_v40 = vadd.f32 %v8611_v41, %v8429_v18  ;;  %v5715_v48 = vcombine.low %v2844_v10, %v2848_v13  ;;  %vm7073_vm11 = vcmp.eq.s32.totalorder %v9927_v20, %v11143_v31  ;;  %7606 = vst.msk [vmem:[%s12848_s5 + $0x58] sm:$0xff] %vm105_vm0, %v11334_v53  ;;  %v5716_v22 = vcombine.low %v2852_v27, %v2856_v33  ;;  %v11349_v41 = vpop.f32.mrb[5].mxu1 }
 0x272   :  { %v5223_v23 = vcombine.low %v5215_v44, %v5222_v46  ;;  %v5717_v29 = vcombine.low %v2860_v59, %v2864_v54  ;;  %v8612_v61 = vsel %vm7073_vm11, 1.0, %v12854_v1  ;;  %9042 = vmatmul.mubr.msk.f32.gmra.mrb[48].mxu1 %vm7073_vm11, %v12852_v3  ;;  %12921 = vst [vmem:[#allocation24_spill] sm:$0xff] %v11349_v41  ;;  %v5724_v43 = vrot.slane %v5714_v15, %v9964_v49 }
 0x273   :  { %v5731_v38 = vrot.slane %v5715_v48, %v9964_v49  ;;  %v8431_v21 = vadd.f32 %v8612_v61, %v8430_v40  ;;  %vm7074_vm12 = vcmp.eq.s32.totalorder %v9927_v20, %v11336_v28  ;;  %7605 = vst.msk [vmem:[%s12848_s5 + $0x50] sm:$0xff] %vm105_vm0, %v11349_v41  ;;  %v5738_v10 = vrot.slane %v5716_v22, %v9964_v49 }
 0x274   :  { %6564 = vperm.xlu0 %9114, %v5223_v23   ;;  %v5745_v44 = vrot.slane %v5717_v29, %v9964_v49  ;;  %v8613_v18 = vsel %vm7074_vm12, 1.0, %v12854_v1  ;;  %9044 = vmatprep.mubr.msk.f32.mxu1 %vm7074_vm12, %v12852_v3  ;;  %v2804_v13 = vrot.slane %v11130_v12, %v9930_v37  ;;  %v2808_v33 = vrot.slane %v11130_v12, %v9933_v9 }
 0x275   :  { %v5746_v27 = vcombine.low %v5724_v43, %v5731_v38  ;;  %v8432_v46 = vadd.f32 %v8613_v18, %v8431_v21  ;;  %v2812_v59 = vrot.slane %v11130_v12, %v9937_v45  ;;  %v11370_v54 = vpop.f32.mrb[6].mxu1  ;;  %v2816_v15 = vrot.slane %v11130_v12, %v9940_v62  ;;  %v11395_v21 = vpop.xlane.xlu0 %1253 }
 0x276   :  { %12922 = vst [vmem:[#allocation25_spill] sm:$0xff] %v11370_v54  ;;  %v5747_v40 = vcombine.low %v5738_v10, %v5745_v44  ;;  %v2820_v48 = vrot.slane %v11130_v12, %v9948_v19  ;;  %v2824_v23 = vrot.slane %v11130_v12, %v9951_v7  ;;  %7608 = vst.msk [vmem:[%s12848_s5 + $0x68] sm:$0xff] %vm105_vm0, %v11370_v54  ;;  %v11383_v22 = vpop.f32.mrb[7].mxu1  ;;  %vm6652_vm5 = vcmask 130112  }
 0x277   :  { %12923 = vst [vmem:[#allocation26_spill] sm:$0xff] %v11383_v22  ;;  %v5754_v29 = vrot.slane %v5746_v27, %v9964_v49  ;;  %v2828_v61 = vrot.slane %v11130_v12, %v9955_v5  ;;  %v2832_v43 = vrot.slane %v11130_v12, %v9958_v42  ;;  %v5665_v38 = vcombine.low %v2804_v13, %v2808_v33  ;;  %v11400_v27 = vpop.permute.xlu1 %6453 }
 0x278   :  { %7607 = vst.msk [vmem:[%s12848_s5 + $0x60] sm:$0xff] %vm105_vm0, %v11383_v22  ;;  %v5761_v10 = vrot.slane %v5747_v40, %v9964_v49  ;;  %v5666_v44 = vcombine.low %v2812_v59, %v2816_v15  ;;  %v5667_v18 = vcombine.low %v2820_v48, %v2824_v23  ;;  %vm7075_vm13 = vcmp.eq.s32.totalorder %v9927_v20, %v11176_v50 }
 0x279   :  { %v5668_v39 = vcombine.low %v2828_v61, %v2832_v43  ;;  %v5675_v12 = vrot.slane %v5665_v38, %v9964_v49  ;;  %v8614_v13 = vsel %vm7075_vm13, 1.0, %v12854_v1  ;;  %9045 = vmatmul.mubr.msk.f32.gmra.mrb[50].mxu1 %vm7075_vm13, %v12852_v3  ;;  %vm7076_vm14 = vcmp.eq.s32.totalorder %v9927_v20, %v11395_v21 }
 0x27a   :  { %v5762_v33 = vcombine.low %v5754_v29, %v5761_v10  ;;  %v5682_v40 = vrot.slane %v5666_v44, %v9964_v49  ;;  %v5689_v59 = vrot.slane %v5667_v18, %v9964_v49  ;;  %v8433_v15 = vadd.f32 %v8614_v13, %v8432_v46  ;;  %9047 = vmatprep.mubr.msk.f32.mxu1 %vm7076_vm14, %v12852_v3 }
 0x27b   :  { %v5696_v48 = vrot.slane %v5668_v39, %v9964_v49  ;;  %v8615_v23 = vsel %vm7076_vm14, 1.0, %v12854_v1  ;;  %v2964_v61 = vrot.slane %v11113_v51, %v9930_v37  ;;  %v2968_v43 = vrot.slane %v11113_v51, %v9933_v9 }
 0x27c   :  { %6597 = vperm.xlu0 %9114, %v5762_v33   ;;  %v5697_v38 = vcombine.low %v5675_v12, %v5682_v40  ;;  %v8434_v29 = vadd.f32 %v8615_v23, %v8433_v15  ;;  %v2972_v10 = vrot.slane %v11113_v51, %v9937_v45  ;;  %v2976_v46 = vrot.slane %v11113_v51, %v9940_v62  ;;  %v11431_v23 = vpop.permute.xlu1 %6459 }
 0x27d   :  { %v5698_v44 = vcombine.low %v5689_v59, %v5696_v48  ;;  %v2980_v39 = vrot.slane %v11113_v51, %v9948_v19  ;;  %v2984_v18 = vrot.slane %v11113_v51, %v9951_v7  ;;  %v2988_v13 = vrot.slane %v11113_v51, %v9955_v5  ;;  %v11426_v3 = vpop.f32.mrb[8].mxu1 }
 0x27e   :  { %12924 = vst [vmem:[#allocation27_spill] sm:$0xff] %v11426_v3  ;;  %v5705_v12 = vrot.slane %v5697_v38, %v9964_v49  ;;  %v2992_v33 = vrot.slane %v11113_v51, %v9958_v42  ;;  %v5910_v40 = vcombine.low %v2964_v61, %v2968_v43  ;;  %v5911_v15 = vcombine.low %v2972_v10, %v2976_v46  ;;  %v11438_v59 = vpop.f32.mrb[9].mxu1 }
 0x27f   :  { %7610 = vst.msk [vmem:[%s12848_s5 + $0x78] sm:$0xff] %vm105_vm0, %v11426_v3  ;;  %12925 = vst [vmem:[#allocation28_spill] sm:$0xff] %v11438_v59  ;;  %v5712_v48 = vrot.slane %v5698_v44, %v9964_v49  ;;  %v5912_v1 = vcombine.low %v2980_v39, %v2984_v18  ;;  %v2900_v38 = vrot.slane %v11084_v0, %v9930_v37  ;;  %vm6659_vm6 = vcmask 195712  }
 0x280   :  { %v2904_v51 = vrot.slane %v11084_v0, %v9933_v9  ;;  %7609 = vst.msk [vmem:[%s12848_s5 + $0x70] sm:$0xff] %vm105_vm0, %v11438_v59  ;;  %v5913_v61 = vcombine.low %v2988_v13, %v2992_v33  ;;  %v5920_v43 = vrot.slane %v5910_v40, %v9964_v49  ;;  %v5927_v10 = vrot.slane %v5911_v15, %v9964_v49  ;;  %v11468_v15 = vpop.xlane.xlu0 %1257  ;;  %v11473_v24 = vpop.permute.xlu1 %6456 }
 0x281   :  { %v2908_v46 = vrot.slane %v11084_v0, %v9937_v45  ;;  %v5713_v44 = vcombine.low %v5705_v12, %v5712_v48  ;;  %v5934_v39 = vrot.slane %v5912_v1, %v9964_v49  ;;  %v2912_v18 = vrot.slane %v11084_v0, %v9940_v62 }
 0x282   :  { %v2916_v34 = vrot.slane %v11084_v0, %v9948_v19  ;;  %v5941_v16 = vrot.slane %v5913_v61, %v9964_v49  ;;  %v5942_v17 = vcombine.low %v5920_v43, %v5927_v10  ;;  %v2920_v13 = vrot.slane %v11084_v0, %v9951_v7 }
 0x283   :  { %v2924_v33 = vrot.slane %v11084_v0, %v9955_v5  ;;  %6594 = vperm.xlu0 %9114, %v5713_v44   ;;  %v2928_v12 = vrot.slane %v11084_v0, %v9958_v42  ;;  %v5812_v1 = vcombine.low %v2900_v38, %v2904_v51  ;;  %v5813_v40 = vcombine.low %v2908_v46, %v2912_v18 }
 0x284   :  { %vm7077_vm15 = vcmp.eq.s32.totalorder %v9927_v20, %v11218_v14  ;;  %v5943_v48 = vcombine.low %v5934_v39, %v5941_v16  ;;  %v5950_v61 = vrot.slane %v5942_v17, %v9964_v49  ;;  %v5814_v43 = vcombine.low %v2916_v34, %v2920_v13 }
 0x285   :  { %v12926_v10 = vmov 0.0   ;;  %9048 = vmatmul.mubr.msk.f32.gmra.mrb[52].mxu1 %vm7077_vm15, %v12927_v63  ;;  %v5815_v44 = vcombine.low %v2924_v33, %v2928_v12  ;;  %v5822_v0 = vrot.slane %v5812_v1, %v9964_v49  ;;  %v5829_v38 = vrot.slane %v5813_v40, %v9964_v49  ;;  %v11477_v46 = vpop.f32.mrb[10].mxu1 }
 0x286   :  { %v8616_v58 = vsel %vm7077_vm15, 1.0, %v12926_v10  ;;  %12928 = vst [vmem:[#allocation29_spill] sm:$0xff] %v11477_v46  ;;  %v5957_v18 = vrot.slane %v5943_v48, %v9964_v49  ;;  %v5836_v16 = vrot.slane %v5814_v43, %v9964_v49  ;;  %vm7078_vm1 = vcmp.eq.s32.totalorder %v9927_v20, %v11468_v15  ;;  %7612 = vst.msk [vmem:[%s12848_s5 + $0x88] sm:$0xff] %vm105_vm0, %v11477_v46  ;;  %v11489_v34 = vpop.f32.mrb[11].mxu1 }
 0x287   :  { %v8435_v51 = vadd.f32 %v8616_v58, %v8434_v29  ;;  %v6703_v17 = vadd.s32 4294967224, %v9927_v20  ;;  %12929 = vst [vmem:[#allocation30_spill] sm:$0xff] %v11489_v34  ;;  %v5843_v58 = vrot.slane %v5815_v44, %v9964_v49  ;;  %v5844_v29 = vcombine.low %v5822_v0, %v5829_v38  ;;  %9050 = vmatprep.mubr.msk.f32.mxu1 %vm7078_vm1, %v12927_v63  ;;  %v11512_v38 = vpop.xlane.xlu0 %1261 }
 0x288   :  { %v8617_v39 = vsel %vm7078_vm1, 1.0, %v12926_v10  ;;  %v2868_v13 = vrot.slane %v11163_v30, %v9930_v37  ;;  %7611 = vst.msk [vmem:[%s12848_s5 + $0x80] sm:$0xff] %vm105_vm0, %v11489_v34  ;;  %v11503_v33 = vsub.s32 %v9927_v20, %v9916_v26  ;;  %v5958_v12 = vcombine.low %v5950_v61, %v5957_v18 }
 0x289   :  { %v8436_v1 = vadd.f32 %v8617_v39, %v8435_v51  ;;  %v2872_v40 = vrot.slane %v11163_v30, %v9933_v9  ;;  %v5845_v48 = vcombine.low %v5836_v16, %v5843_v58  ;;  %v5852_v43 = vrot.slane %v5844_v29, %v9964_v49  ;;  %v11523_v16 = vpop.permute.xlu1 %6465 }
 0x28a   :  { %v2876_v44 = vrot.slane %v11163_v30, %v9937_v45  ;;  %v2880_v0 = vrot.slane %v11163_v30, %v9940_v62  ;;  %6609 = vperm.xlu1 %9113, %v5958_v12   ;;  %v11515_v56 = vsub.s32 %v6703_v17, %v9916_v26  ;;  %v2884_v61 = vrot.slane %v11163_v30, %v9948_v19 }
 0x28b   :  { %v2888_v51 = vrot.slane %v11163_v30, %v9951_v7  ;;  %v2892_v18 = vrot.slane %v11163_v30, %v9955_v5  ;;  %v5859_v58 = vrot.slane %v5845_v48, %v9964_v49  ;;  %v2896_v29 = vrot.slane %v11163_v30, %v9958_v42 }
 0x28c   :  { %v5763_v39 = vcombine.low %v2868_v13, %v2872_v40  ;;  %v5764_v12 = vcombine.low %v2876_v44, %v2880_v0  ;;  %vm7079_vm2 = vcmp.eq.s32.totalorder %v9927_v20, %v11290_v8  ;;  %vm7080_vm3 = vcmp.eq.s32.totalorder %v9927_v20, %v11512_v38 }
 0x28d   :  { %v5765_v17 = vcombine.low %v2884_v61, %v2888_v51  ;;  %v2932_v46 = vrot.slane %v11201_v47, %v9930_v37  ;;  %v5860_v34 = vcombine.low %v5852_v43, %v5859_v58  ;;  %v5766_v59 = vcombine.low %v2892_v18, %v2896_v29  ;;  %9051 = vmatmul.mubr.msk.f32.gmra.mrb[54].mxu1 %vm7079_vm2, %v12927_v63  ;;  %v11546_v18 = vpop.permute.xlu0 %6450 }
 0x28e   :  { %v5773_v3 = vrot.slane %v5763_v39, %v9964_v49  ;;  %v5780_v48 = vrot.slane %v5764_v12, %v9964_v49  ;;  %v8618_v13 = vsel %vm7079_vm2, 1.0, %v12926_v10  ;;  %v8619_v40 = vsel %vm7080_vm3, 1.0, %v12926_v10  ;;  %9053 = vmatprep.mubr.msk.f32.mxu1 %vm7080_vm3, %v12927_v63 }
 0x28f   :  { %v5787_v30 = vrot.slane %v5765_v17, %v9964_v49  ;;  %v2936_v44 = vrot.slane %v11201_v47, %v9933_v9  ;;  %6603 = vperm.xlu0 %9114, %v5860_v34   ;;  %v5794_v43 = vrot.slane %v5766_v59, %v9964_v49  ;;  %v8437_v61 = vadd.f32 %v8618_v13, %v8436_v1  ;;  %v11556_v59 = vpop.permute.xlu1 %6462 }
 0x290   :  { %v5795_v0 = vcombine.low %v5773_v3, %v5780_v48  ;;  %v2940_v51 = vrot.slane %v11201_v47, %v9937_v45  ;;  %v2944_v58 = vrot.slane %v11201_v47, %v9940_v62  ;;  %v2948_v29 = vrot.slane %v11201_v47, %v9948_v19 }
 0x291   :  { %v2952_v39 = vrot.slane %v11201_v47, %v9951_v7  ;;  %v2956_v34 = vrot.slane %v11201_v47, %v9955_v5  ;;  %v5796_v3 = vcombine.low %v5787_v30, %v5794_v43  ;;  %v8438_v12 = vadd.f32 %v8619_v40, %v8437_v61  ;;  %v11569_v40 = vpop.permute.xlu0 %6477 }
 0x292   :  { %v5803_v1 = vrot.slane %v5795_v0, %v9964_v49  ;;  %v2960_v17 = vrot.slane %v11201_v47, %v9958_v42  ;;  %v5861_v48 = vcombine.low %v2932_v46, %v2936_v44  ;;  %v5862_v13 = vcombine.low %v2940_v51, %v2944_v58 }
 0x293   :  { %v5863_v22 = vcombine.low %v2948_v29, %v2952_v39  ;;  %vm7081_vm4 = vcmp.eq.s32.totalorder %v9927_v20, %v11347_v52  ;;  %v5810_v54 = vrot.slane %v5796_v3, %v9964_v49  ;;  %v6647_v30 = vadd.s32 4294967288, %v9927_v20  ;;  %v11567_v43 = vpop.f32.mrb[12].mxu1  ;;  %v11597_v29 = vpop.permute.xlu1 %6471 }
 0x294   :  { %v5864_v41 = vcombine.low %v2956_v34, %v2960_v17  ;;  %v8620_v53 = vsel %vm7081_vm4, 1.0, %v12926_v10  ;;  %9054 = vmatmul.mubr.msk.f32.gmra.mrb[56].mxu1 %vm7081_vm4, %v12927_v63  ;;  %12930 = vst [vmem:[#allocation31_spill] sm:$0xff] %v11567_v43  ;;  %v5871_v47 = vrot.slane %v5861_v48, %v9964_v49  ;;  %v5878_v46 = vrot.slane %v5862_v13, %v9964_v49  ;;  %v11581_v63 = vpop.f32.mrb[13].mxu1 }
 0x295   :  { %v5885_v44 = vrot.slane %v5863_v22, %v9964_v49  ;;  %v11574_v0 = vadd.f32 %v8620_v53, %v8438_v12  ;;  %7614 = vst.msk [vmem:[%s12848_s5 + $0x98] sm:$0xff] %vm105_vm0, %v11567_v43  ;;  %12932 = vst [vmem:[#allocation33_spill] sm:$0xff] %v11581_v63  ;;  %v5811_v10 = vcombine.low %v5803_v1, %v5810_v54  ;;  %v6717_v58 = vadd.s32 4294967208, %v9927_v20 }
 0x296   :  { %v5892_v61 = vrot.slane %v5864_v41, %v9964_v49  ;;  %v11585_v51 = vsub.s32 %v6647_v30, %v9916_v26  ;;  %7613 = vst.msk [vmem:[%s12848_s5 + $0x90] sm:$0xff] %vm105_vm0, %v11581_v63  ;;  %v6646_v53 = vrot.slane %v11546_v18, %v11503_v33  ;;  %v5893_v22 = vcombine.low %v5871_v47, %v5878_v46 }
 0x297   :  { %12931 = vst [vmem:[#allocation32_spill] sm:$0xff] %v11574_v0  ;;  %v3028_v54 = vrot.slane %v11143_v31, %v9930_v37  ;;  %6600 = vperm.xlu0 %9114, %v5811_v10   ;;  %v3032_v34 = vrot.slane %v11143_v31, %v9933_v9  ;;  %v3036_v3 = vrot.slane %v11143_v31, %v9937_v45  ;;  %v11629_v63 = vpop.permute.xlu1 %6468  ;;  %vm6666_vm7 = vcmask 261312  }
 0x298   :  { %v5894_v39 = vcombine.low %v5885_v44, %v5892_v61  ;;  %v5901_v18 = vrot.slane %v5893_v22, %v9964_v49  ;;  %v3040_v1 = vrot.slane %v11143_v31, %v9940_v62  ;;  %v3044_v12 = vrot.slane %v11143_v31, %v9948_v19 }
 0x299   :  { %v6651_v48 = vrot.slane %v11400_v27, %v11585_v51  ;;  %v3048_v13 = vrot.slane %v11143_v31, %v9951_v7  ;;  %v3052_v30 = vrot.slane %v11143_v31, %v9955_v5  ;;  %v11618_v47 = vsub.s32 %v6717_v58, %v9916_v26 }
 0x29a   :  { %v5908_v17 = vrot.slane %v5894_v39, %v9964_v49  ;;  %v3056_v46 = vrot.slane %v11143_v31, %v9958_v42  ;;  %v6008_v44 = vcombine.low %v3028_v54, %v3032_v34  ;;  %v6009_v10 = vcombine.low %v3036_v3, %v3040_v1 }
 0x29b   :  { %v6010_v22 = vcombine.low %v3044_v12, %v3048_v13  ;;  %v6661_v39 = vadd.s32 4294967272, %v9927_v20  ;;  %v2996_v27 = vrot.slane %v11274_v35, %v9930_v37  ;;  %v3000_v58 = vrot.slane %v11274_v35, %v9933_v9 }
 0x29c   :  { %v5909_v61 = vcombine.low %v5901_v18, %v5908_v17  ;;  %v6011_v41 = vcombine.low %v3052_v30, %v3056_v46  ;;  %v6018_v0 = vrot.slane %v6008_v44, %v9964_v49  ;;  %v6025_v43 = vrot.slane %v6009_v10, %v9964_v49  ;;  %v11639_v18 = vpop.permute.xlu0 %6483 }
 0x29d   :  { %v11632_v31 = vsel %vm6652_vm5, %v6651_v48, %v6646_v53  ;;  %v6032_v54 = vrot.slane %v6010_v22, %v9964_v49  ;;  %v3004_v34 = vrot.slane %v11274_v35, %v9937_v45  ;;  %v3008_v3 = vrot.slane %v11274_v35, %v9940_v62 }
 0x29e   :  { %6606 = vperm.xlu0 %9114, %v5909_v61   ;;  %v6039_v1 = vrot.slane %v6011_v41, %v9964_v49  ;;  %v6040_v12 = vcombine.low %v6018_v0, %v6025_v43  ;;  %v3012_v17 = vrot.slane %v11274_v35, %v9948_v19  ;;  %v3016_v53 = vrot.slane %v11274_v35, %v9951_v7 }
 0x29f   :  { %v11647_v48 = vsub.s32 %v6661_v39, %v9916_v26  ;;  %v3020_v13 = vrot.slane %v11274_v35, %v9955_v5  ;;  %v3024_v30 = vrot.slane %v11274_v35, %v9958_v42  ;;  %v5959_v46 = vcombine.low %v2996_v27, %v3000_v58  ;;  %v11662_v58 = vpop.permute.xlu1 %6474 }
 0x2a0   :  { %v6041_v44 = vcombine.low %v6032_v54, %v6039_v1  ;;  %v6048_v41 = vrot.slane %v6040_v12, %v9964_v49  ;;  %v5960_v43 = vcombine.low %v3004_v34, %v3008_v3  ;;  %v5961_v0 = vcombine.low %v3012_v17, %v3016_v53 }
 0x2a1   :  { %v5962_v61 = vcombine.low %v3020_v13, %v3024_v30  ;;  %v5969_v22 = vrot.slane %v5959_v46, %v9964_v49  ;;  %v6654_v39 = vadd.s32 4294967280, %v9927_v20  ;;  %v6731_v27 = vadd.s32 4294967192, %v9927_v20 }
 0x2a2   :  { %v6055_v2 = vrot.slane %v6041_v44, %v9964_v49  ;;  %v5976_v25 = vrot.slane %v5960_v43, %v9964_v49  ;;  %v5983_v35 = vrot.slane %v5961_v0, %v9964_v49  ;;  %v3060_v3 = vrot.slane %v11336_v28, %v9930_v37 }
 0x2a3   :  { %v5990_v54 = vrot.slane %v5962_v61, %v9964_v49  ;;  %v11666_v34 = vsub.s32 %v6654_v39, %v9916_v26  ;;  %v3064_v1 = vrot.slane %v11336_v28, %v9933_v9  ;;  %v3068_v13 = vrot.slane %v11336_v28, %v9937_v45 }
 0x2a4   :  { %v6056_v12 = vcombine.low %v6048_v41, %v6055_v2  ;;  %v5991_v53 = vcombine.low %v5969_v22, %v5976_v25  ;;  %v11676_v30 = vpop.f32.mrb[14].mxu1  ;;  %v3072_v44 = vrot.slane %v11336_v28, %v9940_v62  ;;  %v3076_v43 = vrot.slane %v11336_v28, %v9948_v19 }
 0x2a5   :  { %12933 = vst [vmem:[#allocation34_spill] sm:$0xff] %v11666_v34  ;;  %12934 = vst [vmem:[#allocation35_spill] sm:$0xff] %v11676_v30  ;;  %v5992_v46 = vcombine.low %v5983_v35, %v5990_v54  ;;  %v11687_v25 = vpop.f32.mrb[15].mxu1  ;;  %v11691_v41 = vsub.s32 %v6731_v27, %v9916_v26  ;;  %v3080_v0 = vrot.slane %v11336_v28, %v9951_v7  ;;  %v11705_v35 = vpop.permute.xlu0 %6489  ;;  %v6675_v10 = vadd.s32 4294967256, %v9927_v20 }
 0x2a6   :  { %7616 = vst.msk [vmem:[%s12848_s5 + $0xa8] sm:$0xff] %vm105_vm0, %v11676_v30  ;;  %12935 = vst [vmem:[#allocation36_spill] sm:$0xff] %v11687_v25  ;;  %6615 = vperm.xlu0 %9114, %v6056_v12   ;;  %v5999_v2 = vrot.slane %v5991_v53, %v9964_v49  ;;  %v3084_v61 = vrot.slane %v11336_v28, %v9955_v5  ;;  %v6658_v39 = vrot.slane %v11473_v24, %v11666_v34  ;;  %v11712_v30 = vpop.permute.xlu1 %6480  ;;  %vm6673_vm8 = vcmask 326912  }
 0x2a7   :  { %7615 = vst.msk [vmem:[%s12848_s5 + $0xa0] sm:$0xff] %vm105_vm0, %v11687_v25  ;;  %v6006_v22 = vrot.slane %v5992_v46, %v9964_v49  ;;  %v3088_v27 = vrot.slane %v11336_v28, %v9958_v42  ;;  %v6057_v54 = vcombine.low %v3060_v3, %v3064_v1  ;;  %v6058_v12 = vcombine.low %v3068_v13, %v3072_v44 }
 0x2a8   :  { %v6059_v53 = vcombine.low %v3076_v43, %v3080_v0  ;;  %v3092_v17 = vrot.slane %v11176_v50, %v9930_v37  ;;  %v3096_v24 = vrot.slane %v11176_v50, %v9933_v9  ;;  %v3100_v13 = vrot.slane %v11176_v50, %v9937_v45 }
 0x2a9   :  { %v6007_v25 = vcombine.low %v5999_v2, %v6006_v22  ;;  %v6060_v46 = vcombine.low %v3084_v61, %v3088_v27  ;;  %v6067_v36 = vrot.slane %v6057_v54, %v9964_v49  ;;  %v6074_v3 = vrot.slane %v6058_v12, %v9964_v49 }
 0x2aa   :  { %v6081_v1 = vrot.slane %v6059_v53, %v9964_v49  ;;  %v3104_v43 = vrot.slane %v11176_v50, %v9940_v62  ;;  %v3108_v2 = vrot.slane %v11176_v50, %v9948_v19  ;;  %v3112_v0 = vrot.slane %v11176_v50, %v9951_v7 }
 0x2ab   :  { %6612 = vperm.xlu0 %9114, %v6007_v25   ;;  %v6088_v44 = vrot.slane %v6060_v46, %v9964_v49  ;;  %v6089_v61 = vcombine.low %v6067_v36, %v6074_v3  ;;  %v11731_v22 = vsub.s32 %v6675_v10, %v9916_v26  ;;  %v3116_v27 = vrot.slane %v11176_v50, %v9955_v5  ;;  %v11741_v10 = vpop.permute.xlu1 %6486 }
 0x2ac   :  { %v3120_v25 = vrot.slane %v11176_v50, %v9958_v42  ;;  %v6106_v12 = vcombine.low %v3092_v17, %v3096_v24  ;;  %v6107_v53 = vcombine.low %v3100_v13, %v3104_v43  ;;  %v6108_v46 = vcombine.low %v3108_v2, %v3112_v0 }
 0x2ad   :  { %v6090_v54 = vcombine.low %v6081_v1, %v6088_v44  ;;  %v6660_v28 = vsel %vm6659_vm6, %v6658_v39, %v11632_v31  ;;  %v6097_v57 = vrot.slane %v6089_v61, %v9964_v49  ;;  %v6668_v36 = vadd.s32 4294967264, %v9927_v20 }
 0x2ae   :  { %v6109_v4 = vcombine.low %v3116_v27, %v3120_v25  ;;  %v6116_v6 = vrot.slane %v6106_v12, %v9964_v49  ;;  %v6123_v50 = vrot.slane %v6107_v53, %v9964_v49  ;;  %v6130_v17 = vrot.slane %v6108_v46, %v9964_v49 }
 0x2af   :  { %v6104_v3 = vrot.slane %v6090_v54, %v9964_v49  ;;  %v11751_v39 = vsub.s32 %v6668_v36, %v9916_v26  ;;  %v6745_v44 = vadd.s32 4294967176, %v9927_v20  ;;  %v3124_v43 = vrot.slane %v11395_v21, %v9930_v37  ;;  %v11781_v36 = vpop.permute.xlu0 %6495 }
 0x2b0   :  { %v6137_v31 = vrot.slane %v6109_v4, %v9964_v49  ;;  %v6138_v13 = vcombine.low %v6116_v6, %v6123_v50  ;;  %v3128_v0 = vrot.slane %v11395_v21, %v9933_v9  ;;  %v3132_v61 = vrot.slane %v11395_v21, %v9937_v45  ;;  %12938 = vst [vmem:[#allocation38_spill] sm:$0xff] %v11781_v36 }
 0x2b1   :  { %12936 = vst [vmem:[#allocation37_spill] sm:$0xff] %v11751_v39  ;;  %v6105_v1 = vcombine.low %v6097_v57, %v6104_v3  ;;  %v12937_v57 = vrot.slane %v11431_v23, %v11647_v48  ;;  %v3136_v27 = vrot.slane %v11395_v21, %v9940_v62  ;;  %v3140_v25 = vrot.slane %v11395_v21, %v9948_v19  ;;  %v11776_v23 = vpop.permute.xlu1 %6492 }
 0x2b2   :  { %v6139_v2 = vcombine.low %v6130_v17, %v6137_v31  ;;  %v6146_v4 = vrot.slane %v6138_v13, %v9964_v49  ;;  %v6672_v12 = vrot.slane %v11556_v59, %v11751_v39  ;;  %v3144_v53 = vrot.slane %v11395_v21, %v9951_v7 }
 0x2b3   :  { %6618 = vperm.xlu0 %9114, %v6105_v1   ;;  %v6667_v6 = vsel %vm6666_vm7, %v12937_v57, %v6660_v28  ;;  %v3148_v46 = vrot.slane %v11395_v21, %v9955_v5  ;;  %v11779_v28 = vsub.s32 %v6745_v44, %v9916_v26  ;;  %v3152_v3 = vrot.slane %v11395_v21, %v9958_v42 }
 0x2b4   :  { %v6153_v54 = vrot.slane %v6139_v2, %v9964_v49  ;;  %v6155_v50 = vcombine.low %v3124_v43, %v3128_v0  ;;  %v6156_v17 = vcombine.low %v3132_v61, %v3136_v27  ;;  %v6157_v1 = vcombine.low %v3140_v25, %v3144_v53 }
 0x2b5   :  { %v11785_v31 = vpop.f32.mrb[16].mxu1  ;;  %v6689_v13 = vadd.s32 4294967240, %v9927_v20  ;;  %v3156_v2 = vrot.slane %v11218_v14, %v9930_v37  ;;  %v6158_v21 = vcombine.low %v3148_v46, %v3152_v3  ;;  %v3160_v61 = vrot.slane %v11218_v14, %v9933_v9  ;;  %v11826_v24 = vpop.permute.xlu1 %6498 }
 0x2b6   :  { %12939 = vst [vmem:[#allocation39_spill] sm:$0xff] %v11785_v31  ;;  %v6154_v59 = vcombine.low %v6146_v4, %v6153_v54  ;;  %7618 = vst.msk [vmem:[%s12848_s5 + $0xb8] sm:$0xff] %vm105_vm0, %v11785_v31  ;;  %v11795_v44 = vpop.f32.mrb[17].mxu1  ;;  %v6165_v43 = vrot.slane %v6155_v50, %v9964_v49  ;;  %v6172_v0 = vrot.slane %v6156_v17, %v9964_v49  ;;  %v11819_v50 = vpop.permute.xlu0 %6501  ;;  %vm6680_vm9 = vcmask 392512  }
 0x2b7   :  { %12940 = vst [vmem:[#allocation40_spill] sm:$0xff] %v11795_v44  ;;  %7617 = vst.msk [vmem:[%s12848_s5 + $0xb0] sm:$0xff] %vm105_vm0, %v11795_v44  ;;  %v6179_v4 = vrot.slane %v6157_v1, %v9964_v49  ;;  %v11808_v57 = vsub.s32 %v6689_v13, %v9916_v26  ;;  %v3164_v27 = vrot.slane %v11218_v14, %v9937_v45  ;;  %vm6687_vm10 = vcmask 458112  }
 0x2b8   :  { %6621 = vperm.xlu0 %9114, %v6154_v59   ;;  %v3168_v25 = vrot.slane %v11218_v14, %v9940_v62  ;;  %v6186_v54 = vrot.slane %v6158_v21, %v9964_v49  ;;  %v6187_v53 = vcombine.low %v6165_v43, %v6172_v0  ;;  %v3172_v46 = vrot.slane %v11218_v14, %v9948_v19 }
 0x2b9   :  { %v3176_v3 = vrot.slane %v11218_v14, %v9951_v7  ;;  %v6674_v17 = vsel %vm6673_vm8, %v6672_v12, %v6667_v6  ;;  %v3180_v59 = vrot.slane %v11218_v14, %v9955_v5  ;;  %v3184_v1 = vrot.slane %v11218_v14, %v9958_v42 }
 0x2ba   :  { %v6204_v13 = vcombine.low %v3156_v2, %v3160_v61  ;;  %v6188_v21 = vcombine.low %v6179_v4, %v6186_v54  ;;  %v6195_v43 = vrot.slane %v6187_v53, %v9964_v49  ;;  %v6205_v0 = vcombine.low %v3164_v27, %v3168_v25  ;;  %v11836_v61 = vpop.permute.xlu0 %6507 }
 0x2bb   :  { %v6206_v31 = vcombine.low %v3172_v46, %v3176_v3  ;;  %v6207_v44 = vcombine.low %v3180_v59, %v3184_v1  ;;  %v6682_v6 = vadd.s32 4294967248, %v9927_v20  ;;  %v6693_v34 = vrot.slane %v11597_v29, %v11808_v57  ;;  %v11856_v1 = vpop.permute.xlu1 %6504 }
 0x2bc   :  { %v6214_v39 = vrot.slane %v6204_v13, %v9964_v49  ;;  %v6202_v12 = vrot.slane %v6188_v21, %v9964_v49  ;;  %v6221_v14 = vrot.slane %v6205_v0, %v9964_v49  ;;  %v12942_v25 = vrot.slane %v11523_v16, %v11731_v22 }
 0x2bd   :  { %v6228_v2 = vrot.slane %v6206_v31, %v9964_v49  ;;  %v6235_v4 = vrot.slane %v6207_v44, %v9964_v49  ;;  %v11840_v27 = vsub.s32 %v6682_v6, %v9916_v26  ;;  %v3188_v29 = vrot.slane %v11468_v15, %v9930_v37 }
 0x2be   :  { %v6681_v54 = vsel %vm6680_vm9, %v12942_v25, %v6674_v17  ;;  %v6203_v53 = vcombine.low %v6195_v43, %v6202_v12  ;;  %v6236_v46 = vcombine.low %v6214_v39, %v6221_v14  ;;  %v3192_v31 = vrot.slane %v11468_v15, %v9933_v9  ;;  %v11865_v21 = vpop.permute.xlu0 %6513 }
 0x2bf   :  { %12941 = vst [vmem:[#allocation41_spill] sm:$0xff] %v11840_v27  ;;  %v6237_v3 = vcombine.low %v6228_v2, %v6235_v4  ;;  %v6686_v44 = vrot.slane %v11629_v63, %v11840_v27  ;;  %v3196_v59 = vrot.slane %v11468_v15, %v9937_v45  ;;  %v3200_v16 = vrot.slane %v11468_v15, %v9940_v62 }
 0x2c0   :  { %6624 = vperm.xlu0 %9114, %v6203_v53   ;;  %v6244_v39 = vrot.slane %v6236_v46, %v9964_v49  ;;  %v3204_v17 = vrot.slane %v11468_v15, %v9948_v19  ;;  %v3208_v13 = vrot.slane %v11468_v15, %v9951_v7  ;;  %v3212_v63 = vrot.slane %v11468_v15, %v9955_v5 }
 0x2c1   :  { %v6251_v43 = vrot.slane %v6237_v3, %v9964_v49  ;;  %v6688_v0 = vsel %vm6687_vm10, %v6686_v44, %v6681_v54  ;;  %v3216_v6 = vrot.slane %v11468_v15, %v9958_v42  ;;  %v6253_v12 = vcombine.low %v3188_v29, %v3192_v31 }
 0x2c2   :  { %v6254_v14 = vcombine.low %v3196_v59, %v3200_v16  ;;  %v6255_v2 = vcombine.low %v3204_v17, %v3208_v13  ;;  %vm6694_vm11 = vcmask 523712   ;;  %v6696_v4 = vadd.s32 4294967232, %v9927_v20  ;;  %v11879_v29 = vpop.permute.xlu0 %6519  ;;  %v11890_v17 = vpop.permute.xlu1 %6510 }
 0x2c3   :  { %v6252_v25 = vcombine.low %v6244_v39, %v6251_v43  ;;  %v6256_v53 = vcombine.low %v3212_v63, %v3216_v6  ;;  %v6263_v46 = vrot.slane %v6253_v12, %v9964_v49  ;;  %vm6701_vm12 = vcmask 589312  }
 0x2c4   :  { %v6270_v27 = vrot.slane %v6254_v14, %v9964_v49  ;;  %v6277_v3 = vrot.slane %v6255_v2, %v9964_v49  ;;  %v11876_v54 = vsub.s32 %v6696_v4, %v9916_v26  ;;  %v6695_v15 = vsel %vm6694_vm11, %v6693_v34, %v6688_v0 }
 0x2c5   :  { %v11881_v31 = vpop.f32.mrb[18].mxu1  ;;  %6627 = vperm.xlu0 %9114, %v6252_v25   ;;  %v6284_v44 = vrot.slane %v6256_v53, %v9964_v49  ;;  %v3220_v59 = vrot.slane %v11290_v8, %v9930_v37  ;;  %v3224_v16 = vrot.slane %v11290_v8, %v9933_v9  ;;  %v3228_v39 = vrot.slane %v11290_v8, %v9937_v45 }
 0x2c6   :  { %12943 = vst [vmem:[#allocation42_spill] sm:$0xff] %v11876_v54  ;;  %12944 = vst [vmem:[#allocation43_spill] sm:$0xff] %v11881_v31  ;;  %v11897_v34 = vpop.f32.mrb[19].mxu1  ;;  %v6285_v13 = vcombine.low %v6263_v46, %v6270_v27  ;;  %v6700_v63 = vrot.slane %v11662_v58, %v11876_v54  ;;  %v3232_v43 = vrot.slane %v11290_v8, %v9940_v62  ;;  %v11918_v53 = vpop.permute.xlu0 %6525  ;;  %vm6708_vm13 = vcmask 654912  }
 0x2c7   :  { %7620 = vst.msk [vmem:[%s12848_s5 + $0xc8] sm:$0xff] %vm105_vm0, %v11881_v31  ;;  %12945 = vst [vmem:[#allocation44_spill] sm:$0xff] %v11897_v34  ;;  %v3236_v0 = vrot.slane %v11290_v8, %v9948_v19  ;;  %v6286_v6 = vcombine.low %v6277_v3, %v6284_v44  ;;  %v3240_v12 = vrot.slane %v11290_v8, %v9951_v7  ;;  %vm6715_vm14 = vcmask 720512  }
 0x2c8   :  { %7619 = vst.msk [vmem:[%s12848_s5 + $0xc0] sm:$0xff] %vm105_vm0, %v11897_v34  ;;  %v3244_v27 = vrot.slane %v11290_v8, %v9955_v5  ;;  %v3248_v58 = vrot.slane %v11290_v8, %v9958_v42  ;;  %v6293_v14 = vrot.slane %v6285_v13, %v9964_v49  ;;  %v6702_v2 = vsel %vm6701_vm12, %v6700_v63, %v6695_v15 }
 0x2c9   :  { %v6302_v4 = vcombine.low %v3220_v59, %v3224_v16  ;;  %v6303_v25 = vcombine.low %v3228_v39, %v3232_v43  ;;  %v6300_v46 = vrot.slane %v6286_v6, %v9964_v49  ;;  %v6304_v3 = vcombine.low %v3236_v0, %v3240_v12  ;;  %v11928_v16 = vpop.permute.xlu1 %6516 }
 0x2ca   :  { %v6305_v44 = vcombine.low %v3244_v27, %v3248_v58  ;;  %v6710_v13 = vadd.s32 4294967216, %v9927_v20  ;;  %v12947_v0 = vrot.slane %v11569_v40, %v11515_v56  ;;  %v3252_v12 = vrot.slane %v11512_v38, %v9930_v37 }
 0x2cb   :  { %v6312_v34 = vrot.slane %v6302_v4, %v9964_v49  ;;  %v6319_v8 = vrot.slane %v6303_v25, %v9964_v49  ;;  %v6301_v54 = vcombine.low %v6293_v14, %v6300_v46  ;;  %v6326_v15 = vrot.slane %v6304_v3, %v9964_v49  ;;  %v11966_v46 = vpop.permute.xlu0 %6531 }
 0x2cc   :  { %v6333_v59 = vrot.slane %v6305_v44, %v9964_v49  ;;  %v11930_v39 = vpop.f32.mrb[20].mxu1  ;;  %v11933_v43 = vsub.s32 %v6710_v13, %v9916_v26  ;;  %v6709_v6 = vsel %vm6708_vm13, %v12947_v0, %v6702_v2  ;;  %v3256_v58 = vrot.slane %v11512_v38, %v9933_v9 }
 0x2cd   :  { %12946 = vst [vmem:[#allocation45_spill] sm:$0xff] %v11930_v39  ;;  %v6334_v63 = vcombine.low %v6312_v34, %v6319_v8  ;;  %7622 = vst.msk [vmem:[%s12848_s5 + $0xd8] sm:$0xff] %vm105_vm0, %v11930_v39  ;;  %v11946_v27 = vpop.f32.mrb[21].mxu1  ;;  %6630 = vperm.xlu0 %9114, %v6301_v54   ;;  %v3260_v40 = vrot.slane %v11512_v38, %v9937_v45  ;;  %v3264_v14 = vrot.slane %v11512_v38, %v9940_v62  ;;  %vm6722_vm15 = vcmask 786112  }
 0x2ce   :  { %12948 = vst [vmem:[#allocation46_spill] sm:$0xff] %v11946_v27  ;;  %v6335_v34 = vcombine.low %v6326_v15, %v6333_v59  ;;  %7621 = vst.msk [vmem:[%s12848_s5 + $0xd0] sm:$0xff] %vm105_vm0, %v11946_v27  ;;  %v6714_v54 = vrot.slane %v11712_v30, %v11933_v43  ;;  %v3268_v4 = vrot.slane %v11512_v38, %v9948_v19  ;;  %v6724_v39 = vadd.s32 4294967200, %v9927_v20  ;;  %v11976_v27 = vpop.permute.xlu1 %6522 }
 0x2cf   :  { %v6342_v2 = vrot.slane %v6334_v63, %v9964_v49  ;;  %v3272_v25 = vrot.slane %v11512_v38, %v9951_v7  ;;  %v3276_v44 = vrot.slane %v11512_v38, %v9955_v5  ;;  %v3280_v8 = vrot.slane %v11512_v38, %v9958_v42 }
 0x2d0   :  { %v6349_v3 = vrot.slane %v6335_v34, %v9964_v49  ;;  %v6351_v13 = vcombine.low %v3252_v12, %v3256_v58  ;;  %v6716_v15 = vsel %vm6715_vm14, %v6714_v54, %v6709_v6  ;;  %v6352_v30 = vcombine.low %v3260_v40, %v3264_v14 }
 0x2d1   :  { %v6353_v59 = vcombine.low %v3268_v4, %v3272_v25  ;;  %v6354_v0 = vcombine.low %v3276_v44, %v3280_v8  ;;  %vm6729_vm1 = vcmask 851712   ;;  %v12949_v38 = vrot.slane %v11639_v18, %v11618_v47 }
 0x2d2   :  { %v6350_v63 = vcombine.low %v6342_v2, %v6349_v3  ;;  %v6361_v31 = vrot.slane %v6351_v13, %v9964_v49  ;;  %v6368_v34 = vrot.slane %v6352_v30, %v9964_v49  ;;  %v11988_v40 = vsub.s32 %v6724_v39, %v9916_v26  ;;  %v12007_v3 = vpop.permute.xlu0 %6537 }
 0x2d3   :  { %v6375_v36 = vrot.slane %v6353_v59, %v9964_v49  ;;  %v6723_v6 = vsel %vm6722_vm15, %v12949_v38, %v6716_v15  ;;  %v11984_v12 = vpop.f32.mrb[22].mxu1  ;;  %v6382_v58 = vrot.slane %v6354_v0, %v9964_v49  ;;  %v3284_v14 = vrot.slane %v11347_v52, %v9930_v37 }
 0x2d4   :  { %6633 = vperm.xlu0 %9114, %v6350_v63   ;;  %v3288_v2 = vrot.slane %v11347_v52, %v9933_v9  ;;  %7624 = vst.msk [vmem:[%s12848_s5 + $0xe8] sm:$0xff] %vm105_vm0, %v11984_v12  ;;  %v11999_v18 = vpop.f32.mrb[23].mxu1  ;;  %v6383_v54 = vcombine.low %v6361_v31, %v6368_v34  ;;  %v3292_v4 = vrot.slane %v11347_v52, %v9937_v45  ;;  %vm6736_vm2 = vcmask 917312  }
 0x2d5   :  { %v3296_v39 = vrot.slane %v11347_v52, %v9940_v62  ;;  %v3300_v25 = vrot.slane %v11347_v52, %v9948_v19  ;;  %7623 = vst.msk [vmem:[%s12848_s5 + $0xe0] sm:$0xff] %vm105_vm0, %v11999_v18  ;;  %v6384_v44 = vcombine.low %v6375_v36, %v6382_v58  ;;  %v6728_v31 = vrot.slane %v11741_v10, %v11988_v40  ;;  %v9116_v10 = vld [vmem:[%s12843_s0 + $0x8] sm:$0xff]  ;;  %v12029_v58 = vpop.permute.xlu1 %6528 }
 0x2d6   :  { %v3304_v8 = vrot.slane %v11347_v52, %v9951_v7  ;;  %v3308_v13 = vrot.slane %v11347_v52, %v9955_v5  ;;  %v6391_v15 = vrot.slane %v6383_v54, %v9964_v49  ;;  %v3312_v30 = vrot.slane %v11347_v52, %v9958_v42 }
 0x2d7   :  { %v6400_v59 = vcombine.low %v3284_v14, %v3288_v2  ;;  %v6401_v63 = vcombine.low %v3292_v4, %v3296_v39  ;;  %v6398_v0 = vrot.slane %v6384_v44, %v9964_v49  ;;  %v6730_v36 = vsel %vm6729_vm1, %v6728_v31, %v6723_v6  ;;  %v9117_v14 = vld [vmem:[%s12843_s0] sm:$0xff] }
 0x2d8   :  { %v6402_v34 = vcombine.low %v3300_v25, %v3304_v8  ;;  %v7983_v38 = vsub.f32 %v11188_v55, %v9116_v10  ;;  %v6403_v5 = vcombine.low %v3308_v13, %v3312_v30  ;;  %v7982_v6 = vsub.f32 %v11199_v32, %v9117_v14  ;;  %v12040_v8 = vpop.permute.xlu0 %6543  ;;  %v12951_v14 = vld [vmem:[#allocation34_spill] sm:$0xff] }
 0x2d9   :  { %v6410_v54 = vrot.slane %v6400_v59, %v9964_v49  ;;  %v6417_v52 = vrot.slane %v6401_v63, %v9964_v49  ;;  %v6399_v2 = vcombine.low %v6391_v15, %v6398_v0  ;;  %v6738_v31 = vadd.s32 4294967184, %v9927_v20 }
 0x2da   :  { %v6424_v4 = vrot.slane %v6402_v34, %v9964_v49  ;;  %v8111_v39 = vmul.f32 %v7983_v38, %v7983_v38  ;;  %v6431_v55 = vrot.slane %v6403_v5, %v9964_v49  ;;  %v8110_v44 = vmul.f32 %v7982_v6, %v7982_v6  ;;  %v9119_v34 = vld [vmem:[%s12843_s0 + $0x10] sm:$0xff]  ;;  %v12068_v38 = vpop.permute.xlu1 %6534 }
 0x2db   :  { %v6432_v25 = vcombine.low %v6410_v54, %v6417_v52  ;;  %v6759_v13 = vrot.slane %v11819_v50, %v11585_v51  ;;  %v6769_v30 = vrot.slane %v11836_v61, %v11647_v48  ;;  %6636 = vperm.xlu0 %9114, %v6399_v2   ;;  %v12950_v15 = vrot.slane %v11705_v35, %v11691_v41  ;;  %v9118_v35 = vld [vmem:[%s12843_s0 + $0x18] sm:$0xff] }
 0x2dc   :  { %v8175_v32 = vsel %vm105_vm0, %v8111_v39, 0.0  ;;  %v6433_v59 = vcombine.low %v6424_v4, %v6431_v55  ;;  %v8174_v63 = vsel %vm105_vm0, %v8110_v44, 0.0  ;;  %v12056_v0 = vsub.s32 %v6738_v31, %v9916_v26  ;;  %v12952_v39 = vld [vmem:[#allocation37_spill] sm:$0xff] }
 0x2dd   :  { %v12051_v5 = vsel %vm6736_vm2, %v12950_v15, %v6730_v36  ;;  %v6440_v20 = vrot.slane %v6432_v25, %v9964_v49  ;;  %v8176_v50 = vadd.f32 %v8175_v32, %v8174_v63  ;;  %vm6743_vm3 = vcmask 982912   ;;  %v9120_v25 = vld [vmem:[%s12843_s0 + $0x28] sm:$0xff] }
 0x2de   :  { %v6755_v61 = vrot.slane %v11826_v24, %v11503_v33  ;;  %v7985_v36 = vsub.f32 %v11212_v60, %v9118_v35  ;;  %v7984_v10 = vsub.f32 %v11225_v11, %v9119_v34  ;;  %v12070_v26 = vpop.f32.mrb[24].mxu1  ;;  %v6447_v54 = vrot.slane %v6433_v59, %v9964_v49  ;;  %v12953_v44 = vld [vmem:[#allocation17_spill] sm:$0xff]  ;;  %v9121_v59 = vld [vmem:[%s12843_s0 + $0x20] sm:$0xff] }
 0x2df   :  { %v6742_v24 = vrot.slane %v11776_v23, %v12056_v0  ;;  %v6779_v52 = vrot.slane %v11865_v21, %v11731_v22  ;;  %v6764_v60 = vrot.slane %v11856_v1, %v12951_v14  ;;  %7626 = vst.msk [vmem:[%s12848_s5 + $0xf8] sm:$0xff] %vm105_vm0, %v12070_v26  ;;  %v12084_v11 = vpop.f32.mrb[25].mxu1  ;;  %v6774_v23 = vrot.slane %v11890_v17, %v12952_v39 }
 0x2e0   :  { %v6760_v6 = vsel %vm6652_vm5, %v6759_v13, %v6755_v61  ;;  %v8113_v2 = vmul.f32 %v7985_v36, %v7985_v36  ;;  %v8112_v4 = vmul.f32 %v7984_v10, %v7984_v10  ;;  %7625 = vst.msk [vmem:[%s12848_s5 + $0xf0] sm:$0xff] %vm105_vm0, %v12084_v11  ;;  %v6448_v1 = vcombine.low %v6440_v20, %v6447_v54  ;;  %v12101_v13 = vpop.permute.xlu0 %6549  ;;  %v12954_v20 = vld [vmem:[#allocation18_spill] sm:$0xff]  ;;  %v12955_v36 = vld [vmem:[#allocation41_spill] sm:$0xff] }
 0x2e1   :  { %v6765_v21 = vsel %vm6659_vm6, %v6764_v60, %v6760_v6  ;;  %v6789_v55 = vrot.slane %v11879_v29, %v11808_v57  ;;  %v7987_v31 = vsub.f32 %v12953_v44, %v9120_v25  ;;  %v7986_v29 = vsub.f32 %v12954_v20, %v9121_v59  ;;  %v12956_v60 = vld [vmem:[#allocation42_spill] sm:$0xff] }
 0x2e2   :  { %v8179_v17 = vsel %vm105_vm0, %v8113_v2, 0.0  ;;  %v8177_v32 = vsel %vm105_vm0, %v8112_v4, 0.0  ;;  %v6770_v15 = vsel %vm6666_vm7, %v6769_v30, %v6765_v21  ;;  %6639 = vperm.xlu0 %9114, %v6448_v1   ;;  %v6784_v34 = vrot.slane %v11928_v16, %v12955_v36  ;;  %v6541_v2 = vpop.permute.xlu1 %6540  ;;  %v12957_v16 = vld [vmem:[#allocation19_spill] sm:$0xff] }
 0x2e3   :  { %v8178_v63 = vadd.f32 %v8177_v32, %v8176_v50  ;;  %v6775_v61 = vsel %vm6673_vm8, %v6774_v23, %v6770_v15  ;;  %v8115_v35 = vmul.f32 %v7987_v31, %v7987_v31  ;;  %v8114_v10 = vmul.f32 %v7986_v29, %v7986_v29  ;;  %v9122_v23 = vld [vmem:[%s12843_s0 + $0x38] sm:$0xff] }
 0x2e4   :  { %v6780_v54 = vsel %vm6680_vm9, %v6779_v52, %v6775_v61  ;;  %v6794_v30 = vrot.slane %v11976_v27, %v12956_v60  ;;  %v6799_v6 = vrot.slane %v11918_v53, %v11515_v56  ;;  %v7989_v21 = vsub.f32 %v12957_v16, %v9122_v23  ;;  %v9123_v53 = vld [vmem:[%s12843_s0 + $0x30] sm:$0xff]  ;;  %v12958_v27 = vld [vmem:[#allocation20_spill] sm:$0xff]  ;;  %v6556_v20 = vpop.permute.xlu0 %6555 }
 0x2e5   :  { %v8183_v4 = vsel %vm105_vm0, %v8115_v35, 0.0  ;;  %v8180_v1 = vadd.f32 %v8179_v17, %v8178_v63  ;;  %v6785_v50 = vsel %vm6687_vm10, %v6784_v34, %v6780_v54  ;;  %v8181_v52 = vsel %vm105_vm0, %v8114_v10, 0.0  ;;  %v12959_v10 = vld [vmem:[#allocation21_spill] sm:$0xff] }
 0x2e6   :  { %v6790_v25 = vsel %vm6694_vm11, %v6789_v55, %v6785_v50  ;;  %v7988_v44 = vsub.f32 %v12958_v27, %v9123_v53  ;;  %v6804_v31 = vrot.slane %v12029_v58, %v11933_v43  ;;  %v8117_v15 = vmul.f32 %v7989_v21, %v7989_v21 }
 0x2e7   :  { %v8182_v17 = vadd.f32 %v8181_v52, %v8180_v1  ;;  %v6795_v32 = vsel %vm6701_vm12, %v6794_v30, %v6790_v25  ;;  %v6809_v59 = vrot.slane %v11966_v46, %v11618_v47  ;;  %v6814_v63 = vrot.slane %v12068_v38, %v11988_v40  ;;  %v9124_v46 = vld [vmem:[%s12843_s0 + $0x48] sm:$0xff]  ;;  %v12960_v38 = vld [vmem:[#allocation22_spill] sm:$0xff] }
 0x2e8   :  { %v6800_v29 = vsel %vm6708_vm13, %v6799_v6, %v6795_v32  ;;  %v8116_v55 = vmul.f32 %v7988_v44, %v7988_v44  ;;  %v6819_v61 = vrot.slane %v12007_v3, %v11691_v41  ;;  %v6744_v58 = vsel %vm6743_vm3, %v6742_v24, %v12051_v5  ;;  %v9125_v3 = vld [vmem:[%s12843_s0 + $0x40] sm:$0xff]  ;;  %v6547_v24 = vpop.permute.xlu1 %6546 }
 0x2e9   :  { %v8184_v35 = vadd.f32 %v8183_v4, %v8182_v17  ;;  %v6805_v34 = vsel %vm6715_vm14, %v6804_v31, %v6800_v29  ;;  %v7991_v54 = vsub.f32 %v12959_v10, %v9124_v46  ;;  %v7990_v1 = vsub.f32 %v12960_v38, %v9125_v3  ;;  %v12961_v31 = vld [vmem:[#allocation38_spill] sm:$0xff] }
 0x2ea   :  { %v8185_v30 = vsel %vm105_vm0, %v8116_v55, 0.0  ;;  %v6810_v6 = vsel %vm6722_vm15, %v6809_v59, %v6805_v34  ;;  %v6824_v5 = vrot.slane %v6541_v2, %v12056_v0  ;;  %v12154_v4 = vpop.f32.mrb[26].mxu1  ;;  %vm6750_vm4 = vcmask 1048512   ;;  %v6553_v59 = vpop.permute.xlu0 %6552  ;;  %v9127_v10 = vld [vmem:[%s12843_s0 + $0x50] sm:$0xff] }
 0x2eb   :  { %v8186_v50 = vadd.f32 %v8185_v30, %v8184_v35  ;;  %v6815_v23 = vsel %vm6729_vm1, %v6814_v63, %v6810_v6  ;;  %v8119_v16 = vmul.f32 %v7991_v54, %v7991_v54  ;;  %7628 = vst.msk [vmem:[%s12848_s5 + $0x108] sm:$0xff] %vm105_vm0, %v12154_v4  ;;  %v12162_v21 = vpop.f32.mrb[27].mxu1  ;;  %v8187_v52 = vsel %vm105_vm0, %v8117_v15, 0.0  ;;  %v9126_v63 = vld [vmem:[%s12843_s0 + $0x58] sm:$0xff]  ;;  %v12964_v54 = vld [vmem:[#allocation24_spill] sm:$0xff] }
 0x2ec   :  { %v6820_v2 = vsel %vm6736_vm2, %v6819_v61, %v6815_v23  ;;  %v8118_v25 = vmul.f32 %v7990_v1, %v7990_v1  ;;  %v6829_v53 = vrot.slane %v12040_v8, %v11779_v28  ;;  %7627 = vst.msk [vmem:[%s12848_s5 + $0x100] sm:$0xff] %vm105_vm0, %v12162_v21  ;;  %v12962_v17 = vrot.slane %v12961_v31, %v11779_v28  ;;  %v12963_v61 = vld [vmem:[#allocation23_spill] sm:$0xff] }
 0x2ed   :  { %v8188_v27 = vadd.f32 %v8187_v52, %v8186_v50  ;;  %v6825_v44 = vsel %vm6743_vm3, %v6824_v5, %v6820_v2  ;;  %v6834_v15 = vrot.slane %v6547_v24, %v11503_v33  ;;  %v6838_v55 = vrot.slane %v12101_v13, %v11585_v51  ;;  %v9128_v24 = vld [vmem:[%s12843_s0 + $0x68] sm:$0xff]  ;;  %v12966_v52 = vld [vmem:[#allocation26_spill] sm:$0xff] }
 0x2ee   :  { %v12178_v32 = vsel %vm6750_vm4, %v12962_v17, %v6744_v58  ;;  %v8189_v8 = vsel %vm105_vm0, %v8118_v25, 0.0  ;;  %v12183_v29 = vsel %vm6750_vm4, %v6829_v53, %v6825_v44  ;;  %v7993_v35 = vsub.f32 %v12963_v61, %v9126_v63  ;;  %v12965_v50 = vld [vmem:[#allocation25_spill] sm:$0xff]  ;;  %v9130_v17 = vld [vmem:[%s12843_s0 + $0x78] sm:$0xff] }
 0x2ef   :  { %v8191_v58 = vsel %vm105_vm0, %v8119_v16, 0.0  ;;  %v8190_v34 = vadd.f32 %v8189_v8, %v8188_v27  ;;  %v6989_v46 = vcombine.low %v12178_v32, %v12183_v29  ;;  %v7992_v30 = vsub.f32 %v12964_v54, %v9127_v10  ;;  %v9129_v16 = vld [vmem:[%s12843_s0 + $0x60] sm:$0xff]  ;;  %v9131_v8 = vld [vmem:[%s12843_s0 + $0x70] sm:$0xff] }
 0x2f0   :  { %v6839_v13 = vsel %vm6652_vm5, %v6838_v55, %v6834_v15  ;;  %v8121_v6 = vmul.f32 %v7993_v35, %v7993_v35  ;;  %v6848_v3 = vrot.slane %v6556_v20, %v11647_v48  ;;  %v6843_v38 = vrot.slane %v6553_v59, %v12951_v14  ;;  %v12967_v15 = vld [vmem:[#allocation27_spill] sm:$0xff]  ;;  %v12968_v55 = vld [vmem:[#allocation28_spill] sm:$0xff] }
 0x2f1   :  { %v8120_v1 = vmul.f32 %v7992_v30, %v7992_v30  ;;  %v8192_v5 = vadd.f32 %v8191_v58, %v8190_v34  ;;  %v7995_v23 = vsub.f32 %v12965_v50, %v9128_v24  ;;  %v7994_v2 = vsub.f32 %v12966_v52, %v9129_v16  ;;  %v9132_v54 = vld [vmem:[%s12843_s0 + $0x80] sm:$0xff]  ;;  %v12969_v30 = vld [vmem:[#allocation30_spill] sm:$0xff]  ;;  %v9133_v24 = vld [vmem:[%s12843_s0 + $0x88] sm:$0xff] }
 0x2f2   :  { %v6844_v25 = vsel %vm6659_vm6, %v6843_v38, %v6839_v13  ;;  %v7997_v59 = vsub.f32 %v12967_v15, %v9130_v17  ;;  %v7996_v63 = vsub.f32 %v12968_v55, %v9131_v8  ;;  %v8195_v61 = vsel %vm105_vm0, %v8121_v6, 0.0  ;;  %v12970_v50 = vld [vmem:[#allocation29_spill] sm:$0xff]  ;;  %v9134_v52 = vld [vmem:[%s12843_s0 + $0x90] sm:$0xff]  ;;  %v12972_v17 = vld [vmem:[#allocation31_spill] sm:$0xff] }
 0x2f3   :  { %v8193_v20 = vsel %vm105_vm0, %v8120_v1, 0.0  ;;  %v8122_v53 = vmul.f32 %v7994_v2, %v7994_v2  ;;  %v12212_v27 = vsel %vm6666_vm7, %v6848_v3, %v6844_v25  ;;  %v8123_v31 = vmul.f32 %v7995_v23, %v7995_v23  ;;  %v12971_v2 = vld [vmem:[#allocation33_spill] sm:$0xff] }
 0x2f4   :  { %v8194_v44 = vadd.f32 %v8193_v20, %v8192_v5  ;;  %v8124_v34 = vmul.f32 %v7996_v63, %v7996_v63  ;;  %v7998_v13 = vsub.f32 %v12969_v30, %v9132_v54  ;;  %v8125_v1 = vmul.f32 %v7997_v59, %v7997_v59  ;;  %v9136_v63 = vld [vmem:[%s12843_s0 + $0xa0] sm:$0xff]  ;;  %v9137_v30 = vld [vmem:[%s12843_s0 + $0xa8] sm:$0xff] }
 0x2f5   :  { %v8197_v35 = vsel %vm105_vm0, %v8122_v53, 0.0  ;;  %v8199_v6 = vsel %vm105_vm0, %v8123_v31, 0.0  ;;  %v7999_v23 = vsub.f32 %v12970_v50, %v9133_v24  ;;  %v8000_v25 = vsub.f32 %v12971_v2, %v9134_v52  ;;  %v9135_v31 = vld [vmem:[%s12843_s0 + $0x98] sm:$0xff]  ;;  %v9138_v24 = vld [vmem:[%s12843_s0 + $0xb0] sm:$0xff]  ;;  %v12975_v50 = vld [vmem:[#allocation40_spill] sm:$0xff] }
 0x2f6   :  { %v8196_v58 = vadd.f32 %v8195_v61, %v8194_v44  ;;  %v12224_v10 = vpop.f32.mrb[28].mxu1  ;;  %v8201_v5 = vsel %vm105_vm0, %v8124_v34, 0.0  ;;  %v8126_v16 = vmul.f32 %v7998_v13, %v7998_v13  ;;  %v8203_v53 = vsel %vm105_vm0, %v8125_v1, 0.0  ;;  %v12973_v61 = vld [vmem:[#allocation36_spill] sm:$0xff]  ;;  %v12974_v13 = vld [vmem:[#allocation35_spill] sm:$0xff] }
 0x2f7   :  { %7630 = vst.msk [vmem:[%s12848_s5 + $0x118] sm:$0xff] %vm105_vm0, %v12224_v10  ;;  %v12235_v3 = vpop.f32.mrb[29].mxu1  ;;  %v8001_v15 = vsub.f32 %v12972_v17, %v9135_v31  ;;  %v8127_v59 = vmul.f32 %v7999_v23, %v7999_v23  ;;  %v8128_v55 = vmul.f32 %v8000_v25, %v8000_v25  ;;  %v8004_v23 = vsub.f32 %v12975_v50, %v9138_v24 }
 0x2f8   :  { %v8198_v38 = vadd.f32 %v8197_v35, %v8196_v58  ;;  %7629 = vst.msk [vmem:[%s12848_s5 + $0x110] sm:$0xff] %vm105_vm0, %v12235_v3  ;;  %v8205_v8 = vsel %vm105_vm0, %v8126_v16, 0.0  ;;  %v8002_v35 = vsub.f32 %v12973_v61, %v9136_v63 }
 0x2f9   :  { %v8129_v54 = vmul.f32 %v8001_v15, %v8001_v15  ;;  %v8209_v1 = vsel %vm105_vm0, %v8128_v55, 0.0  ;;  %v12977_v55 = vld [vmem:[#allocation44_spill] sm:$0xff] }
 0x2fa   :  { %v8200_v20 = vadd.f32 %v8199_v6, %v8198_v38  ;;  %v8003_v6 = vsub.f32 %v12974_v13, %v9137_v30  ;;  %v8207_v38 = vsel %vm105_vm0, %v8127_v59, 0.0  ;;  %v8132_v59 = vmul.f32 %v8004_v23, %v8004_v23 }
 0x2fb   :  { %v8211_v25 = vsel %vm105_vm0, %v8129_v54, 0.0  ;;  %v12978_v54 = vld [vmem:[#allocation43_spill] sm:$0xff] }
 0x2fc   :  { %v8202_v44 = vadd.f32 %v8201_v5, %v8200_v20  ;;  %v8130_v5 = vmul.f32 %v8002_v35, %v8002_v35  ;;  %v8131_v17 = vmul.f32 %v8003_v6, %v8003_v6  ;;  %v8217_v6 = vsel %vm105_vm0, %v8132_v59, 0.0 }
 0x2fe   :  { %v8204_v58 = vadd.f32 %v8203_v53, %v8202_v44  ;;  %v9139_v53 = vld [vmem:[%s12843_s0 + $0xb8] sm:$0xff]  ;;  %v8213_v15 = vsel %vm105_vm0, %v8130_v5, 0.0  ;;  %v8215_v13 = vsel %vm105_vm0, %v8131_v17, 0.0  ;;  %v12979_v5 = vld [vmem:[#allocation46_spill] sm:$0xff] }
 0x2ff   :  { %v12976_v44 = vld [vmem:[#allocation39_spill] sm:$0xff] }
 0x300   :  { %v8206_v34 = vadd.f32 %v8205_v8, %v8204_v58  ;;  %v8005_v31 = vsub.f32 %v12976_v44, %v9139_v53  ;;  %v9140_v8 = vld [vmem:[%s12843_s0 + $0xc0] sm:$0xff] }
 0x301   :  { %v8006_v63 = vsub.f32 %v12977_v55, %v9140_v8 }
 0x302   :  { %v8208_v16 = vadd.f32 %v8207_v38, %v8206_v34  ;;  %v12272_v52 = vpop.f32.mrb[30].mxu1  ;;  %v8133_v58 = vmul.f32 %v8005_v31, %v8005_v31  ;;  %v9141_v34 = vld [vmem:[%s12843_s0 + $0xc8] sm:$0xff] }
 0x303   :  { %7632 = vst.msk [vmem:[%s12848_s5 + $0x128] sm:$0xff] %vm105_vm0, %v12272_v52  ;;  %v12279_v2 = vpop.f32.mrb[31].mxu1  ;;  %v8007_v30 = vsub.f32 %v12978_v54, %v9141_v34  ;;  %v8134_v38 = vmul.f32 %v8006_v63, %v8006_v63  ;;  %v9145_v34 = vld [vmem:[%s12843_s0 + $0xe8] sm:$0xff] }
 0x304   :  { %v8210_v20 = vadd.f32 %v8209_v1, %v8208_v16  ;;  %7631 = vst.msk [vmem:[%s12848_s5 + $0x120] sm:$0xff] %vm105_vm0, %v12279_v2  ;;  %v9142_v1 = vld [vmem:[%s12843_s0 + $0xd0] sm:$0xff]  ;;  %v8219_v44 = vsel %vm105_vm0, %v8133_v58, 0.0  ;;  %v8011_v54 = vsub.f32 %v11984_v12, %v9145_v34 }
 0x305   :  { %v8008_v24 = vsub.f32 %v12979_v5, %v9142_v1  ;;  %v8135_v16 = vmul.f32 %v8007_v30, %v8007_v30  ;;  %v8221_v31 = vsel %vm105_vm0, %v8134_v38, 0.0 }
 0x306   :  { %v8212_v61 = vadd.f32 %v8211_v25, %v8210_v20  ;;  %v9143_v25 = vld [vmem:[%s12843_s0 + $0xd8] sm:$0xff]  ;;  %v12980_v20 = vld [vmem:[#allocation45_spill] sm:$0xff] }
 0x307   :  { %v8009_v53 = vsub.f32 %v12980_v20, %v9143_v25  ;;  %v8136_v17 = vmul.f32 %v8008_v24, %v8008_v24  ;;  %v9147_v24 = vld [vmem:[%s12843_s0 + $0xf8] sm:$0xff]  ;;  %v9148_v25 = vld [vmem:[%s12843_s0 + $0x100] sm:$0xff] }
 0x308   :  { %v8214_v35 = vadd.f32 %v8213_v15, %v8212_v61  ;;  %v9144_v15 = vld [vmem:[%s12843_s0 + $0xe0] sm:$0xff]  ;;  %v8223_v61 = vsel %vm105_vm0, %v8135_v16, 0.0 }
 0x309   :  { %v8010_v59 = vsub.f32 %v11999_v18, %v9144_v15  ;;  %v8137_v58 = vmul.f32 %v8009_v53, %v8009_v53  ;;  %v8225_v18 = vsel %vm105_vm0, %v8136_v17, 0.0 }
 0x30a   :  { %v8216_v50 = vadd.f32 %v8215_v13, %v8214_v35  ;;  %v9146_v13 = vld [vmem:[%s12843_s0 + $0xf0] sm:$0xff] }
 0x30b   :  { %v8138_v30 = vmul.f32 %v8010_v59, %v8010_v59  ;;  %v8227_v1 = vsel %vm105_vm0, %v8137_v58, 0.0 }
 0x30c   :  { %v8218_v23 = vadd.f32 %v8217_v6, %v8216_v50  ;;  %v8012_v6 = vsub.f32 %v12084_v11, %v9146_v13  ;;  %v8013_v50 = vsub.f32 %v12070_v26, %v9147_v24  ;;  %v8014_v11 = vsub.f32 %v12162_v21, %v9148_v25  ;;  %v9154_v25 = vld [vmem:[%s12843_s0 + $0x130] sm:$0xff] }
 0x30d   :  { %v8229_v12 = vsel %vm105_vm0, %v8138_v30, 0.0 }
 0x30e   :  { %v8220_v8 = vadd.f32 %v8219_v44, %v8218_v23  ;;  %v12316_v55 = vpop.f32.mrb[32].mxu1  ;;  %v8139_v23 = vmul.f32 %v8011_v54, %v8011_v54  ;;  %v8140_v16 = vmul.f32 %v8012_v6, %v8012_v6  ;;  %v8141_v44 = vmul.f32 %v8013_v50, %v8013_v50  ;;  %v9152_v6 = vld [vmem:[%s12843_s0 + $0x120] sm:$0xff]  ;;  %v9153_v50 = vld [vmem:[%s12843_s0 + $0x128] sm:$0xff] }
 0x30f   :  { %7634 = vst.msk [vmem:[%s12848_s5 + $0x138] sm:$0xff] %vm105_vm0, %v12316_v55  ;;  %v7466_v63 = vpop.f32.mrb[33].mxu1  ;;  %v8142_v59 = vmul.f32 %v8014_v11, %v8014_v11 }
 0x310   :  { %v8222_v35 = vadd.f32 %v8221_v31, %v8220_v8  ;;  %7633 = vst.msk [vmem:[%s12848_s5 + $0x130] sm:$0xff] %vm105_vm0, %v7466_v63  ;;  %v9149_v31 = vld [vmem:[%s12843_s0 + $0x108] sm:$0xff]  ;;  %v8231_v26 = vsel %vm105_vm0, %v8139_v23, 0.0  ;;  %v8233_v15 = vsel %vm105_vm0, %v8140_v16, 0.0  ;;  %v9150_v8 = vld [vmem:[%s12843_s0 + $0x110] sm:$0xff]  ;;  %v8019_v23 = vsub.f32 %v12272_v52, %v9153_v50  ;;  %v9155_v52 = vld [vmem:[%s12843_s0 + $0x138] sm:$0xff] }
 0x311   :  { %v8015_v17 = vsub.f32 %v12154_v4, %v9149_v31  ;;  %v8016_v21 = vsub.f32 %v12235_v3, %v9150_v8  ;;  %v8235_v4 = vsel %vm105_vm0, %v8141_v44, 0.0  ;;  %v8237_v54 = vsel %vm105_vm0, %v8142_v59, 0.0  ;;  %v9151_v3 = vld [vmem:[%s12843_s0 + $0x118] sm:$0xff]  ;;  %v9156_v59 = vld [vmem:[%s12843_s0 + $0x140] sm:$0xff] }
 0x312   :  { %v8224_v38 = vadd.f32 %v8223_v61, %v8222_v35  ;;  %v8017_v30 = vsub.f32 %v12224_v10, %v9151_v3  ;;  %v8020_v11 = vsub.f32 %v7466_v63, %v9154_v25  ;;  %v8147_v31 = vmul.f32 %v8019_v23, %v8019_v23 }
 0x313   :  { %v8143_v34 = vmul.f32 %v8015_v17, %v8015_v17  ;;  %v8144_v13 = vmul.f32 %v8016_v21, %v8016_v21  ;;  %v8021_v17 = vsub.f32 %v12316_v55, %v9155_v52 }
 0x314   :  { %v8226_v5 = vadd.f32 %v8225_v18, %v8224_v38  ;;  %v8018_v38 = vsub.f32 %v12279_v2, %v9152_v6 }
 0x315   :  { %v8241_v10 = vsel %vm105_vm0, %v8144_v13, 0.0  ;;  %v8149_v55 = vmul.f32 %v8021_v17, %v8021_v17  ;;  %v9158_v13 = vld [vmem:[%s12843_s0 + $0x150] sm:$0xff] }
 0x316   :  { %v8228_v20 = vadd.f32 %v8227_v1, %v8226_v5  ;;  %v8239_v5 = vsel %vm105_vm0, %v8143_v34, 0.0  ;;  %v8146_v16 = vmul.f32 %v8018_v38, %v8018_v38 }
 0x318   :  { %v8230_v53 = vadd.f32 %v8229_v12, %v8228_v20  ;;  %v8145_v12 = vmul.f32 %v8017_v30, %v8017_v30 }
 0x31a   :  { %v8232_v61 = vadd.f32 %v8231_v26, %v8230_v53  ;;  %v9022_v35 = vpop.f32.mrb[34].mxu1  ;;  %v8243_v63 = vsel %vm105_vm0, %v8145_v12, 0.0  ;;  %v8245_v26 = vsel %vm105_vm0, %v8146_v16, 0.0 }
 0x31b   :  { %7636 = vst.msk [vmem:[%s12848_s5 + $0x148] sm:$0xff] %vm105_vm0, %v9022_v35  ;;  %v7476_v58 = vpop.f32.mrb[35].mxu1 }
 0x31c   :  { %v8234_v18 = vadd.f32 %v8233_v15, %v8232_v61  ;;  %7635 = vst.msk [vmem:[%s12848_s5 + $0x140] sm:$0xff] %vm105_vm0, %v7476_v58  ;;  %v8148_v15 = vmul.f32 %v8020_v11, %v8020_v11  ;;  %v8022_v8 = vsub.f32 %v7476_v58, %v9156_v59  ;;  %v8247_v61 = vsel %vm105_vm0, %v8147_v31, 0.0 }
 0x31e   :  { %v8236_v1 = vadd.f32 %v8235_v4, %v8234_v18  ;;  %v8249_v34 = vsel %vm105_vm0, %v8148_v15, 0.0  ;;  %v8150_v30 = vmul.f32 %v8022_v8, %v8022_v8  ;;  %v9162_v15 = vld [vmem:[%s12843_s0 + $0x170] sm:$0xff] }
 0x320   :  { %v8238_v24 = vadd.f32 %v8237_v54, %v8236_v1  ;;  %v9157_v54 = vld [vmem:[%s12843_s0 + $0x148] sm:$0xff]  ;;  %v8253_v23 = vsel %vm105_vm0, %v8150_v30, 0.0 }
 0x321   :  { %v8023_v3 = vsub.f32 %v9022_v35, %v9157_v54  ;;  %v8251_v35 = vsel %vm105_vm0, %v8149_v55, 0.0  ;;  %v9163_v55 = vld [vmem:[%s12843_s0 + $0x178] sm:$0xff] }
 0x322   :  { %v8240_v2 = vadd.f32 %v8239_v5, %v8238_v24  ;;  %v9025_v20 = vpop.f32.mrb[36].mxu1  ;;  %v9159_v5 = vld [vmem:[%s12843_s0 + $0x158] sm:$0xff] }
 0x323   :  { %7638 = vst.msk [vmem:[%s12848_s5 + $0x158] sm:$0xff] %vm105_vm0, %v9025_v20  ;;  %v7486_v53 = vpop.f32.mrb[37].mxu1  ;;  %v8025_v24 = vsub.f32 %v9025_v20, %v9159_v5  ;;  %v8151_v50 = vmul.f32 %v8023_v3, %v8023_v3  ;;  %v9161_v20 = vld [vmem:[%s12843_s0 + $0x168] sm:$0xff] }
 0x324   :  { %v8242_v44 = vadd.f32 %v8241_v10, %v8240_v2  ;;  %7637 = vst.msk [vmem:[%s12848_s5 + $0x150] sm:$0xff] %vm105_vm0, %v7486_v53  ;;  %v8024_v6 = vsub.f32 %v7486_v53, %v9158_v13  ;;  %v9160_v10 = vld [vmem:[%s12843_s0 + $0x160] sm:$0xff]  ;;  %v9165_v5 = vld [vmem:[%s12843_s0 + $0x188] sm:$0xff] }
 0x325   :  { %v8153_v2 = vmul.f32 %v8025_v24, %v8025_v24 }
 0x326   :  { %v8244_v21 = vadd.f32 %v8243_v63, %v8242_v44  ;;  %v8152_v12 = vmul.f32 %v8024_v6, %v8024_v6  ;;  %v8255_v44 = vsel %vm105_vm0, %v8151_v50, 0.0  ;;  %v9164_v6 = vld [vmem:[%s12843_s0 + $0x180] sm:$0xff] }
 0x327   :  { %v8259_v8 = vsel %vm105_vm0, %v8153_v2, 0.0 }
 0x328   :  { %v8246_v4 = vadd.f32 %v8245_v26, %v8244_v21  ;;  %v9028_v18 = vpop.f32.mrb[38].mxu1  ;;  %v8257_v31 = vsel %vm105_vm0, %v8152_v12, 0.0 }
 0x329   :  { %7640 = vst.msk [vmem:[%s12848_s5 + $0x168] sm:$0xff] %vm105_vm0, %v9028_v18  ;;  %v7496_v58 = vpop.f32.mrb[39].mxu1  ;;  %v8027_v52 = vsub.f32 %v9028_v18, %v9161_v20  ;;  %v9167_v20 = vld [vmem:[%s12843_s0 + $0x190] sm:$0xff] }
 0x32a   :  { %v8248_v38 = vadd.f32 %v8247_v61, %v8246_v4  ;;  %7639 = vst.msk [vmem:[%s12848_s5 + $0x160] sm:$0xff] %vm105_vm0, %v7496_v58  ;;  %v8026_v16 = vsub.f32 %v7496_v58, %v9160_v10 }
 0x32b   :  { %v8155_v61 = vmul.f32 %v8027_v52, %v8027_v52 }
 0x32c   :  { %v8250_v1 = vadd.f32 %v8249_v34, %v8248_v38  ;;  %v8154_v17 = vmul.f32 %v8026_v16, %v8026_v16 }
 0x32d   :  { %v8263_v38 = vsel %vm105_vm0, %v8155_v61, 0.0 }
 0x32e   :  { %v8252_v25 = vadd.f32 %v8251_v35, %v8250_v1  ;;  %v8261_v4 = vsel %vm105_vm0, %v8154_v17, 0.0 }
 0x32f   :  { %v9031_v53 = vpop.f32.mrb[40].mxu1 }
 0x330   :  { %v8254_v11 = vadd.f32 %v8253_v23, %v8252_v25  ;;  %7642 = vst.msk [vmem:[%s12848_s5 + $0x178] sm:$0xff] %vm105_vm0, %v9031_v53  ;;  %v7506_v63 = vpop.f32.mrb[41].mxu1  ;;  %v8029_v18 = vsub.f32 %v9031_v53, %v9163_v55  ;;  %v9166_v53 = vld [vmem:[%s12843_s0 + $0x198] sm:$0xff] }
 0x331   :  { %7641 = vst.msk [vmem:[%s12848_s5 + $0x170] sm:$0xff] %vm105_vm0, %v7506_v63  ;;  %v8028_v59 = vsub.f32 %v7506_v63, %v9162_v15  ;;  %v12981_v63 = vld [vmem:[#allocation32_spill] sm:$0xff] }
 0x332   :  { %v8256_v26 = vadd.f32 %v8255_v44, %v8254_v11  ;;  %v8157_v35 = vmul.f32 %v8029_v18, %v8029_v18 }
 0x333   :  { %v8156_v34 = vmul.f32 %v8028_v59, %v8028_v59 }
 0x334   :  { %v8258_v21 = vadd.f32 %v8257_v31, %v8256_v26  ;;  %v8267_v10 = vsel %vm105_vm0, %v8157_v35, 0.0  ;;  %v8440_v26 = vrot.slane %v12981_v63, 4 }
 0x335   :  { %v8265_v1 = vsel %vm105_vm0, %v8156_v34, 0.0 }
 0x336   :  { %v8260_v54 = vadd.f32 %v8259_v8, %v8258_v21  ;;  %v9034_v3 = vpop.f32.mrb[42].mxu1  ;;  %v8441_v35 = vadd.f32 %v8440_v26, %v12981_v63  ;;  %v9172_v26 = vld [vmem:[%s12843_s0 + $0x1c8] sm:$0xff] }
 0x337   :  { %7644 = vst.msk [vmem:[%s12848_s5 + $0x188] sm:$0xff] %vm105_vm0, %v9034_v3  ;;  %v7516_v30 = vpop.f32.mrb[43].mxu1  ;;  %v8031_v24 = vsub.f32 %v9034_v3, %v9165_v5  ;;  %v9170_v5 = vld [vmem:[%s12843_s0 + $0x1b8] sm:$0xff] }
 0x338   :  { %v8262_v13 = vadd.f32 %v8261_v4, %v8260_v54  ;;  %7643 = vst.msk [vmem:[%s12848_s5 + $0x180] sm:$0xff] %vm105_vm0, %v7516_v30  ;;  %v8030_v58 = vsub.f32 %v7516_v30, %v9164_v6  ;;  %v9168_v4 = vld [vmem:[%s12843_s0 + $0x1a8] sm:$0xff]  ;;  %v9169_v54 = vld [vmem:[%s12843_s0 + $0x1a0] sm:$0xff] }
 0x339   :  { %v8159_v16 = vmul.f32 %v8031_v24, %v8031_v24 }
 0x33a   :  { %v8264_v50 = vadd.f32 %v8263_v38, %v8262_v13  ;;  %v8158_v23 = vmul.f32 %v8030_v58, %v8030_v58 }
 0x33b   :  { %v8271_v15 = vsel %vm105_vm0, %v8159_v16, 0.0 }
 0x33c   :  { %v8266_v12 = vadd.f32 %v8265_v1, %v8264_v50  ;;  %v8269_v25 = vsel %vm105_vm0, %v8158_v23, 0.0  ;;  %v9037_v11 = vpop.f32.mrb[44].mxu1 }
 0x33d   :  { %7646 = vst.msk [vmem:[%s12848_s5 + $0x198] sm:$0xff] %vm105_vm0, %v9037_v11  ;;  %v8033_v44 = vsub.f32 %v9037_v11, %v9166_v53  ;;  %v7526_v31 = vpop.f32.mrb[45].mxu1  ;;  %v8442_v53 = vrot.slane %v8441_v35, 2 }
 0x33e   :  { %v8268_v2 = vadd.f32 %v8267_v10, %v8266_v12  ;;  %7645 = vst.msk [vmem:[%s12848_s5 + $0x190] sm:$0xff] %vm105_vm0, %v7526_v31  ;;  %v8032_v52 = vsub.f32 %v7526_v31, %v9167_v20  ;;  %v9171_v12 = vld [vmem:[%s12843_s0 + $0x1b0] sm:$0xff] }
 0x33f   :  { %v8161_v59 = vmul.f32 %v8033_v44, %v8033_v44  ;;  %v8443_v20 = vadd.f32 %v8442_v53, %v8441_v35 }
 0x340   :  { %v8270_v17 = vadd.f32 %v8269_v25, %v8268_v2  ;;  %v8160_v8 = vmul.f32 %v8032_v52, %v8032_v52  ;;  %v9040_v21 = vpop.f32.mrb[46].mxu1 }
 0x341   :  { %7648 = vst.msk [vmem:[%s12848_s5 + $0x1a8] sm:$0xff] %vm105_vm0, %v9040_v21  ;;  %v8035_v55 = vsub.f32 %v9040_v21, %v9168_v4  ;;  %v7536_v18 = vpop.f32.mrb[47].mxu1  ;;  %v8275_v13 = vsel %vm105_vm0, %v8161_v59, 0.0  ;;  %v9173_v21 = vld [vmem:[%s12843_s0 + $0x1c0] sm:$0xff] }
 0x342   :  { %v8272_v61 = vadd.f32 %v8271_v15, %v8270_v17  ;;  %v8273_v34 = vsel %vm105_vm0, %v8160_v8, 0.0  ;;  %7647 = vst.msk [vmem:[%s12848_s5 + $0x1a0] sm:$0xff] %vm105_vm0, %v7536_v18  ;;  %v8034_v3 = vsub.f32 %v7536_v18, %v9169_v54  ;;  %v8444_v8 = vrot.slane %v8443_v20, 1 }
 0x343   :  { %v8163_v6 = vmul.f32 %v8035_v55, %v8035_v55 }
 0x344   :  { %v8274_v30 = vadd.f32 %v8273_v34, %v8272_v61  ;;  %v8162_v58 = vmul.f32 %v8034_v3, %v8034_v3  ;;  %v8445_v55 = vadd.f32 %v8444_v8, %v8443_v20  ;;  %v9177_v20 = vld [vmem:[%s12843_s0 + $0x1e0] sm:$0xff]  ;;  %v12983_v8 = vld [vmem:[#allocation9_spill] sm:$0xff] }
 0x345   :  { %v9043_v38 = vpop.f32.mrb[48].mxu1  ;;  %v8279_v25 = vsel %vm105_vm0, %v8163_v6, 0.0 }
 0x346   :  { %v8276_v1 = vadd.f32 %v8275_v13, %v8274_v30  ;;  %7650 = vst.msk [vmem:[%s12848_s5 + $0x1b8] sm:$0xff] %vm105_vm0, %v9043_v38  ;;  %v8037_v24 = vsub.f32 %v9043_v38, %v9170_v5  ;;  %v7546_v50 = vpop.f32.mrb[49].mxu1  ;;  %v8277_v23 = vsel %vm105_vm0, %v8162_v58, 0.0  ;;  %8446 = vst [vmem:[#allocation6] sm:$0x1] %v8445_v55  ;;  %v9174_v58 = vld [vmem:[%s12843_s0 + $0x1d8] sm:$0xff] }
 0x347   :  { %7649 = vst.msk [vmem:[%s12848_s5 + $0x1b0] sm:$0xff] %vm105_vm0, %v7546_v50  ;;  %v8036_v10 = vsub.f32 %v7546_v50, %v9171_v12 }
 0x348   :  { %v8278_v16 = vadd.f32 %v8277_v23, %v8276_v1  ;;  %v8165_v11 = vmul.f32 %v8037_v24, %v8037_v24  ;;  %v9175_v1 = vld [vmem:[%s12843_s0 + $0x1d0] sm:$0xff] }
 0x349   :  { %v8164_v2 = vmul.f32 %v8036_v10, %v8036_v10 }
 0x34a   :  { %v8280_v44 = vadd.f32 %v8279_v25, %v8278_v16  ;;  %v8283_v63 = vsel %vm105_vm0, %v8165_v11, 0.0  ;;  %v9176_v11 = vld [vmem:[%s12843_s0 + $0x1e8] sm:$0xff] }
 0x34b   :  { %v8281_v31 = vsel %vm105_vm0, %v8164_v2, 0.0 }
 0x34c   :  { %v8282_v52 = vadd.f32 %v8281_v31, %v8280_v44  ;;  %v9046_v17 = vpop.f32.mrb[50].mxu1  ;;  %v12982_v44 = vld [vmem:[#allocation10_spill] sm:$0xff] }
 0x34d   :  { %7652 = vst.msk [vmem:[%s12848_s5 + $0x1c8] sm:$0xff] %vm105_vm0, %v9046_v17  ;;  %v8039_v15 = vsub.f32 %v9046_v17, %v9172_v26  ;;  %v7556_v59 = vpop.f32.mrb[51].mxu1  ;;  %v2580_v31 = vrot.slane %v12982_v44, %v9930_v37  ;;  %v2584_v17 = vrot.slane %v12982_v44, %v9933_v9  ;;  %v2592_v26 = vrot.slane %v12982_v44, %v9940_v62 }
 0x34e   :  { %7651 = vst.msk [vmem:[%s12848_s5 + $0x1c0] sm:$0xff] %vm105_vm0, %v7556_v59  ;;  %v8038_v61 = vsub.f32 %v7556_v59, %v9173_v21  ;;  %v8284_v4 = vadd.f32 %v8283_v63, %v8282_v52  ;;  %v2588_v63 = vrot.slane %v12982_v44, %v9937_v45  ;;  %v2600_v59 = vrot.slane %v12982_v44, %v9951_v7 }
 0x34f   :  { %v8167_v18 = vmul.f32 %v8039_v15, %v8039_v15  ;;  %v2596_v15 = vrot.slane %v12982_v44, %v9948_v19  ;;  %v2604_v21 = vrot.slane %v12982_v44, %v12983_v8 }
 0x350   :  { %v8166_v34 = vmul.f32 %v8038_v61, %v8038_v61  ;;  %v2608_v61 = vrot.slane %v12982_v44, %v9958_v42 }
 0x351   :  { %v8287_v30 = vsel %vm105_vm0, %v8167_v18, 0.0  ;;  %v12984_v18 = vld [vmem:[#allocation14_spill] sm:$0xff] }
 0x352   :  { %v8285_v54 = vsel %vm105_vm0, %v8166_v34, 0.0  ;;  %v2612_v34 = vrot.slane %v12984_v18, %v9930_v37 }
 0x353   :  { %v8286_v3 = vadd.f32 %v8285_v54, %v8284_v4  ;;  %v2616_v54 = vrot.slane %v12984_v18, %v9933_v9 }
 0x355   :  { %v8288_v13 = vadd.f32 %v8287_v30, %v8286_v3  ;;  %v2620_v3 = vrot.slane %v12984_v18, %v9937_v45  ;;  %v2624_v30 = vrot.slane %v12984_v18, %v9940_v62 }
 0x358   :  { %v9049_v6 = vpop.f32.mrb[52].mxu1 }
 0x359   :  { %7654 = vst.msk [vmem:[%s12848_s5 + $0x1d8] sm:$0xff] %vm105_vm0, %v9049_v6  ;;  %v8041_v38 = vsub.f32 %v9049_v6, %v9174_v58  ;;  %v7566_v35 = vpop.f32.mrb[53].mxu1  ;;  %v2632_v6 = vrot.slane %v12984_v18, %v9951_v7 }
 0x35a   :  { %7653 = vst.msk [vmem:[%s12848_s5 + $0x1d0] sm:$0xff] %vm105_vm0, %v7566_v35  ;;  %v8040_v5 = vsub.f32 %v7566_v35, %v9175_v1  ;;  %v2636_v35 = vrot.slane %v12984_v18, %v12983_v8  ;;  %v2640_v1 = vrot.slane %v12984_v18, %v9958_v42 }
 0x35b   :  { %v8169_v24 = vmul.f32 %v8041_v38, %v8041_v38 }
 0x35c   :  { %v8168_v50 = vmul.f32 %v8040_v5, %v8040_v5 }
 0x35d   :  { %v8291_v10 = vsel %vm105_vm0, %v8169_v24, 0.0  ;;  %v9178_v24 = vld [vmem:[%s12843_s0 + $0x1f8] sm:$0xff] }
 0x35e   :  { %v8289_v23 = vsel %vm105_vm0, %v8168_v50, 0.0 }
 0x35f   :  { %v8290_v12 = vadd.f32 %v8289_v23, %v8288_v13  ;;  %v2628_v13 = vrot.slane %v12984_v18, %v9948_v19 }
 0x360   :  { %v9052_v16 = vpop.f32.mrb[54].mxu1 }
 0x361   :  { %v8292_v25 = vadd.f32 %v8291_v10, %v8290_v12  ;;  %7656 = vst.msk [vmem:[%s12848_s5 + $0x1e8] sm:$0xff] %vm105_vm0, %v9052_v16  ;;  %v8043_v2 = vsub.f32 %v9052_v16, %v9176_v11  ;;  %v7576_v53 = vpop.f32.mrb[55].mxu1  ;;  %v5322_v12 = vcombine.low %v2580_v31, %v2584_v17  ;;  %v5323_v10 = vcombine.low %v2588_v63, %v2592_v26  ;;  %v12985_v26 = vld [vmem:[#allocation11_spill] sm:$0xff] }
 0x362   :  { %7655 = vst.msk [vmem:[%s12848_s5 + $0x1e0] sm:$0xff] %vm105_vm0, %v7576_v53  ;;  %v8042_v52 = vsub.f32 %v7576_v53, %v9177_v20  ;;  %v5325_v53 = vcombine.low %v2604_v21, %v2608_v61  ;;  %v5371_v20 = vcombine.low %v2612_v34, %v2616_v54  ;;  %v5374_v63 = vcombine.low %v2636_v35, %v2640_v1 }
 0x363   :  { %v8171_v4 = vmul.f32 %v8043_v2, %v8043_v2  ;;  %v5324_v2 = vcombine.low %v2596_v15, %v2600_v59  ;;  %v2648_v18 = vrot.slane %v12985_v26, %v9933_v9  ;;  %v2656_v15 = vrot.slane %v12985_v26, %v9940_v62 }
 0x364   :  { %v8170_v55 = vmul.f32 %v8042_v52, %v8042_v52  ;;  %v5372_v52 = vcombine.low %v2620_v3, %v2624_v30  ;;  %v2660_v59 = vrot.slane %v12985_v26, %v9948_v19  ;;  %v2664_v61 = vrot.slane %v12985_v26, %v9951_v7 }
 0x365   :  { %v8295_v16 = vsel %vm105_vm0, %v8171_v4, 0.0  ;;  %v2644_v4 = vrot.slane %v12985_v26, %v9930_v37  ;;  %v2668_v34 = vrot.slane %v12985_v26, %v12983_v8  ;;  %v2672_v54 = vrot.slane %v12985_v26, %v9958_v42 }
 0x366   :  { %v8293_v58 = vsel %vm105_vm0, %v8170_v55, 0.0  ;;  %v5373_v55 = vcombine.low %v2628_v13, %v2632_v6  ;;  %v5332_v30 = vrot.slane %v5322_v12, %v9964_v49  ;;  %v5339_v13 = vrot.slane %v5323_v10, %v9964_v49  ;;  %v12986_v10 = vld [vmem:[#allocation15_spill] sm:$0xff] }
 0x367   :  { %v9055_v38 = vpop.f32.mrb[56].mxu1  ;;  %v8294_v5 = vadd.f32 %v8293_v58, %v8292_v25  ;;  %v9179_v25 = vld [vmem:[%s12843_s0 + $0x1f0] sm:$0xff]  ;;  %v2652_v58 = vrot.slane %v12985_v26, %v9937_v45  ;;  %v5353_v35 = vrot.slane %v5325_v53, %v9964_v49  ;;  %v5381_v1 = vrot.slane %v5371_v20, %v9964_v49  ;;  %s9254_s0 = smov [#allocation2]  }
 0x368   :  { %7658 = vst.msk [vmem:[%s12848_s5 + $0x1f8] sm:$0xff] %vm105_vm0, %v9055_v38  ;;  %v8045_v50 = vsub.f32 %v9055_v38, %v9178_v24  ;;  %v7586_v23 = vpop.f32.mrb[57].mxu1  ;;  %v5346_v38 = vrot.slane %v5324_v2, %v9964_v49  ;;  %v5388_v24 = vrot.slane %v5372_v52, %v9964_v49  ;;  %v5422_v12 = vcombine.low %v2660_v59, %v2664_v61 }
 0x369   :  { %7657 = vst.msk [vmem:[%s12848_s5 + $0x1f0] sm:$0xff] %vm105_vm0, %v7586_v23  ;;  %v8044_v11 = vsub.f32 %v7586_v23, %v9179_v25  ;;  %v8296_v44 = vadd.f32 %v8295_v16, %v8294_v5  ;;  %v5402_v23 = vrot.slane %v5374_v63, %v9964_v49  ;;  %v5420_v16 = vcombine.low %v2644_v4, %v2648_v18  ;;  %s8453_s5 = sshll.u32 %s9254_s0, 4  ;;  %s8454_s5 = int_to_ptr.vmem [resolvable:$true] %s8453_s5 }
 0x36a   :  { %v8173_v31 = vmul.f32 %v8045_v50, %v8045_v50  ;;  %v5395_v50 = vrot.slane %v5373_v55, %v9964_v49  ;;  %v5421_v25 = vcombine.low %v2652_v58, %v2656_v15  ;;  %v2680_v2 = vrot.slane %v12986_v10, %v9933_v9  ;;  %s9180_s18 = scalar_lea.vmem %s8454_s5, 64  ;;  %p9185_p1 = scmp.lt.s32.totalorder %s8454_s5, %s8454_s5 }
 0x36b   :  { %v8172_v17 = vmul.f32 %v8044_v11, %v8044_v11  ;;  %v5423_v11 = vcombine.low %v2668_v34, %v2672_v54  ;;  %v2684_v53 = vrot.slane %v12986_v10, %v9937_v45  ;;  %v2688_v20 = vrot.slane %v12986_v10, %v9940_v62  ;;  %p9181_p0 = scmp.ne.s32.totalorder %s8454_s5, %s9180_s18  ;;  %p9186_p2 = scmp.lt.s32.totalorder %s9180_s18, %s9180_s18 }
 0x36c   :  { %v8299_v6 = vsel %vm105_vm0, %v8173_v31, 0.0  ;;  %v2692_v52 = vrot.slane %v12986_v10, %v9948_v19  ;;  %v2696_v55 = vrot.slane %v12986_v10, %v9951_v7  ;;  %v2700_v31 = vrot.slane %v12986_v10, %v12983_v8 }
 0x36d   :  { %v8297_v21 = vsel %vm105_vm0, %v8172_v17, 0.0  ;;  %v2704_v17 = vrot.slane %v12986_v10, %v9958_v42  ;;  %v5354_v63 = vcombine.low %v5332_v30, %v5339_v13  ;;  %v5355_v26 = vcombine.low %v5346_v38, %v5353_v35  ;;  %p9187_p3 = por %p9186_p2, %p9185_p1 }
 0x36e   :  { %v8298_v3 = vadd.f32 %v8297_v21, %v8296_v44  ;;  %v2676_v44 = vrot.slane %v12986_v10, %v9930_v37  ;;  %v5403_v4 = vcombine.low %v5381_v1, %v5388_v24  ;;  %v5404_v18 = vcombine.low %v5395_v50, %v5402_v23 }
 0x36f   :  { %v5430_v58 = vrot.slane %v5420_v16, %v9964_v49  ;;  %v5437_v15 = vrot.slane %v5421_v25, %v9964_v49  ;;  %v5444_v59 = vrot.slane %v5422_v12, %v9964_v49  ;;  %v5451_v21 = vrot.slane %v5423_v11, %v9964_v49  ;;  %p9188_p4 = pnand %p9187_p3, %p9181_p0 }
 0x370   :  { %v8300_v5 = vadd.f32 %v8299_v6, %v8298_v3  ;;  %v5469_v61 = vcombine.low %v2676_v44, %v2680_v2  ;;  %v5470_v34 = vcombine.low %v2684_v53, %v2688_v20  ;;  %v5471_v54 = vcombine.low %v2692_v52, %v2696_v55  ;;  %v12987_v6 = vld [vmem:[#allocation12_spill] sm:$0xff] }
 0x371   :  { %v5472_v3 = vcombine.low %v2700_v31, %v2704_v17  ;;  %v2712_v30 = vrot.slane %v12987_v6, %v9933_v9  ;;  %v2716_v13 = vrot.slane %v12987_v6, %v9937_v45  ;;  %v2720_v38 = vrot.slane %v12987_v6, %v9940_v62 }
 0x372   :  { %8301 = vadd.xlane.f32.xlu1 %v8300_v5  ;;  %v2708_v5 = vrot.slane %v12987_v6, %v9930_v37  ;;  %v2724_v35 = vrot.slane %v12987_v6, %v9948_v19  ;;  %v2728_v1 = vrot.slane %v12987_v6, %v9951_v7  ;;  %v2732_v24 = vrot.slane %v12987_v6, %v12983_v8 }
 0x373   :  { %v2736_v50 = vrot.slane %v12987_v6, %v9958_v42  ;;  %v5362_v23 = vrot.slane %v5354_v63, %v9964_v49  ;;  %v5369_v16 = vrot.slane %v5355_v26, %v9964_v49  ;;  %v5411_v25 = vrot.slane %v5403_v4, %v9964_v49  ;;  %v12988_v63 = vld [vmem:[#allocation16_spill] sm:$0xff] }
 0x374   :  { %v5418_v12 = vrot.slane %v5404_v18, %v9964_v49  ;;  %v5452_v11 = vcombine.low %v5430_v58, %v5437_v15  ;;  %v5453_v10 = vcombine.low %v5444_v59, %v5451_v21  ;;  %v5479_v44 = vrot.slane %v5469_v61, %v9964_v49 }
 0x375   :  { %v5486_v2 = vrot.slane %v5470_v34, %v9964_v49  ;;  %v5493_v53 = vrot.slane %v5471_v54, %v9964_v49  ;;  %v5500_v20 = vrot.slane %v5472_v3, %v9964_v49  ;;  %v5518_v52 = vcombine.low %v2708_v5, %v2712_v30 }
 0x376   :  { %v5519_v55 = vcombine.low %v2716_v13, %v2720_v38  ;;  %v5520_v31 = vcombine.low %v2724_v35, %v2728_v1  ;;  %v5521_v17 = vcombine.low %v2732_v24, %v2736_v50  ;;  %v2740_v26 = vrot.slane %v12988_v63, %v9930_v37 }
 0x377   :  { %v2744_v4 = vrot.slane %v12988_v63, %v9933_v9  ;;  %v2748_v18 = vrot.slane %v12988_v63, %v9937_v45  ;;  %v2752_v58 = vrot.slane %v12988_v63, %v9940_v62  ;;  %v2756_v15 = vrot.slane %v12988_v63, %v9948_v19 }
 0x378   :  { %v2760_v59 = vrot.slane %v12988_v63, %v9951_v7  ;;  %v2764_v21 = vrot.slane %v12988_v63, %v12983_v8  ;;  %v2768_v61 = vrot.slane %v12988_v63, %v9958_v42  ;;  %v5370_v34 = vcombine.low %v5362_v23, %v5369_v16  ;;  %v12989_v16 = vld [vmem:[#allocation13_spill] sm:$0xff] }
 0x379   :  { %v5419_v54 = vcombine.low %v5411_v25, %v5418_v12  ;;  %v5460_v3 = vrot.slane %v5452_v11, %v9964_v49  ;;  %v5467_v6 = vrot.slane %v5453_v10, %v9964_v49  ;;  %v5501_v5 = vcombine.low %v5479_v44, %v5486_v2 }
 0x37a   :  { %v5502_v30 = vcombine.low %v5493_v53, %v5500_v20  ;;  %v5528_v13 = vrot.slane %v5518_v52, %v9964_v49  ;;  %v5535_v38 = vrot.slane %v5519_v55, %v9964_v49  ;;  %v5542_v35 = vrot.slane %v5520_v31, %v9964_v49 }
 0x37b   :  { %v5549_v1 = vrot.slane %v5521_v17, %v9964_v49  ;;  %v5567_v24 = vcombine.low %v2740_v26, %v2744_v4  ;;  %v5568_v50 = vcombine.low %v2748_v18, %v2752_v58  ;;  %v5569_v63 = vcombine.low %v2756_v15, %v2760_v59 }
 0x37c   :  { %v5570_v23 = vcombine.low %v2764_v21, %v2768_v61  ;;  %v2772_v25 = vrot.slane %v12989_v16, %v9930_v37  ;;  %v2776_v12 = vrot.slane %v12989_v16, %v9933_v9  ;;  %v2780_v11 = vrot.slane %v12989_v16, %v9937_v45 }
 0x37d   :  { %v2784_v10 = vrot.slane %v12989_v16, %v9940_v62  ;;  %v2788_v44 = vrot.slane %v12989_v16, %v9948_v19  ;;  %v2792_v2 = vrot.slane %v12989_v16, %v9951_v7  ;;  %v2796_v53 = vrot.slane %v12989_v16, %v12983_v8 }
 0x37e   :  { %v2800_v37 = vrot.slane %v12989_v16, %v9958_v42  ;;  %v5468_v20 = vcombine.low %v5460_v3, %v5467_v6  ;;  %v5509_v9 = vrot.slane %v5501_v5, %v9964_v49  ;;  %v5516_v45 = vrot.slane %v5502_v30, %v9964_v49 }
 0x37f   :  { %v5550_v52 = vcombine.low %v5528_v13, %v5535_v38  ;;  %v5551_v62 = vcombine.low %v5542_v35, %v5549_v1  ;;  %v5577_v55 = vrot.slane %v5567_v24, %v9964_v49  ;;  %v5584_v19 = vrot.slane %v5568_v50, %v9964_v49  ;;  %v6562_v50 = vpop.permute.xlu0 %6561 }
 0x380   :  { %v5591_v7 = vrot.slane %v5569_v63, %v9964_v49  ;;  %v5598_v31 = vrot.slane %v5570_v23, %v9964_v49  ;;  %v5616_v8 = vcombine.low %v2772_v25, %v2776_v12  ;;  %v5617_v17 = vcombine.low %v2780_v11, %v2784_v10 }
 0x381   :  { %v5618_v26 = vcombine.low %v2788_v44, %v2792_v2  ;;  %v5619_v42 = vcombine.low %v2796_v53, %v2800_v37  ;;  %v5517_v4 = vcombine.low %v5509_v9, %v5516_v45  ;;  %v5558_v18 = vrot.slane %v5550_v52, %v9964_v49  ;;  %v6571_v9 = vpop.permute.xlu1 %6570 }
 0x382   :  { %v5565_v58 = vrot.slane %v5551_v62, %v9964_v49  ;;  %v5599_v15 = vcombine.low %v5577_v55, %v5584_v19  ;;  %v5600_v59 = vcombine.low %v5591_v7, %v5598_v31  ;;  %v5626_v21 = vrot.slane %v5616_v8, %v9964_v49 }
 0x383   :  { %6573 = vperm.xlu1 %9113, %v5370_v34   ;;  %v5633_v61 = vrot.slane %v5617_v17, %v9964_v49  ;;  %v5640_v34 = vrot.slane %v5618_v26, %v9964_v49  ;;  %v6559_v63 = vpop.permute.xlu0 %6558 }
 0x384   :  { %v5566_v3 = vcombine.low %v5558_v18, %v5565_v58  ;;  %v5607_v6 = vrot.slane %v5599_v15, %v9964_v49  ;;  %v5614_v5 = vrot.slane %v5600_v59, %v9964_v49  ;;  %v6853_v59 = vrot.slane %v6559_v63, %v12952_v39 }
 0x385   :  { %v5648_v30 = vcombine.low %v5626_v21, %v5633_v61  ;;  %v6610_v52 = vpop.permute.xlu1 %6609 }
 0x386   :  { %v5615_v38 = vcombine.low %v5607_v6, %v5614_v5  ;;  %v6858_v5 = vrot.slane %v6562_v50, %v11731_v22 }
 0x387   :  { %6576 = vperm.xlu1 %9113, %v5419_v54   ;;  %v5647_v54 = vrot.slane %v5619_v42, %v9964_v49  ;;  %v5656_v35 = vrot.slane %v5648_v30, %v9964_v49  ;;  %v6568_v23 = vpop.permute.xlu0 %6567 }
 0x389   :  { %v5649_v13 = vcombine.low %v5640_v34, %v5647_v54 }
 0x38b   :  { %6579 = vperm.xlu1 %9113, %v5468_v20   ;;  %v5663_v1 = vrot.slane %v5649_v13, %v9964_v49  ;;  %v6565_v16 = vpop.permute.xlu0 %6564 }
 0x38d   :  { %v5664_v24 = vcombine.low %v5656_v35, %v5663_v1  ;;  %v6937_v1 = vrot.slane %v6610_v52, %v11731_v22 }
 0x38f   :  { %6582 = vperm.xlu1 %9113, %v5517_v4   ;;  %v6598_v25 = vpop.permute.xlu0 %6597 }
 0x390   :  { %v6917_v58 = vrot.slane %v6598_v25, %v11585_v51  ;;  %v6863_v51 = vrot.slane %v6565_v16, %v12955_v36 }
 0x393   :  { %6585 = vperm.xlu1 %9113, %v5566_v3   ;;  %v6595_v12 = vpop.permute.xlu0 %6594 }
 0x394   :  { %v6913_v26 = vrot.slane %v6595_v12, %v11503_v33 }
 0x396   :  { %v6918_v21 = vsel %vm6652_vm5, %v6917_v58, %v6913_v26 }
 0x397   :  { %6588 = vperm.xlu1 %9113, %v5615_v38   ;;  %v6604_v11 = vpop.permute.xlu0 %6603 }
 0x398   :  { %v6927_v33 = vrot.slane %v6604_v11, %v11647_v48 }
 0x39b   :  { %6591 = vperm.xlu1 %9113, %v5664_v24   ;;  %v6601_v10 = vpop.permute.xlu0 %6600 }
 0x39c   :  { %v6922_v4 = vrot.slane %v6601_v10, %v12951_v14  ;;  %v6854_v14 = vsel %vm6673_vm8, %v6853_v59, %v12212_v27  ;;  %v6868_v27 = vrot.slane %v6568_v23, %v11808_v57  ;;  %v6873_v10 = vrot.slane %v6571_v9, %v12956_v60 }
 0x39e   :  { %v6923_v34 = vsel %vm6659_vm6, %v6922_v4, %v6918_v21 }
 0x39f   :  { %v6607_v44 = vpop.permute.xlu0 %6606  ;;  %v6928_v30 = vsel %vm6666_vm7, %v6927_v33, %v6923_v34  ;;  %v6997_v34 = vrot.slane %v6989_v46, %v9964_v49 }
 0x3a0   :  { %v6932_v54 = vrot.slane %v6607_v44, %v12952_v39  ;;  %v6859_v39 = vsel %vm6680_vm9, %v6858_v5, %v6854_v14 }
 0x3a1   :  { %v6864_v48 = vsel %vm6687_vm10, %v6863_v51, %v6859_v39 }
 0x3a2   :  { %v6933_v13 = vsel %vm6673_vm8, %v6932_v54, %v6928_v30  ;;  %v6869_v12 = vsel %vm6694_vm11, %v6868_v27, %v6864_v48 }
 0x3a3   :  { %v6616_v2 = vpop.permute.xlu0 %6615  ;;  %v6938_v63 = vsel %vm6680_vm9, %v6937_v1, %v6933_v13 }
 0x3a7   :  { %v6613_v53 = vpop.permute.xlu0 %6612 }
 0x3a8   :  { %v6942_v38 = vrot.slane %v6613_v53, %v12955_v36  ;;  %v6947_v36 = vrot.slane %v6616_v2, %v11808_v57 }
 0x3aa   :  { %v6943_v50 = vsel %vm6687_vm10, %v6942_v38, %v6938_v63 }
 0x3ab   :  { %v6619_v37 = vpop.permute.xlu0 %6618  ;;  %v6948_v53 = vsel %vm6694_vm11, %v6947_v36, %v6943_v50 }
 0x3ac   :  { %v6952_v16 = vrot.slane %v6619_v37, %v12956_v60 }
 0x3af   :  { %v6622_v20 = vpop.permute.xlu0 %6621 }
 0x3b0   :  { %v6957_v11 = vrot.slane %v6622_v20, %v11515_v56 }
 0x3b3   :  { %v6625_v45 = vpop.permute.xlu0 %6624 }
 0x3b4   :  { %v6962_v44 = vrot.slane %v6625_v45, %v11933_v43 }
 0x3b7   :  { %v12733_v62 = vpop.permute.xlu0 %6627 }
 0x3b8   :  { %v6967_v37 = vrot.slane %v12733_v62, %v11618_v47 }
 0x3bb   :  { %v6631_v17 = vpop.permute.xlu0 %6630 }
 0x3bc   :  { %v6972_v57 = vrot.slane %v6631_v17, %v11988_v40 }
 0x3bf   :  { %v6634_v3 = vpop.permute.xlu0 %6633 }
 0x3c3   :  { %v6637_v24 = vpop.permute.xlu0 %6636 }
 0x3c7   :  { %v6640_v2 = vpop.permute.xlu0 %6639 }
 0x3ff   :  { %v8302_v55 = vpop.xlane.xlu1 %8301 }
 0x400   :  { %v8303_v19 = vrot.slane %v8302_v55, 4 }
 0x402   :  { %v8304_v7 = vadd.f32 %v8303_v19, %v8302_v55  ;;  %v6953_v55 = vsel %vm6701_vm12, %v6952_v16, %v6948_v53  ;;  %v6982_v19 = vrot.slane %v6637_v24, %v12056_v0 }
 0x403   :  { %v6574_v31 = vpop.permute.xlu1 %6573  ;;  %v6958_v9 = vsel %vm6708_vm13, %v6957_v11, %v6953_v55 }
 0x404   :  { %v8305_v8 = vrot.slane %v8304_v7, 2  ;;  %v6878_v22 = vrot.slane %v6574_v31, %v11515_v56  ;;  %v6874_v56 = vsel %vm6701_vm12, %v6873_v10, %v6869_v12 }
 0x406   :  { %v8306_v42 = vadd.f32 %v8305_v8, %v8304_v7  ;;  %v6879_v45 = vsel %vm6708_vm13, %v6878_v22, %v6874_v56 }
 0x407   :  { %v6577_v18 = vpop.permute.xlu1 %6576 }
 0x408   :  { %v8307_v15 = vrot.slane %v8306_v42, 1  ;;  %v6883_v23 = vrot.slane %v6577_v18, %v11933_v43  ;;  %v6977_v43 = vrot.slane %v6634_v3, %v11691_v41 }
 0x40a   :  { %v8308_v61 = vadd.f32 %v8307_v15, %v8306_v42  ;;  %v6884_v7 = vsel %vm6715_vm14, %v6883_v23, %v6879_v45 }
 0x40b   :  { %v6580_v6 = vpop.permute.xlu1 %6579 }
 0x40c   :  { %9104 = vpush %v8308_v61  ;;  %v6888_v52 = vrot.slane %v6580_v6, %v11618_v47  ;;  %v6963_v47 = vsel %vm6715_vm14, %v6962_v44, %v6958_v9 }
 0x40d   :  { %v6968_v8 = vsel %vm6722_vm15, %v6967_v37, %v6963_v47 }
 0x40e   :  { %v6889_v17 = vsel %vm6722_vm15, %v6888_v52, %v6884_v7  ;;  %v6973_v26 = vsel %vm6729_vm1, %v6972_v57, %v6968_v8 }
 0x40f   :  { %v6583_v35 = vpop.permute.xlu1 %6582 }
 0x410   :  { %v6893_v60 = vrot.slane %v6583_v35, %v11988_v40  ;;  %v6987_v40 = vrot.slane %v6640_v2, %v11779_v28 }
 0x412   :  { %v6894_v42 = vsel %vm6729_vm1, %v6893_v60, %v6889_v17 }
 0x413   :  { %v6586_v25 = vpop.permute.xlu1 %6585 }
 0x414   :  { %v6898_v62 = vrot.slane %v6586_v25, %v11691_v41  ;;  %v6978_v41 = vsel %vm6736_vm2, %v6977_v43, %v6973_v26 }
 0x415   :  { %v6983_v15 = vsel %vm6743_vm3, %v6982_v19, %v6978_v41 }
 0x416   :  { %v6899_v18 = vsel %vm6736_vm2, %v6898_v62, %v6894_v42  ;;  %v6988_v59 = vsel %vm6750_vm4, %v6987_v40, %v6983_v15 }
 0x417   :  { %v6589_v20 = vpop.permute.xlu1 %6588 }
 0x418   :  { %v6903_v31 = vrot.slane %v6589_v20, %v12056_v0 }
 0x41a   :  { %v6904_v0 = vsel %vm6743_vm3, %v6903_v31, %v6899_v18 }
 0x41b   :  { %v6592_v4 = vpop.permute.xlu1 %6591 }
 0x41c   :  { %v6908_v58 = vrot.slane %v6592_v4, %v11779_v28  ;;  %v12990_v28 = vlaneseq }
 0x41e   :  { %v6909_v21 = vsel %vm6750_vm4, %v6908_v58, %v6904_v0  ;;  %vm7015_vm0 = vcmp.lt.s32.totalorder %v12990_v28, 512 }
 0x41f   :  { %v6990_v61 = vcombine.low %v6909_v21, %v6988_v59 }
 0x421   :  { %v7004_v54 = vrot.slane %v6990_v61, %v9964_v49 }
 0x423   :  { %v7005_v3 = vcombine.low %v6997_v34, %v7004_v54 }
 0x425   :  { %v7012_v6 = vrot.slane %v7005_v3, %v9964_v49 }
 0x427   :  { %7017 = vst.msk [vmem:[#allocation2] sm:$0xf] %vm7015_vm0, %v7012_v6 }
 0x428   :  { %9191 = shalt.err (!%p9188_p4)
}
 0x429   :  { %s9192_s20 = scalar_lea.hbm %s12847_s4, 64 }
 0x42a   :  { %p9193_p5 = scmp.ne.s32.totalorder %s12847_s4, %s9192_s20  ;;  %p9196_p6 = scmp.lt.u32.totalorder %s9192_s20, %s12847_s4 }
 0x42c   :  { %p9198_p7 = pnand %p9196_p6, %p9193_p5 }
 0x42e   :  { %9201 = shalt.err (!%p9198_p7)
}
 0x42f   :  { %8456 = dma.vmem_to_hbm [thread:$0]  %s8454_s5, 64, %s12847_s4, [#allocation3]   ;;  %vm8311_vm5 = vcmask 0  }
 0x430   :  { %s9255_s26 = smov [#allocation4]   ;;  %s9256_s28 = smov [#allocation6]  }
 0x431   :  { %s8465_s27 = sshll.u32 %s9255_s26, 4  ;;  %s8475_s29 = sshll.u32 %s9256_s28, 4  ;;  %s8466_s27 = int_to_ptr.vmem [resolvable:$true] %s8465_s27  ;;  %s12811_s29 = int_to_ptr.vmem [resolvable:$true] %s8475_s29 }
 0x432   :  { %s9202_s8 = scalar_lea.vmem %s8466_s27, 16  ;;  %s9206_s9 = scalar_lea.vmem %s8466_s27, 32 }
 0x433   :  { %p9203_p8 = scmp.ne.s32.totalorder %s8466_s27, %s9202_s8  ;;  %p9207_p9 = scmp.lt.s32.totalorder %s8466_s27, %s8466_s27 }
 0x434   :  { %p9208_p10 = scmp.lt.s32.totalorder %s9206_s9, %s9202_s8 }
 0x436   :  { %p9209_p11 = por %p9208_p10, %p9207_p9 }
 0x438   :  { %p9210_p12 = pnand %p9209_p11, %p9203_p8 }
 0x43d   :  { %s9105_s30 = spop %9104 }
 0x43e   :  { %v8310_v49 = vstv %s9105_s30 }
 0x43f   :  { %8312 = vst.msk [vmem:[#allocation4] sm:$0x1] %vm8311_vm5, %v8310_v49 }
 0x440   :  { %9213 = shalt.err (!%p9210_p12)
}
 0x441   :  { %s9214_s1 = scalar_lea.hbm %s12849_s6, 16 }
 0x442   :  { %p9215_p13 = scmp.ne.s32.totalorder %s12849_s6, %s9214_s1  ;;  %p9218_p0 = scmp.lt.u32.totalorder %s9214_s1, %s12849_s6 }
 0x444   :  { %p9220_p1 = pnand %p9218_p0, %p9215_p13 }
 0x446   :  { %9223 = shalt.err (!%p9220_p1)
}
 0x447   :  { %8468 = dma.vmem_to_hbm [thread:$0]  %s8466_s27, 16, %s12849_s6, [#allocation5]  }
 0x448   :  { %s9224_s17 = scalar_lea.vmem %s12811_s29, 16  ;;  %s9228_s0 = scalar_lea.vmem %s12811_s29, 32 }
 0x449   :  { %p9225_p2 = scmp.ne.s32.totalorder %s12811_s29, %s9224_s17  ;;  %p9229_p3 = scmp.lt.s32.totalorder %s12811_s29, %s12811_s29 }
 0x44a   :  { %p9230_p4 = scmp.lt.s32.totalorder %s9228_s0, %s9224_s17 }
 0x44c   :  { %p9231_p5 = por %p9230_p4, %p9229_p3 }
 0x44e   :  { %p9232_p6 = pnand %p9231_p5, %p9225_p2 }
 0x450   :  { %9235 = shalt.err (!%p9232_p6)
}
 0x451   :  { %s9236_s19 = scalar_lea.hbm %s12850_s7, 16 }
 0x452   :  { %p9237_p7 = scmp.ne.s32.totalorder %s12850_s7, %s9236_s19  ;;  %p9240_p8 = scmp.lt.u32.totalorder %s9236_s19, %s12850_s7 }
 0x454   :  { %p9242_p9 = pnand %p9240_p8, %p9237_p7 }
 0x456   :  { %9245 = shalt.err (!%p9242_p9)
}
 0x457   :  { %8478 = dma.vmem_to_hbm [thread:$0]  %s12811_s29, 16, %s12850_s7, [#allocation5]  }
 0x458   :  { %9246 = dma.done.wait [#allocation3], 64  }
 0x459   :  { %9247 = vsyncadd [#allocation3], 4294967232 }
 0x45a   :  { %9248 = dma.done.wait [#allocation5], 32  }
 0x45b   :  { %9249 = vsyncadd [#allocation5], 4294967264 }
 0x45c   :  { %8490 = vsyncpa [#allocation3], 1 }
 0x45d   :  { %8491 = vsyncpa [#allocation5], 1 }

</bundles_post_ra>
